<compile_context>
chip_gen: v7x
topology: tpu7x:2x2x1
jax: 0.10.0
libtpu: 0.0.40
codegen_flags: <defaults>
</compile_context>

<pallas_src>
import functools

import jax
import jax.numpy as jnp
from jax.experimental import pallas as pl
from jax.experimental.pallas import tpu as pltpu


# --------------------------------------------------------------------------
# Fused kernel: (encoder 1x1 conv -> emb_features 1x1 conv) per spatial chunk,
# global-average-pool accumulation, and the enc_fc -> fc_mu -> emb_cnn_code
# head at the last chunk of each batch element.
#
# TODO(synk): the real Encoder()/VAE_CA_NET come from .pth checkpoints whose
# class definitions are not in the provided source; a synthetic stand-in
# (1x1 conv 4->32 + global-avg-pool + FC) with the interface shapes implied by
# the forward is used.  If the real encoder has a bias/BN/ReLU between its
# conv and emb_features (or before the pool), the weight pre-composition and
# the pooled-from-x shortcut must be replaced by two in-kernel matmuls on a
# VMEM-resident (32, TILE_S) intermediate.
# --------------------------------------------------------------------------
def _fused_encoder_kernel(x_ref, w_comb_ref, w_enc_t_ref,
                          w1_ref, b1_ref, w2_ref, b2_ref, w3_ref, b3_ref,
                          feat_ref, code_ref, x_sum_ref, *, inv_s):
    s = pl.program_id(1)

    @pl.when(s == 0)
    def _():
        x_sum_ref[...] = jnp.zeros_like(x_sum_ref)

    x = x_ref[...]                                          # (C_in, TILE_S) f32

    # features chunk: composed channel mix (MXU, f32 accumulate, bf16 store).
    feat_ref[...] = jnp.dot(
        w_comb_ref[...], x,
        preferred_element_type=jnp.float32).astype(feat_ref.dtype)

    # partial spatial sum of x for the global average pool (4-row XLU reduce).
    x_sum_ref[...] += jnp.sum(x, axis=1, keepdims=True)     # (C_in, 1)

    @pl.when(s == pl.num_programs(1) - 1)
    def _():
        # pooled = mean_S(x) @ w_enc^T, done as a VPU weighted sum (no MXU).
        x_mean = x_sum_ref[...] * inv_s                      # (C_in, 1)
        pooled = jnp.sum(x_mean * w_enc_t_ref[...],
                         axis=0, keepdims=True)              # (1, C_mid)
        # Head chain: enc_fc -> fc_mu -> emb_cnn_code (tiny, once per batch).
        h = jnp.dot(pooled, w1_ref[...],
                    preferred_element_type=jnp.float32) + b1_ref[...]
        mu = jnp.dot(h, w2_ref[...],
                     preferred_element_type=jnp.float32) + b2_ref[...]
        code_ref[...] = (jnp.dot(mu, w3_ref[...],
                                 preferred_element_type=jnp.float32)
                         + b3_ref[...]).astype(code_ref.dtype)


def fused_encoder(x_flat, p, *, tile_s=8192, feat_dtype=jnp.bfloat16):
    """x_flat: (B, C_in, S) -> features (B, nef, S) [feat_dtype], cnn_code (B, nef) f32."""
    B, C_in, S = x_flat.shape
    C_mid = p["w_enc_conv"].shape[0]                         # 32
    nef = p["w_emb_feat"].shape[0]

    tile_s = min(tile_s, S)
    assert S % tile_s == 0 and tile_s % 128 == 0, (S, tile_s)
    n_s = S // tile_s

    # No bias / nonlinearity between the two 1x1 convs -> exact composition.
    w_comb = jnp.dot(p["w_emb_feat"], p["w_enc_conv"],
                     preferred_element_type=jnp.float32)     # (nef, C_in)
    w_enc_t = p["w_enc_conv"].T                              # (C_in, C_mid)

    w1 = p["w_enc_fc"];   b1 = p["b_enc_fc"].reshape(1, -1)
    w2 = p["w_fc_mu"];    b2 = p["b_fc_mu"].reshape(1, -1)
    w3 = p["w_emb_code"]; b3 = p["b_emb_code"].reshape(1, -1)
    H, M, N = w1.shape[1], w2.shape[1], w3.shape[1]

    kern = functools.partial(_fused_encoder_kernel, inv_s=1.0 / float(S))
    feat, code = pl.pallas_call(
        kern,
        out_shape=(jax.ShapeDtypeStruct((B, nef, S), feat_dtype),
                   jax.ShapeDtypeStruct((B, 1, N), jnp.float32)),
        grid=(B, n_s),
        in_specs=[
            pl.BlockSpec((None, C_in, tile_s), lambda b, s: (b, 0, s)),
            pl.BlockSpec((nef, C_in),   lambda b, s: (0, 0)),
            pl.BlockSpec((C_in, C_mid), lambda b, s: (0, 0)),
            pl.BlockSpec((C_mid, H),    lambda b, s: (0, 0)),
            pl.BlockSpec((1, H),        lambda b, s: (0, 0)),
            pl.BlockSpec((H, M),        lambda b, s: (0, 0)),
            pl.BlockSpec((1, M),        lambda b, s: (0, 0)),
            pl.BlockSpec((M, N),        lambda b, s: (0, 0)),
            pl.BlockSpec((1, N),        lambda b, s: (0, 0)),
        ],
        out_specs=(
            pl.BlockSpec((None, nef, tile_s), lambda b, s: (b, 0, s)),
            pl.BlockSpec((None, 1, N),        lambda b, s: (b, 0, 0)),
        ),
        scratch_shapes=[pltpu.VMEM((C_in, 1), jnp.float32)],
        compiler_params=pltpu.CompilerParams(
            dimension_semantics=("parallel", "arbitrary"),
            vmem_limit_bytes=32 * 1024 * 1024),
    )(x_flat, w_comb, w_enc_t, w1, b1, w2, b2, w3, b3)
    return feat, code[:, 0, :]


# --------------------------------------------------------------------------
# CNN_ENCODER.forward
# --------------------------------------------------------------------------
def cnn_encoder_forward(x, p, *, feat_dtype=jnp.bfloat16):
    # x = x.view(-1, 4, 32, 32, 32)   (PyTorch NCDHW)
    x = x.reshape(-1, 4, 32, 32, 32)
    B = x.shape[0]
    S = 32 * 32 * 32
    x_flat = x.reshape(B, 4, S)

    nef = p["w_emb_feat"].shape[0]
    feat_flat, cnn_code = fused_encoder(x_flat, p, feat_dtype=feat_dtype)
    features = feat_flat.reshape(B, nef, 32, 32, 32)
    return features, cnn_code


def init_params(key, nef=32, h_dim=256):
    ks = jax.random.split(key, 8)
    initrange = 0.1
    # NOTE: weights stored as (in, out) for x @ W; transpose nn.Linear weights
    # ((out, in)) when loading a real PyTorch checkpoint.
    return {
        # synthetic encoder stand-in params
        "w_enc_conv": jax.random.normal(ks[0], (32, 4), jnp.float32) * 0.05,
        "w_enc_fc":   jax.random.normal(ks[1], (32, h_dim), jnp.float32) * 0.05,
        "b_enc_fc":   jnp.zeros((h_dim,), jnp.float32),
        # fc_mu (from VAE_CA_NET), output dim 512 implied by emb_cnn_code
        "w_fc_mu":    jax.random.normal(ks[2], (h_dim, 512), jnp.float32) * 0.05,
        "b_fc_mu":    jnp.zeros((512,), jnp.float32),
        # emb_features: conv1x1(32, nef), weight ~ U(-0.1, 0.1), no bias
        "w_emb_feat": jax.random.uniform(ks[3], (nef, 32), jnp.float32,
                                         -initrange, initrange),
        # emb_cnn_code: Linear(512, nef), weight ~ U(-0.1, 0.1)
        "w_emb_code": jax.random.uniform(ks[4], (512, nef), jnp.float32,
                                         -initrange, initrange),
        "b_emb_code": jax.random.uniform(ks[5], (nef,), jnp.float32,
                                         -1.0 / 512**0.5, 1.0 / 512**0.5),
    }


if __name__ == "__main__":
    key = jax.random.PRNGKey(0)
    kx, kp = jax.random.split(key)
    nef = 32
    x = jax.random.normal(kx, (2, 4, 32, 32, 32), jnp.float32)
    params = init_params(kp, nef=nef)

    features, cnn_code = jax.jit(cnn_encoder_forward)(x, params)
    jax.block_until_ready((features, cnn_code))

    assert features.shape == (2, nef, 32, 32, 32), features.shape
    assert cnn_code.shape == (2, nef), cnn_code.shape
    print("KERNEL_OK")
</pallas_src>

<mosaic_0001>
module attributes {stable_mosaic.version = 11 : i64} {
  func.func @_fused_encoder_kernel(%arg0: i32, %arg1: i32, %arg2: memref<1x4x8192xf32, #tpu.memory_space<vmem>>, %arg3: memref<32x4xf32, #tpu.memory_space<vmem>>, %arg4: memref<4x32xf32, #tpu.memory_space<vmem>>, %arg5: memref<32x256xf32, #tpu.memory_space<vmem>>, %arg6: memref<1x256xf32, #tpu.memory_space<vmem>>, %arg7: memref<256x512xf32, #tpu.memory_space<vmem>>, %arg8: memref<1x512xf32, #tpu.memory_space<vmem>>, %arg9: memref<512x32xf32, #tpu.memory_space<vmem>>, %arg10: memref<1x32xf32, #tpu.memory_space<vmem>>, %arg11: memref<1x32x8192xbf16, #tpu.memory_space<vmem>>, %arg12: memref<1x1x32xf32, #tpu.memory_space<vmem>>, %arg13: memref<4x1xf32, #tpu.memory_space<vmem>>) attributes {dimension_semantics = [#tpu.dimension_semantics<parallel>, #tpu.dimension_semantics<arbitrary>], iteration_bounds = array<i64: 2, 4>, scalar_prefetch = 0 : i64, scratch_operands = 1 : i64, tpu.core_type = #tpu.core_type<tc>, window_params = [{transform_indices = @transform_0, window_bounds = array<i64: 1, 4, 8192>}, {pipeline_mode = #tpu.pipeline_mode<synchronous>, transform_indices = @transform_1, window_bounds = array<i64: 32, 4>}, {pipeline_mode = #tpu.pipeline_mode<synchronous>, transform_indices = @transform_2, window_bounds = array<i64: 4, 32>}, {pipeline_mode = #tpu.pipeline_mode<synchronous>, transform_indices = @transform_3, window_bounds = array<i64: 32, 256>}, {pipeline_mode = #tpu.pipeline_mode<synchronous>, transform_indices = @transform_4, window_bounds = array<i64: 1, 256>}, {pipeline_mode = #tpu.pipeline_mode<synchronous>, transform_indices = @transform_5, window_bounds = array<i64: 256, 512>}, {pipeline_mode = #tpu.pipeline_mode<synchronous>, transform_indices = @transform_6, window_bounds = array<i64: 1, 512>}, {pipeline_mode = #tpu.pipeline_mode<synchronous>, transform_indices = @transform_7, window_bounds = array<i64: 512, 32>}, {pipeline_mode = #tpu.pipeline_mode<synchronous>, transform_indices = @transform_8, window_bounds = array<i64: 1, 32>}, {transform_indices = @transform_9, window_bounds = array<i64: 1, 32, 8192>}, {transform_indices = @transform_10, window_bounds = array<i64: 1, 1, 32>}]} {
    %c0_i32 = arith.constant 0 : i32
    %0 = arith.cmpi eq, %arg1, %c0_i32 : i32
    %1 = arith.extui %0 : i1 to i32
    %c0_i32_0 = arith.constant 0 : i32
    %2 = arith.cmpi ne, %1, %c0_i32_0 : i32
    scf.if %2 {
      %cst_14 = arith.constant 0.000000e+00 : f32
      %19 = vector.broadcast %cst_14 : f32 to vector<4x1xf32>
      %c0_15 = arith.constant 0 : index
      %c0_16 = arith.constant 0 : index
      %20 = vector.load %arg13[%c0_15, %c0_16] : memref<4x1xf32, #tpu.memory_space<vmem>>, vector<4x1xf32>
      tpu.vector_store %arg13[%c0_15, %c0_16], %19 {strides = array<i32>} : memref<4x1xf32, #tpu.memory_space<vmem>>, vector<4x1xf32>,
    } else {
    }
    %c0 = arith.constant 0 : index
    %c0_1 = arith.constant 0 : index
    %c0_2 = arith.constant 0 : index
    %3 = vector.load %arg2[%c0, %c0_1, %c0_2] : memref<1x4x8192xf32, #tpu.memory_space<vmem>>, vector<1x4x8192xf32>
    %4 = vector.shape_cast %3 : vector<1x4x8192xf32> to vector<4x8192xf32>
    %c0_3 = arith.constant 0 : index
    %c0_4 = arith.constant 0 : index
    %5 = vector.load %arg3[%c0_3, %c0_4] : memref<32x4xf32, #tpu.memory_space<vmem>>, vector<32x4xf32>
    %cst = arith.constant dense<0.000000e+00> : vector<32x8192xf32>
    %6 = tpu.matmul %5, %4, %cst {dimension_numbers = #tpu.dot_dimension_numbers<[1], [0], [0], [1], [0, 0, 1, 1], [], []>} : vector<32x4xf32>, vector<4x8192xf32>, vector<32x8192xf32> -> vector<32x8192xf32>
    %7 = arith.truncf %6 : vector<32x8192xf32> to vector<32x8192xbf16>
    %c0_5 = arith.constant 0 : index
    %c0_6 = arith.constant 0 : index
    %c0_7 = arith.constant 0 : index
    %8 = vector.load %arg11[%c0_5, %c0_6, %c0_7] : memref<1x32x8192xbf16, #tpu.memory_space<vmem>>, vector<1x32x8192xbf16>
    %9 = vector.shape_cast %8 : vector<1x32x8192xbf16> to vector<32x8192xbf16>
    %10 = vector.shape_cast %7 : vector<32x8192xbf16> to vector<1x32x8192xbf16>
    tpu.vector_store %arg11[%c0_5, %c0_6, %c0_7], %10 {strides = array<i32>} : memref<1x32x8192xbf16, #tpu.memory_space<vmem>>, vector<1x32x8192xbf16>,
    %c0_8 = arith.constant 0 : index
    %c0_9 = arith.constant 0 : index
    %11 = vector.load %arg13[%c0_8, %c0_9] : memref<4x1xf32, #tpu.memory_space<vmem>>, vector<4x1xf32>
    %cst_10 = arith.constant dense<0.000000e+00> : vector<4xf32>
    %12 = vector.multi_reduction <add>, %4, %cst_10 [1] : vector<4x8192xf32> to vector<4xf32>
    %13 = vector.shape_cast %12 : vector<4xf32> to vector<4x1xf32>
    %14 = arith.addf %11, %13 : vector<4x1xf32>
    %c0_11 = arith.constant 0 : index
    %c0_12 = arith.constant 0 : index
    %15 = vector.load %arg13[%c0_11, %c0_12] : memref<4x1xf32, #tpu.memory_space<vmem>>, vector<4x1xf32>
    tpu.vector_store %arg13[%c0_11, %c0_12], %14 {strides = array<i32>} : memref<4x1xf32, #tpu.memory_space<vmem>>, vector<4x1xf32>,
    %c3_i32 = arith.constant 3 : i32
    %16 = arith.cmpi eq, %arg1, %c3_i32 : i32
    %17 = arith.extui %16 : i1 to i32
    %c0_i32_13 = arith.constant 0 : i32
    %18 = arith.cmpi ne, %17, %c0_i32_13 : i32
    scf.if %18 {
      %c0_14 = arith.constant 0 : index
      %c0_15 = arith.constant 0 : index
      %19 = vector.load %arg13[%c0_14, %c0_15] : memref<4x1xf32, #tpu.memory_space<vmem>>, vector<4x1xf32>
      %cst_16 = arith.constant 3.05175781E-5 : f32
      %20 = vector.broadcast %cst_16 : f32 to vector<4x1xf32>
      %21 = arith.mulf %19, %20 : vector<4x1xf32>
      %c0_17 = arith.constant 0 : index
      %c0_18 = arith.constant 0 : index
      %22 = vector.load %arg4[%c0_17, %c0_18] : memref<4x32xf32, #tpu.memory_space<vmem>>, vector<4x32xf32>
      %23 = vector.broadcast %21 : vector<4x1xf32> to vector<4x32xf32>
      %24 = arith.mulf %23, %22 : vector<4x32xf32>
      %cst_19 = arith.constant dense<0.000000e+00> : vector<32xf32>
      %25 = vector.multi_reduction <add>, %24, %cst_19 [0] : vector<4x32xf32> to vector<32xf32>
      %26 = vector.shape_cast %25 : vector<32xf32> to vector<1x32xf32>
      %c0_20 = arith.constant 0 : index
      %c0_21 = arith.constant 0 : index
      %27 = vector.load %arg5[%c0_20, %c0_21] : memref<32x256xf32, #tpu.memory_space<vmem>>, vector<32x256xf32>
      %cst_22 = arith.constant dense<0.000000e+00> : vector<1x256xf32>
      %28 = tpu.matmul %26, %27, %cst_22 {dimension_numbers = #tpu.dot_dimension_numbers<[1], [0], [0], [1], [0, 0, 1, 1], [], []>} : vector<1x32xf32>, vector<32x256xf32>, vector<1x256xf32> -> vector<1x256xf32>
      %c0_23 = arith.constant 0 : index
      %c0_24 = arith.constant 0 : index
      %29 = vector.load %arg6[%c0_23, %c0_24] : memref<1x256xf32, #tpu.memory_space<vmem>>, vector<1x256xf32>
      %30 = arith.addf %28, %29 : vector<1x256xf32>
      %c0_25 = arith.constant 0 : index
      %c0_26 = arith.constant 0 : index
      %31 = vector.load %arg7[%c0_25, %c0_26] : memref<256x512xf32, #tpu.memory_space<vmem>>, vector<256x512xf32>
      %cst_27 = arith.constant dense<0.000000e+00> : vector<1x512xf32>
      %32 = tpu.matmul %30, %31, %cst_27 {dimension_numbers = #tpu.dot_dimension_numbers<[1], [0], [0], [1], [0, 0, 1, 1], [], []>} : vector<1x256xf32>, vector<256x512xf32>, vector<1x512xf32> -> vector<1x512xf32>
      %c0_28 = arith.constant 0 : index
      %c0_29 = arith.constant 0 : index
      %33 = vector.load %arg8[%c0_28, %c0_29] : memref<1x512xf32, #tpu.memory_space<vmem>>, vector<1x512xf32>
      %34 = arith.addf %32, %33 : vector<1x512xf32>
      %c0_30 = arith.constant 0 : index
      %c0_31 = arith.constant 0 : index
      %35 = vector.load %arg9[%c0_30, %c0_31] : memref<512x32xf32, #tpu.memory_space<vmem>>, vector<512x32xf32>
      %cst_32 = arith.constant dense<0.000000e+00> : vector<1x32xf32>
      %36 = tpu.matmul %34, %35, %cst_32 {dimension_numbers = #tpu.dot_dimension_numbers<[1], [0], [0], [1], [0, 0, 1, 1], [], []>} : vector<1x512xf32>, vector<512x32xf32>, vector<1x32xf32> -> vector<1x32xf32>
      %c0_33 = arith.constant 0 : index
      %c0_34 = arith.constant 0 : index
      %37 = vector.load %arg10[%c0_33, %c0_34] : memref<1x32xf32, #tpu.memory_space<vmem>>, vector<1x32xf32>
      %38 = arith.addf %36, %37 : vector<1x32xf32>
      %c0_35 = arith.constant 0 : index
      %c0_36 = arith.constant 0 : index
      %c0_37 = arith.constant 0 : index
      %39 = vector.load %arg12[%c0_35, %c0_36, %c0_37] : memref<1x1x32xf32, #tpu.memory_space<vmem>>, vector<1x1x32xf32>
      %40 = vector.shape_cast %39 : vector<1x1x32xf32> to vector<1x32xf32>
      %41 = vector.shape_cast %38 : vector<1x32xf32> to vector<1x1x32xf32>
      tpu.vector_store %arg12[%c0_35, %c0_36, %c0_37], %41 {strides = array<i32>} : memref<1x1x32xf32, #tpu.memory_space<vmem>>, vector<1x1x32xf32>,
    } else {
    }
    return
  }
  func.func @transform_0(%arg0: i32, %arg1: i32) -> (i32, i32, i32) {
    %c0_i32 = arith.constant 0 : i32
    %c0_i32_0 = arith.constant 0 : i32
    return %arg0, %c0_i32, %arg1 : i32, i32, i32
  }
  func.func @transform_1(%arg0: i32, %arg1: i32) -> (i32, i32) {
    %c0_i32 = arith.constant 0 : i32
    %c0_i32_0 = arith.constant 0 : i32
    %c0_i32_1 = arith.constant 0 : i32
    return %c0_i32, %c0_i32_0 : i32, i32
  }
  func.func @transform_2(%arg0: i32, %arg1: i32) -> (i32, i32) {
    %c0_i32 = arith.constant 0 : i32
    %c0_i32_0 = arith.constant 0 : i32
    %c0_i32_1 = arith.constant 0 : i32
    return %c0_i32, %c0_i32_0 : i32, i32
  }
  func.func @transform_3(%arg0: i32, %arg1: i32) -> (i32, i32) {
    %c0_i32 = arith.constant 0 : i32
    %c0_i32_0 = arith.constant 0 : i32
    %c0_i32_1 = arith.constant 0 : i32
    return %c0_i32, %c0_i32_0 : i32, i32
  }
  func.func @transform_4(%arg0: i32, %arg1: i32) -> (i32, i32) {
    %c0_i32 = arith.constant 0 : i32
    %c0_i32_0 = arith.constant 0 : i32
    %c0_i32_1 = arith.constant 0 : i32
    return %c0_i32, %c0_i32_0 : i32, i32
  }
  func.func @transform_5(%arg0: i32, %arg1: i32) -> (i32, i32) {
    %c0_i32 = arith.constant 0 : i32
    %c0_i32_0 = arith.constant 0 : i32
    %c0_i32_1 = arith.constant 0 : i32
    return %c0_i32, %c0_i32_0 : i32, i32
  }
  func.func @transform_6(%arg0: i32, %arg1: i32) -> (i32, i32) {
    %c0_i32 = arith.constant 0 : i32
    %c0_i32_0 = arith.constant 0 : i32
    %c0_i32_1 = arith.constant 0 : i32
    return %c0_i32, %c0_i32_0 : i32, i32
  }
  func.func @transform_7(%arg0: i32, %arg1: i32) -> (i32, i32) {
    %c0_i32 = arith.constant 0 : i32
    %c0_i32_0 = arith.constant 0 : i32
    %c0_i32_1 = arith.constant 0 : i32
    return %c0_i32, %c0_i32_0 : i32, i32
  }
  func.func @transform_8(%arg0: i32, %arg1: i32) -> (i32, i32) {
    %c0_i32 = arith.constant 0 : i32
    %c0_i32_0 = arith.constant 0 : i32
    %c0_i32_1 = arith.constant 0 : i32
    return %c0_i32, %c0_i32_0 : i32, i32
  }
  func.func @transform_9(%arg0: i32, %arg1: i32) -> (i32, i32, i32) {
    %c0_i32 = arith.constant 0 : i32
    %c0_i32_0 = arith.constant 0 : i32
    return %arg0, %c0_i32, %arg1 : i32, i32, i32
  }
  func.func @transform_10(%arg0: i32, %arg1: i32) -> (i32, i32, i32) {
    %c0_i32 = arith.constant 0 : i32
    %c0_i32_0 = arith.constant 0 : i32
    %c0_i32_1 = arith.constant 0 : i32
    return %arg0, %c0_i32, %c0_i32_0 : i32, i32, i32
  }
}

</mosaic_0001>

<bundles_post_ra>
// kernel: cnn_encoder_forward.1
= control target key start
LH: loop header
LB: loop body
LE: loop exit
PB: predicated region body
PF: predicated region fallthrough
CT: control target
= control target key end

     0   :  { %16 = vsyncpa [#allocation5], 0  ;;  %s8438_s0 = inlined_call_operand.vmem [shape: f32[2,4,32768], index: 0, kind: input, shape index: {}]   ;;  %s8439_s1 = inlined_call_operand.vmem [shape: f32[32,4], index: 1, kind: input, shape index: {}]   ;;  %s8440_s2 = inlined_call_operand.vmem [shape: f32[4,32], index: 2, kind: input, shape index: {}]   ;;  %s8441_s3 = inlined_call_operand.vmem [shape: f32[32,256], index: 3, kind: input, shape index: {}]   ;;  %s8442_s4 = inlined_call_operand.vmem [shape: f32[1,256], index: 4, kind: input, shape index: {}]   ;;  %s8443_s5 = inlined_call_operand.vmem [shape: f32[256,512], index: 5, kind: input, shape index: {}]   ;;  %s8444_s6 = inlined_call_operand.vmem [shape: f32[1,512], index: 6, kind: input, shape index: {}]   ;;  %s8445_s7 = inlined_call_operand.vmem [shape: f32[512,32], index: 7, kind: input, shape index: {}]   ;;  %s8446_s8 = inlined_call_operand.vmem [shape: f32[1,32], index: 8, kind: input, shape index: {}]   ;;  %s8447_s9 = inlined_call_operand.vmem [shape: bf16[2,32,32768], index: 9, kind: output, shape index: {0}]   ;;  %s8448_s10 = inlined_call_operand.hbm [shape: f32[2,1,32], index: 10, kind: output, shape index: {1}]  }
   0x1   :  { %18 = vsyncpa [#allocation5 + $0x1], 0  ;;  %s6603_s13 = smov 0   ;;  %s6605_s14 = smov 0  }
   0x2   :  { %s6607_s15 = smov 0   ;;  %s6609_s16 = smov 0  }
   0x3   :  { %s6611_s17 = smov 0   ;;  %s6613_s18 = smov 0  }
   0x4   :  { %s6615_s19 = smov 0   ;;  %s6617_s20 = smov 0  }
   0x5   :  { %s6619_s21 = smov 0   ;;  %s6621_s22 = smov 0  }
   0x6 LB: > { %8458 = sst [smem:[#allocation7_spill]] %s6505_s13  ;;  %s5566_s23 = sadd.s32 4294967295, %s6541_s22   ;;  %s6541_s22 = sphi %s6621_s22, %s24_s22   ;;  %s6537_s21 = sphi %s6619_s21, %s8481_s21   ;;  %s6533_s20 = sphi %s6617_s20, %s8480_s20   ;;  %s6529_s19 = sphi %s6615_s19, %s8479_s19   ;;  %s6525_s18 = sphi %s6613_s18, %s8478_s18   ;;  %s6521_s17 = sphi %s6611_s17, %s8484_s17   ;;  %s6517_s16 = sphi %s6609_s16, %s8476_s16   ;;  %s6513_s15 = sphi %s6607_s15, %s8475_s15   ;;  %s6509_s14 = sphi %s6605_s14, %s8483_s14   ;;  %s6505_s13 = sphi %s6603_s13, %s8482_s13  }
   0x7   : > { %8459 = sst [smem:[#allocation8_spill]] %s6513_s15  ;;  %s5567_s24 = sadd.s32 4294967294, %s6541_s22  }
   0x8   : > { %8460 = sst [smem:[#allocation9_spill]] %s6521_s17  ;;  %s33_s25 = sadd.s32 1, %s6533_s20 }
   0x9   : > { %8461 = sst [smem:[#allocation10_spill]] %s6533_s20  ;;  %s36_s26 = sadd.s32 1, %s6537_s21 }
   0xa   : > { %8462 = sst [smem:[#allocation11_spill]] %s6537_s21  ;;  %p34_p0 = scmp.ge.s32.totalorder %s33_s25, 4 }
   0xb   : > { %s241_s27 = sadd.s32 1, %s6521_s17  ;;  %p251_p1 = scmp.ne.s32.totalorder %s6521_s17, %s6517_s16 }
   0xc   : > { %p252_p2 = scmp.eq.s32.totalorder %s5566_s23, 7  ;;  %s8486_s25 = smov (%p34_p0, %s33_s25), 0 }
   0xd   : > { %8463 = sst [smem:[#allocation12_spill]] %s8486_s25  ;;  %s8488_s26 = smov (!%p34_p0, %s36_s26), %s6537_s21 }
   0xe   : > { %s237_s28 = ssub.s32 %s6533_s20, %s8486_s25  ;;  %p6665_p3 = por %p252_p2, %p251_p1 }
   0xf   : > { %p38_p4 = scmp.ge.s32.totalorder %s8488_s26, 2  ;;  %s267_s30 = sadd.s32 1, %s6513_s15 }
  0x10   : > { %p277_p5 = scmp.ne.s32.totalorder %s6513_s15, %s6509_s14  ;;  %p283_p6 = scmp.ne.s32.totalorder %s6509_s14, %s6505_s13 }
  0x11   : > { %s8490_s26 = smov (%p38_p4, %s8488_s26), 0  ;;  %p284_p8 = scmp.eq.s32.totalorder %s5567_s24, 7 }
  0x12   : > { %8465 = sst [smem:[#allocation13_spill]] %s8490_s26  ;;  %p6676_p7 = por %p277_p5, %p252_p2 }
  0x13   : > { %s236_s12 = ssub.s32 %s6537_s21, %s8490_s26  ;;  %p5570_p9 = scmp.ge.s32.totalorder %s6541_s22, 1 }
  0x14   : > { %s238_s23 = sor.u32 %s237_s28, %s236_s12  ;;  %p265_p10 = scmp.eq.s32.totalorder %s236_s12, 0 }
  0x15   : > { %p239_p11 = scmp.eq.s32.totalorder %s238_s23, 0  ;;  %p6683_p12 = por %p284_p8, %p283_p6 }
  0x16   : > { %s6688_s20 = scalar_select %p265_p10, %s6513_s15, %s267_s30  }
  0x17   : > { %s8467_s25 = scalar_select %p6683_p12, 1, 0 }
  0x18   : > { %8469 = sst [smem:[#allocation15_spill]] %s6688_s20  ;;  %p339_p13 = scmp.lt.s32.totalorder %s6541_s22, 9 }
  0x19   : > { %8468 = sst [smem:[#allocation14_spill]] %s8467_s25 }
  0x1a   : > { %s6691_s13 = scalar_select %p239_p11, %s6521_s17, %s241_s27  }
  0x1b   : > { %p340_p0 = pnand %p5570_p9, %p339_p13 }
  0x1c   : > { %8470 = sst [smem:[#allocation16_spill]] %s6691_s13  ;;  %s375_s24 = sand.u32 (!%p340_p0), 1, %s6517_s16  }
  0x1d   : > { %343 = sbr.rel (%p340_p0) target bundleno = 1367 (0x557), region = 56  ;;  %s8457_s28 = sand.u32 (!%p340_p0), 1, %s6509_s14  }
  0x1e   : > { %s5571_s12 = sshll.u32 (!%p340_p0), %s375_s24, 10  ;;  %s6697_s23 = sshll.u32 (!%p340_p0), %s6525_s18, 6 }
  0x1f   : > { %p385_p1 = scmp.lt.s32.totalorder (!%p340_p0), %s6529_s19, 1  ;;  %p387_p2 = scmp.lt.s32.totalorder (!%p340_p0), %s6697_s23, 255 }
  0x20   : > { %s6708_s25 = scalar_lea.vmem (!%p340_p0), [#allocation3], %s5571_s12  ;;  %s6712_s16 = scalar_lea.vmem (!%p340_p0), [#allocation4], %s8457_s28 }
  0x21   : > { %p5575_p4 = scmp.ne.s32.totalorder (!%p340_p0), %s6525_s18, 0 }
  0x24   : > { %s386_s27 = scalar_select %p385_p1, %s6529_s19, 1 }
  0x25   : > { %s388_s30 = scalar_select %p387_p2, %s6697_s23, 255 }
  0x26   : > { %s5573_s26 = sshll.u32 %s386_s27, 8  ;;  %398 = sbr.rel (%p5575_p4) target bundleno = 45 (0x2d), region = 60  ;;  %vm399_vm0 = vcmask (!%p5575_p4), 3072   ;;  %v6543_v0 = vmov (!%p5575_p4), 0.0  }
  0x27   : > { %s390_s21 = sadd.s32 %s5573_s26, %s388_s30  ;;  %400 = vst.msk [vmem:[#allocation2] sm:$0xf] (!%p5575_p4), %vm399_vm0, %v6543_v0 }
  0x28   : > { %s5574_s13 = sshll.u32 %s390_s21, 2 }
  0x29   : > { %s6706_s15 = scalar_lea.vmem %s8438_s0, %s5574_s13 }
  0x2d PF: > { %v401_v1 = vld [vmem:[%s6706_s15] sm:$0xff]  ;;  %vm514_vm1 = vcmask 1043456   ;;  %v402_v2 = vld [vmem:[%s6706_s15 + $0x8] sm:$0xff]  ;;  %v403_v3 = vld [vmem:[%s6706_s15 + $0x10] sm:$0xff]  ;;  %v6544_v7 = vmov 0.0   ;;  %vm501_vm2 = vcmask 31744  }
  0x2e   : > { %v469_v4 = vcombine.high %v401_v1, %v401_v1  ;;  %v4420_v5 = vsel %vm514_vm1, %v401_v1, 0.0  ;;  %v470_v6 = vcombine.high %v402_v2, %v402_v2  ;;  %707 = vmatprep.mubr.f32.mxu0 %v6544_v7  ;;  %796 = vmatprep.mubr.f32.mxu1 %v6544_v7  ;;  %v404_v8 = vld [vmem:[%s6706_s15 + $0x18] sm:$0xff]  ;;  %v6725_v9 = vld [vmem:[%s8439_s1] sm:$0xff]  ;;  %v471_v10 = vcombine.high %v403_v3, %v403_v3  ;;  %v406_v16 = vld [vmem:[%s6706_s15 + $0x28] sm:$0xff]  ;;  %p5896_p5 = scmp.ne.s32.totalorder %s6525_s18, 3 }
  0x2f   : > { %v472_v11 = vcombine.high %v404_v8, %v404_v8  ;;  %v4423_v13 = vsel %vm514_vm1, %v402_v2, 0.0  ;;  %v405_v15 = vld [vmem:[%s6706_s15 + $0x20] sm:$0xff]  ;;  %v6745_v19 = vld [vmem:[%s8439_s1 + $0x8] sm:$0xff]  ;;  %v4427_v20 = vsel %vm514_vm1, %v403_v3, 0.0  ;;  %v474_v22 = vcombine.high %v406_v16, %v406_v16  ;;  %v6762_v26 = vld [vmem:[%s8439_s1 + $0x10] sm:$0xff] }
  0x30   : > { %5576 = vmatprep.subr.msk.mxu0 %vm514_vm1, %v469_v4  ;;  %v4421_v12 = vsel %vm514_vm1, %v469_v4, 0.0  ;;  %5582 = vmatprep.subr.msk.mxu1 %vm514_vm1, %v470_v6  ;;  %v4425_v17 = vsel %vm514_vm1, %v470_v6, 0.0  ;;  %v473_v21 = vcombine.high %v405_v15, %v405_v15  ;;  %v4429_v24 = vsel %vm514_vm1, %v471_v10, 0.0  ;;  %v6777_v31 = vld [vmem:[%s8439_s1 + $0x18] sm:$0xff]  ;;  %v407_v35 = vld [vmem:[%s6706_s15 + $0x30] sm:$0xff]  ;;  %v409_v50 = vld [vmem:[%s6706_s15 + $0x40] sm:$0xff] }
  0x31   : > { %v4422_v14 = vadd.f32 %v4421_v12, %v4420_v5  ;;  %5577 = vmatpush1.msk.msra.mxu0 %vm514_vm1, %v401_v1  ;;  %5583 = vmatpush1.msk.msra.mxu1 %vm514_vm1, %v402_v2  ;;  %v4431_v27 = vsel %vm514_vm1, %v404_v8, 0.0  ;;  %v4433_v29 = vsel %vm514_vm1, %v472_v11, 0.0  ;;  %v4435_v32 = vsel %vm514_vm1, %v405_v15, 0.0  ;;  %v408_v36 = vld [vmem:[%s6706_s15 + $0x38] sm:$0xff]  ;;  %v410_v56 = vld [vmem:[%s6706_s15 + $0x48] sm:$0xff]  ;;  %v6829_v62 = vld [vmem:[%s6706_s15 + $0x50] sm:$0xff] }
  0x32   : > { %5578 = vmatmul.mubr.msk.f32.vlgmr.msra.gmra.mrb[0].mxu0 %vm501_vm2, %v6725_v9  ;;  %5584 = vmatmul.mubr.msk.f32.vlgmr.msra.gmra.mrb[0].mxu1 %vm501_vm2, %v6725_v9  ;;  %v4437_v34 = vsel %vm514_vm1, %v473_v21, 0.0  ;;  %v4439_v38 = vsel %vm514_vm1, %v406_v16, 0.0  ;;  %v475_v40 = vcombine.high %v407_v35, %v407_v35  ;;  %v476_v41 = vcombine.high %v408_v36, %v408_v36  ;;  %v412_v4 = vld [vmem:[%s6706_s15 + $0x58] sm:$0xff] }
  0x33   : > { %v4424_v18 = vadd.f32 %v4423_v13, %v4422_v14  ;;  %5588 = vmatprep.subr.msk.mxu0 %vm514_vm1, %v471_v10  ;;  %5594 = vmatprep.subr.msk.mxu1 %vm514_vm1, %v472_v11  ;;  %v4441_v42 = vsel %vm514_vm1, %v474_v22, 0.0  ;;  %v4443_v44 = vsel %vm514_vm1, %v407_v35, 0.0  ;;  %v4447_v48 = vsel %vm514_vm1, %v408_v36, 0.0 }
  0x34   : > { %5589 = vmatpush1.msk.msra.mxu0 %vm514_vm1, %v403_v3  ;;  %5595 = vmatpush1.msk.msra.mxu1 %vm514_vm1, %v404_v8  ;;  %v4445_v46 = vsel %vm514_vm1, %v475_v40, 0.0  ;;  %v4449_v51 = vsel %vm514_vm1, %v476_v41, 0.0  ;;  %v477_v53 = vcombine.high %v409_v50, %v409_v50  ;;  %v4451_v54 = vsel %vm514_vm1, %v409_v50, 0.0 }
  0x35   : > { %v4426_v23 = vadd.f32 %v4425_v17, %v4424_v18  ;;  %713 = vmatprep.mubr.f32.mxu0 %v6544_v7  ;;  %802 = vmatprep.mubr.f32.mxu1 %v6544_v7  ;;  %v478_v59 = vcombine.high %v410_v56, %v410_v56  ;;  %v4455_v60 = vsel %vm514_vm1, %v410_v56, 0.0  ;;  %v479_v1 = vcombine.high %v6829_v62, %v6829_v62 }
  0x36   : > { %5579 = vmatmul.mubr.msk.f32.gmra.mrb[2].mxu0 %vm501_vm2, %v6745_v19  ;;  %5585 = vmatmul.mubr.msk.f32.gmra.mrb[2].mxu1 %vm501_vm2, %v6745_v19  ;;  %v4453_v57 = vsel %vm514_vm1, %v477_v53, 0.0  ;;  %v4459_v2 = vsel %vm514_vm1, %v6829_v62, 0.0  ;;  %v480_v8 = vcombine.high %v412_v4, %v412_v4  ;;  %v4463_v10 = vsel %vm514_vm1, %v412_v4, 0.0 }
  0x37   : > { %v4428_v25 = vadd.f32 %v4427_v20, %v4426_v23  ;;  %719 = vmatprep.mubr.f32.mxu0 %v6544_v7  ;;  %808 = vmatprep.mubr.f32.mxu1 %v6544_v7  ;;  %v4457_v63 = vsel %vm514_vm1, %v478_v59, 0.0  ;;  %v4461_v5 = vsel %vm514_vm1, %v479_v1, 0.0  ;;  %vm4550_vm3 = vcmask 3072  }
  0x38   : > { %5600 = vmatprep.subr.msk.mxu0 %vm514_vm1, %v473_v21  ;;  %5606 = vmatprep.subr.msk.mxu1 %vm514_vm1, %v474_v22  ;;  %v4465_v12 = vsel %vm514_vm1, %v480_v8, 0.0  ;;  %v414_v22 = vld [vmem:[%s6706_s15 + $0x68] sm:$0xff]  ;;  %vm4565_vm4 = vcmask (!%p5896_p5), 257024   ;;  %vm4593_vm5 = vcmask (!%p5896_p5), 261120   ;;  %vm5165_vm6 = vcmask (!%p5896_p5), 253952  }
  0x39   : > { %v4430_v28 = vadd.f32 %v4429_v24, %v4428_v25  ;;  %v4471_v23 = vsel %vm514_vm1, %v414_v22, 0.0  ;;  %v482_v24 = vcombine.high %v414_v22, %v414_v22 }
  0x3a   : > { %5580 = vmatmul.mubr.msk.f32.gmra.mrb[4].mxu0 %vm501_vm2, %v6762_v26  ;;  %5586 = vmatmul.mubr.msk.f32.gmra.mrb[4].mxu1 %vm501_vm2, %v6762_v26 }
  0x3b   : > { %v4432_v30 = vadd.f32 %v4431_v27, %v4430_v28  ;;  %725 = vmatprep.mubr.f32.mxu0 %v6544_v7  ;;  %814 = vmatprep.mubr.f32.mxu1 %v6544_v7  ;;  %v4473_v27 = vsel %vm514_vm1, %v482_v24, 0.0 }
  0x3d   : > { %v4434_v33 = vadd.f32 %v4433_v29, %v4432_v30  ;;  %v6902_v29 = vld [vmem:[%s6706_s15 + $0x70] sm:$0xff] }
  0x3e   : > { %5581 = vmatmul.mubr.msk.f32.gmra.mrb[6].mxu0 %vm501_vm2, %v6777_v31  ;;  %5587 = vmatmul.mubr.msk.f32.gmra.mrb[6].mxu1 %vm501_vm2, %v6777_v31  ;;  %v4475_v30 = vsel %vm514_vm1, %v6902_v29, 0.0 }
  0x3f   : > { %885 = vmatprep.mubr.f32.mxu0 %v6544_v7  ;;  %974 = vmatprep.mubr.f32.mxu1 %v6544_v7  ;;  %v4436_v37 = vadd.f32 %v4435_v32, %v4434_v33  ;;  %v483_v32 = vcombine.high %v6902_v29, %v6902_v29 }
  0x41   : > { %v4438_v39 = vadd.f32 %v4437_v34, %v4436_v37  ;;  %v4477_v34 = vsel %vm514_vm1, %v483_v32, 0.0 }
  0x42   : > { %5590 = vmatmul.mubr.msk.f32.vlgmr.msra.gmra.mrb[8].mxu0 %vm501_vm2, %v6725_v9  ;;  %5596 = vmatmul.mubr.msk.f32.vlgmr.msra.gmra.mrb[8].mxu1 %vm501_vm2, %v6725_v9 }
  0x43   : > { %v4440_v43 = vadd.f32 %v4439_v38, %v4438_v39  ;;  %5601 = vmatpush1.msk.msra.mxu0 %vm514_vm1, %v405_v15  ;;  %5607 = vmatpush1.msk.msra.mxu1 %vm514_vm1, %v406_v16  ;;  %v6863_v15 = vld [vmem:[%s6706_s15 + $0x60] sm:$0xff] }
  0x44   : > { %891 = vmatprep.mubr.f32.mxu0 %v6544_v7  ;;  %980 = vmatprep.mubr.f32.mxu1 %v6544_v7  ;;  %v4467_v16 = vsel %vm514_vm1, %v6863_v15, 0.0  ;;  %v481_v17 = vcombine.high %v6863_v15, %v6863_v15 }
  0x45   : > { %v4442_v45 = vadd.f32 %v4441_v42, %v4440_v43  ;;  %5612 = vmatprep.subr.msk.mxu0 %vm514_vm1, %v475_v40  ;;  %5618 = vmatprep.subr.msk.mxu1 %vm514_vm1, %v476_v41  ;;  %v6942_v42 = vld [vmem:[%s6706_s15 + $0x80] sm:$0xff] }
  0x46   : > { %5591 = vmatmul.mubr.msk.f32.gmra.mrb[10].mxu0 %vm501_vm2, %v6745_v19  ;;  %5597 = vmatmul.mubr.msk.f32.gmra.mrb[10].mxu1 %vm501_vm2, %v6745_v19  ;;  %v4469_v20 = vsel %vm514_vm1, %v481_v17, 0.0  ;;  %v4483_v43 = vsel %vm514_vm1, %v6942_v42, 0.0 }
  0x47   : > { %897 = vmatprep.mubr.f32.mxu0 %v6544_v7  ;;  %986 = vmatprep.mubr.f32.mxu1 %v6544_v7  ;;  %v4444_v47 = vadd.f32 %v4443_v44, %v4442_v45  ;;  %v485_v44 = vcombine.high %v6942_v42, %v6942_v42 }
  0x49   : > { %v4446_v49 = vadd.f32 %v4445_v46, %v4444_v47  ;;  %v4485_v46 = vsel %vm514_vm1, %v485_v44, 0.0 }
  0x4a   : > { %5592 = vmatmul.mubr.msk.f32.gmra.mrb[12].mxu0 %vm501_vm2, %v6762_v26  ;;  %5598 = vmatmul.mubr.msk.f32.gmra.mrb[12].mxu1 %vm501_vm2, %v6762_v26 }
  0x4b   : > { %903 = vmatprep.mubr.f32.mxu0 %v6544_v7  ;;  %992 = vmatprep.mubr.f32.mxu1 %v6544_v7  ;;  %v4448_v52 = vadd.f32 %v4447_v48, %v4446_v49  ;;  %v418_v48 = vld [vmem:[%s6706_s15 + $0x88] sm:$0xff] }
  0x4c   : > { %v4487_v49 = vsel %vm514_vm1, %v418_v48, 0.0 }
  0x4d   : > { %v4450_v55 = vadd.f32 %v4449_v51, %v4448_v52 }
  0x4e   : > { %5593 = vmatmul.mubr.msk.f32.gmra.mrb[14].mxu0 %vm501_vm2, %v6777_v31  ;;  %5599 = vmatmul.mubr.msk.f32.gmra.mrb[14].mxu1 %vm501_vm2, %v6777_v31 }
  0x4f   : > { %1063 = vmatprep.mubr.f32.mxu0 %v6544_v7  ;;  %1152 = vmatprep.mubr.f32.mxu1 %v6544_v7  ;;  %v4452_v58 = vadd.f32 %v4451_v54, %v4450_v55  ;;  %v6982_v54 = vld [vmem:[%s6706_s15 + $0x90] sm:$0xff] }
  0x50   : > { %v4491_v55 = vsel %vm514_vm1, %v6982_v54, 0.0 }
  0x51   : > { %v4454_v61 = vadd.f32 %v4453_v57, %v4452_v58 }
  0x52   : > { %5602 = vmatmul.mubr.msk.f32.vlgmr.msra.gmra.mrb[16].mxu0 %vm501_vm2, %v6725_v9  ;;  %5608 = vmatmul.mubr.msk.f32.vlgmr.msra.gmra.mrb[16].mxu1 %vm501_vm2, %v6725_v9 }
  0x53   : > { %5613 = vmatpush1.msk.msra.mxu0 %vm514_vm1, %v407_v35  ;;  %5619 = vmatpush1.msk.msra.mxu1 %vm514_vm1, %v408_v36  ;;  %v4456_v0 = vadd.f32 %v4455_v60, %v4454_v61  ;;  %v416_v36 = vld [vmem:[%s6706_s15 + $0x78] sm:$0xff] }
  0x54   : > { %1069 = vmatprep.mubr.f32.mxu0 %v6544_v7  ;;  %1158 = vmatprep.mubr.f32.mxu1 %v6544_v7  ;;  %v4479_v37 = vsel %vm514_vm1, %v416_v36, 0.0  ;;  %v484_v38 = vcombine.high %v416_v36, %v416_v36  ;;  %v420_v60 = vld [vmem:[%s6706_s15 + $0x98] sm:$0xff] }
  0x55   : > { %5624 = vmatprep.subr.msk.mxu0 %vm514_vm1, %v477_v53  ;;  %5630 = vmatprep.subr.msk.mxu1 %vm514_vm1, %v478_v59  ;;  %v4458_v3 = vadd.f32 %v4457_v63, %v4456_v0  ;;  %v4495_v61 = vsel %vm514_vm1, %v420_v60, 0.0 }
  0x56   : > { %5603 = vmatmul.mubr.msk.f32.gmra.mrb[18].mxu0 %vm501_vm2, %v6745_v19  ;;  %5609 = vmatmul.mubr.msk.f32.gmra.mrb[18].mxu1 %vm501_vm2, %v6745_v19  ;;  %v4481_v40 = vsel %vm514_vm1, %v484_v38, 0.0 }
  0x57   : > { %1075 = vmatprep.mubr.f32.mxu0 %v6544_v7  ;;  %1164 = vmatprep.mubr.f32.mxu1 %v6544_v7  ;;  %v4460_v6 = vadd.f32 %v4459_v2, %v4458_v3  ;;  %v7022_v2 = vld [vmem:[%s6706_s15 + $0xa0] sm:$0xff] }
  0x58   : > { %v4499_v3 = vsel %vm514_vm1, %v7022_v2, 0.0 }
  0x59   : > { %v4462_v11 = vadd.f32 %v4461_v5, %v4460_v6 }
  0x5a   : > { %5604 = vmatmul.mubr.msk.f32.gmra.mrb[20].mxu0 %vm501_vm2, %v6762_v26  ;;  %5610 = vmatmul.mubr.msk.f32.gmra.mrb[20].mxu1 %vm501_vm2, %v6762_v26 }
  0x5b   : > { %1081 = vmatprep.mubr.f32.mxu0 %v6544_v7  ;;  %1170 = vmatprep.mubr.f32.mxu1 %v6544_v7  ;;  %v4464_v13 = vadd.f32 %v4463_v10, %v4462_v11  ;;  %v422_v10 = vld [vmem:[%s6706_s15 + $0xa8] sm:$0xff] }
  0x5c   : > { %v4503_v11 = vsel %vm514_vm1, %v422_v10, 0.0 }
  0x5d   : > { %v4466_v14 = vadd.f32 %v4465_v12, %v4464_v13  ;;  %v490_v12 = vcombine.high %v422_v10, %v422_v10 }
  0x5e   : > { %5605 = vmatmul.mubr.msk.f32.gmra.mrb[22].mxu0 %vm501_vm2, %v6777_v31  ;;  %5611 = vmatmul.mubr.msk.f32.gmra.mrb[22].mxu1 %vm501_vm2, %v6777_v31 }
  0x5f   : > { %1241 = vmatprep.mubr.f32.mxu0 %v6544_v7  ;;  %1330 = vmatprep.mubr.f32.mxu1 %v6544_v7  ;;  %v4468_v18 = vadd.f32 %v4467_v16, %v4466_v14  ;;  %v4505_v14 = vsel %vm514_vm1, %v490_v12, 0.0  ;;  %v7062_v16 = vld [vmem:[%s6706_s15 + $0xb0] sm:$0xff] }
  0x61   : > { %v4470_v21 = vadd.f32 %v4469_v20, %v4468_v18  ;;  %v491_v18 = vcombine.high %v7062_v16, %v7062_v16 }
  0x62   : > { %5614 = vmatmul.mubr.msk.f32.vlgmr.msra.gmra.mrb[24].mxu0 %vm501_vm2, %v6725_v9  ;;  %5620 = vmatmul.mubr.msk.f32.vlgmr.msra.gmra.mrb[24].mxu1 %vm501_vm2, %v6725_v9 }
  0x63   : > { %5625 = vmatpush1.msk.msra.mxu0 %vm514_vm1, %v409_v50  ;;  %5631 = vmatpush1.msk.msra.mxu1 %vm514_vm1, %v410_v56  ;;  %v4472_v25 = vadd.f32 %v4471_v23, %v4470_v21  ;;  %v486_v50 = vcombine.high %v418_v48, %v418_v48  ;;  %v487_v56 = vcombine.high %v6982_v54, %v6982_v54  ;;  %v4509_v21 = vsel %vm514_vm1, %v491_v18, 0.0  ;;  %v424_v23 = vld [vmem:[%s6706_s15 + $0xb8] sm:$0xff] }
  0x64   : > { %1247 = vmatprep.mubr.f32.mxu0 %v6544_v7  ;;  %1336 = vmatprep.mubr.f32.mxu1 %v6544_v7 }
  0x65   : > { %5636 = vmatprep.subr.msk.mxu0 %vm514_vm1, %v479_v1  ;;  %5642 = vmatprep.subr.msk.mxu1 %vm514_vm1, %v480_v8  ;;  %v4474_v28 = vadd.f32 %v4473_v27, %v4472_v25  ;;  %v4489_v52 = vsel %vm514_vm1, %v486_v50, 0.0  ;;  %v4493_v58 = vsel %vm514_vm1, %v487_v56, 0.0  ;;  %v492_v25 = vcombine.high %v424_v23, %v424_v23 }
  0x66   : > { %5615 = vmatmul.mubr.msk.f32.gmra.mrb[26].mxu0 %vm501_vm2, %v6745_v19  ;;  %5621 = vmatmul.mubr.msk.f32.gmra.mrb[26].mxu1 %vm501_vm2, %v6745_v19 }
  0x67   : > { %1253 = vmatprep.mubr.f32.mxu0 %v6544_v7  ;;  %1342 = vmatprep.mubr.f32.mxu1 %v6544_v7  ;;  %v4476_v33 = vadd.f32 %v4475_v30, %v4474_v28  ;;  %v4513_v28 = vsel %vm514_vm1, %v492_v25, 0.0  ;;  %v7102_v30 = vld [vmem:[%s6706_s15 + $0xc0] sm:$0xff] }
  0x69   : > { %v4478_v35 = vadd.f32 %v4477_v34, %v4476_v33  ;;  %v493_v33 = vcombine.high %v7102_v30, %v7102_v30 }
  0x6a   : > { %5616 = vmatmul.mubr.msk.f32.gmra.mrb[28].mxu0 %vm501_vm2, %v6762_v26  ;;  %5622 = vmatmul.mubr.msk.f32.gmra.mrb[28].mxu1 %vm501_vm2, %v6762_v26 }
  0x6b   : > { %1259 = vmatprep.mubr.f32.mxu0 %v6544_v7  ;;  %1348 = vmatprep.mubr.f32.mxu1 %v6544_v7  ;;  %v4480_v39 = vadd.f32 %v4479_v37, %v4478_v35  ;;  %v4517_v35 = vsel %vm514_vm1, %v493_v33, 0.0  ;;  %v426_v37 = vld [vmem:[%s6706_s15 + $0xc8] sm:$0xff] }
  0x6d   : > { %v4482_v41 = vadd.f32 %v4481_v40, %v4480_v39  ;;  %v494_v39 = vcombine.high %v426_v37, %v426_v37 }
  0x6e   : > { %5617 = vmatmul.mubr.msk.f32.gmra.mrb[30].mxu0 %vm501_vm2, %v6777_v31  ;;  %5623 = vmatmul.mubr.msk.f32.gmra.mrb[30].mxu1 %vm501_vm2, %v6777_v31 }
  0x6f   : > { %1419 = vmatprep.mubr.f32.mxu0 %v6544_v7  ;;  %1508 = vmatprep.mubr.f32.mxu1 %v6544_v7  ;;  %v4484_v45 = vadd.f32 %v4483_v43, %v4482_v41  ;;  %v4521_v41 = vsel %vm514_vm1, %v494_v39, 0.0  ;;  %v7142_v43 = vld [vmem:[%s6706_s15 + $0xd0] sm:$0xff] }
  0x71   : > { %v4486_v47 = vadd.f32 %v4485_v46, %v4484_v45  ;;  %v495_v45 = vcombine.high %v7142_v43, %v7142_v43 }
  0x72   : > { %5626 = vmatmul.mubr.msk.f32.vlgmr.msra.gmra.mrb[32].mxu0 %vm501_vm2, %v6725_v9  ;;  %5632 = vmatmul.mubr.msk.f32.vlgmr.msra.gmra.mrb[32].mxu1 %vm501_vm2, %v6725_v9 }
  0x73   : > { %5637 = vmatpush1.msk.msra.mxu0 %vm514_vm1, %v6829_v62  ;;  %5643 = vmatpush1.msk.msra.mxu1 %vm514_vm1, %v412_v4  ;;  %v4488_v51 = vadd.f32 %v4487_v49, %v4486_v47  ;;  %v488_v62 = vcombine.high %v420_v60, %v420_v60  ;;  %v489_v4 = vcombine.high %v7022_v2, %v7022_v2  ;;  %v4525_v47 = vsel %vm514_vm1, %v495_v45, 0.0  ;;  %v7167_v49 = vld [vmem:[%s6706_s15 + $0xd8] sm:$0xff] }
  0x74   : > { %1425 = vmatprep.mubr.f32.mxu0 %v6544_v7  ;;  %1514 = vmatprep.mubr.f32.mxu1 %v6544_v7 }
  0x75   : > { %5648 = vmatprep.subr.msk.mxu0 %vm514_vm1, %v481_v17  ;;  %5654 = vmatprep.subr.msk.mxu1 %vm514_vm1, %v482_v24  ;;  %v4490_v53 = vadd.f32 %v4489_v52, %v4488_v51  ;;  %v4497_v0 = vsel %vm514_vm1, %v488_v62, 0.0  ;;  %v4501_v6 = vsel %vm514_vm1, %v489_v4, 0.0  ;;  %v4507_v17 = vsel %vm514_vm1, %v7062_v16, 0.0 }
  0x76   : > { %5627 = vmatmul.mubr.msk.f32.gmra.mrb[34].mxu0 %vm501_vm2, %v6745_v19  ;;  %5633 = vmatmul.mubr.msk.f32.gmra.mrb[34].mxu1 %vm501_vm2, %v6745_v19  ;;  %v4511_v24 = vsel %vm514_vm1, %v424_v23, 0.0  ;;  %v496_v51 = vcombine.high %v7167_v49, %v7167_v49 }
  0x77   : > { %1431 = vmatprep.mubr.f32.mxu0 %v6544_v7  ;;  %1520 = vmatprep.mubr.f32.mxu1 %v6544_v7  ;;  %v4492_v57 = vadd.f32 %v4491_v55, %v4490_v53  ;;  %v7187_v55 = vld [vmem:[%s6706_s15 + $0xe0] sm:$0xff] }
  0x78   : > { %v4529_v53 = vsel %vm514_vm1, %v496_v51, 0.0 }
  0x79   : > { %v4494_v59 = vadd.f32 %v4493_v58, %v4492_v57  ;;  %v497_v57 = vcombine.high %v7187_v55, %v7187_v55 }
  0x7a   : > { %5628 = vmatmul.mubr.msk.f32.gmra.mrb[36].mxu0 %vm501_vm2, %v6762_v26  ;;  %5634 = vmatmul.mubr.msk.f32.gmra.mrb[36].mxu1 %vm501_vm2, %v6762_v26 }
  0x7b   : > { %1437 = vmatprep.mubr.f32.mxu0 %v6544_v7  ;;  %1526 = vmatprep.mubr.f32.mxu1 %v6544_v7  ;;  %v4496_v63 = vadd.f32 %v4495_v61, %v4494_v59  ;;  %v4533_v59 = vsel %vm514_vm1, %v497_v57, 0.0  ;;  %v430_v61 = vld [vmem:[%s6706_s15 + $0xe8] sm:$0xff] }
  0x7d   : > { %v4498_v1 = vadd.f32 %v4497_v0, %v4496_v63  ;;  %v4535_v63 = vsel %vm514_vm1, %v430_v61, 0.0  ;;  %v7220_v0 = vld [vmem:[%s6706_s15 + $0xf0] sm:$0xff] }
  0x7e   : > { %5629 = vmatmul.mubr.msk.f32.gmra.mrb[38].mxu0 %vm501_vm2, %v6777_v31  ;;  %5635 = vmatmul.mubr.msk.f32.gmra.mrb[38].mxu1 %vm501_vm2, %v6777_v31 }
  0x7f   : > { %1597 = vmatprep.mubr.f32.mxu0 %v6544_v7  ;;  %1686 = vmatprep.mubr.f32.mxu1 %v6544_v7  ;;  %v4500_v5 = vadd.f32 %v4499_v3, %v4498_v1 }
  0x81   : > { %v4502_v8 = vadd.f32 %v4501_v6, %v4500_v5  ;;  %v4539_v5 = vsel %vm514_vm1, %v7220_v0, 0.0  ;;  %v7234_v6 = vld [vmem:[%s6706_s15 + $0xf8] sm:$0xff] }
  0x82   : > { %5638 = vmatmul.mubr.msk.f32.vlgmr.msra.gmra.mrb[40].mxu0 %vm501_vm2, %v6725_v9  ;;  %5644 = vmatmul.mubr.msk.f32.vlgmr.msra.gmra.mrb[40].mxu1 %vm501_vm2, %v6725_v9 }
  0x83   : > { %5649 = vmatpush1.msk.msra.mxu0 %vm514_vm1, %v6863_v15  ;;  %5655 = vmatpush1.msk.msra.mxu1 %vm514_vm1, %v414_v22  ;;  %v4504_v13 = vadd.f32 %v4503_v11, %v4502_v8 }
  0x84   : > { %1603 = vmatprep.mubr.f32.mxu0 %v6544_v7  ;;  %1692 = vmatprep.mubr.f32.mxu1 %v6544_v7 }
  0x85   : > { %5660 = vmatprep.subr.msk.mxu0 %vm514_vm1, %v483_v32  ;;  %5666 = vmatprep.subr.msk.mxu1 %vm514_vm1, %v484_v38  ;;  %v4506_v15 = vadd.f32 %v4505_v14, %v4504_v13  ;;  %v4515_v32 = vsel %vm514_vm1, %v7102_v30, 0.0  ;;  %v4519_v38 = vsel %vm514_vm1, %v426_v37, 0.0  ;;  %v4543_v13 = vsel %vm514_vm1, %v7234_v6, 0.0 }
  0x86   : > { %5639 = vmatmul.mubr.msk.f32.gmra.mrb[42].mxu0 %vm501_vm2, %v6745_v19  ;;  %5645 = vmatmul.mubr.msk.f32.gmra.mrb[42].mxu1 %vm501_vm2, %v6745_v19 }
  0x87   : > { %1609 = vmatprep.mubr.f32.mxu0 %v6544_v7  ;;  %1698 = vmatprep.mubr.f32.mxu1 %v6544_v7  ;;  %v4508_v20 = vadd.f32 %v4507_v17, %v4506_v15 }
  0x89   : > { %v4510_v22 = vadd.f32 %v4509_v21, %v4508_v20 }
  0x8a   : > { %5640 = vmatmul.mubr.msk.f32.gmra.mrb[44].mxu0 %vm501_vm2, %v6762_v26  ;;  %5646 = vmatmul.mubr.msk.f32.gmra.mrb[44].mxu1 %vm501_vm2, %v6762_v26 }
  0x8b   : > { %1615 = vmatprep.mubr.f32.mxu0 %v6544_v7  ;;  %1704 = vmatprep.mubr.f32.mxu1 %v6544_v7  ;;  %v4512_v27 = vadd.f32 %v4511_v24, %v4510_v22 }
  0x8e   : > { %5641 = vmatmul.mubr.msk.f32.gmra.mrb[46].mxu0 %vm501_vm2, %v6777_v31  ;;  %5647 = vmatmul.mubr.msk.f32.gmra.mrb[46].mxu1 %vm501_vm2, %v6777_v31 }
  0x8f   : > { %1775 = vmatprep.mubr.f32.mxu0 %v6544_v7  ;;  %1864 = vmatprep.mubr.f32.mxu1 %v6544_v7 }
  0x92   : > { %5650 = vmatmul.mubr.msk.f32.vlgmr.msra.gmra.mrb[48].mxu0 %vm501_vm2, %v6725_v9  ;;  %5656 = vmatmul.mubr.msk.f32.vlgmr.msra.gmra.mrb[48].mxu1 %vm501_vm2, %v6725_v9 }
  0x93   : > { %5661 = vmatpush1.msk.msra.mxu0 %vm514_vm1, %v6902_v29  ;;  %5667 = vmatpush1.msk.msra.mxu1 %vm514_vm1, %v416_v36  ;;  %v4514_v29 = vadd.f32 %v4513_v28, %v4512_v27 }
  0x94   : > { %1781 = vmatprep.mubr.f32.mxu0 %v6544_v7  ;;  %1870 = vmatprep.mubr.f32.mxu1 %v6544_v7 }
  0x95   : > { %5672 = vmatprep.subr.msk.mxu0 %vm514_vm1, %v485_v44  ;;  %5678 = vmatprep.subr.msk.mxu1 %vm514_vm1, %v486_v50  ;;  %v4516_v34 = vadd.f32 %v4515_v32, %v4514_v29  ;;  %v4523_v44 = vsel %vm514_vm1, %v7142_v43, 0.0  ;;  %v4527_v50 = vsel %vm514_vm1, %v7167_v49, 0.0 }
  0x96   : > { %5651 = vmatmul.mubr.msk.f32.gmra.mrb[50].mxu0 %vm501_vm2, %v6745_v19  ;;  %5657 = vmatmul.mubr.msk.f32.gmra.mrb[50].mxu1 %vm501_vm2, %v6745_v19 }
  0x97   : > { %1787 = vmatprep.mubr.f32.mxu0 %v6544_v7  ;;  %1876 = vmatprep.mubr.f32.mxu1 %v6544_v7  ;;  %v4518_v36 = vadd.f32 %v4517_v35, %v4516_v34 }
  0x99   : > { %v4520_v40 = vadd.f32 %v4519_v38, %v4518_v36 }
  0x9a   : > { %5652 = vmatmul.mubr.msk.f32.gmra.mrb[52].mxu0 %vm501_vm2, %v6762_v26  ;;  %5658 = vmatmul.mubr.msk.f32.gmra.mrb[52].mxu1 %vm501_vm2, %v6762_v26 }
  0x9b   : > { %1793 = vmatprep.mubr.f32.mxu0 %v6544_v7  ;;  %1882 = vmatprep.mubr.f32.mxu1 %v6544_v7 }
  0x9e   : > { %5653 = vmatmul.mubr.msk.f32.gmra.mrb[54].mxu0 %vm501_vm2, %v6777_v31  ;;  %5659 = vmatmul.mubr.msk.f32.gmra.mrb[54].mxu1 %vm501_vm2, %v6777_v31 }
  0x9f   : > { %1953 = vmatprep.mubr.f32.mxu0 %v6544_v7  ;;  %2042 = vmatprep.mubr.f32.mxu1 %v6544_v7 }
  0xa2   : > { %5662 = vmatmul.mubr.msk.f32.vlgmr.msra.gmra.mrb[56].mxu0 %vm501_vm2, %v6725_v9  ;;  %5668 = vmatmul.mubr.msk.f32.vlgmr.msra.gmra.mrb[56].mxu1 %vm501_vm2, %v6725_v9 }
  0xa3   : > { %5673 = vmatpush1.msk.msra.mxu0 %vm514_vm1, %v6942_v42  ;;  %5679 = vmatpush1.msk.msra.mxu1 %vm514_vm1, %v418_v48  ;;  %v4522_v42 = vadd.f32 %v4521_v41, %v4520_v40 }
  0xa4   : > { %1959 = vmatprep.mubr.f32.mxu0 %v6544_v7  ;;  %2048 = vmatprep.mubr.f32.mxu1 %v6544_v7 }
  0xa5   : > { %5684 = vmatprep.subr.msk.mxu0 %vm514_vm1, %v487_v56  ;;  %5690 = vmatprep.subr.msk.mxu1 %vm514_vm1, %v488_v62  ;;  %v4524_v46 = vadd.f32 %v4523_v44, %v4522_v42  ;;  %v4531_v56 = vsel %vm514_vm1, %v7187_v55, 0.0  ;;  %v498_v62 = vcombine.high %v430_v61, %v430_v61 }
  0xa6   : > { %5663 = vmatmul.mubr.msk.f32.gmra.mrb[58].mxu0 %vm501_vm2, %v6745_v19  ;;  %5669 = vmatmul.mubr.msk.f32.gmra.mrb[58].mxu1 %vm501_vm2, %v6745_v19 }
  0xa7   : > { %1965 = vmatprep.mubr.f32.mxu0 %v6544_v7  ;;  %2054 = vmatprep.mubr.f32.mxu1 %v6544_v7  ;;  %v4526_v48 = vadd.f32 %v4525_v47, %v4524_v46 }
  0xa9   : > { %v4528_v52 = vadd.f32 %v4527_v50, %v4526_v48 }
  0xaa   : > { %5664 = vmatmul.mubr.msk.f32.gmra.mrb[60].mxu0 %vm501_vm2, %v6762_v26  ;;  %5670 = vmatmul.mubr.msk.f32.gmra.mrb[60].mxu1 %vm501_vm2, %v6762_v26 }
  0xab   : > { %1971 = vmatprep.mubr.f32.mxu0 %v6544_v7  ;;  %2060 = vmatprep.mubr.f32.mxu1 %v6544_v7 }
  0xae   : > { %5665 = vmatmul.mubr.msk.f32.gmra.mrb[62].mxu0 %vm501_vm2, %v6777_v31  ;;  %5671 = vmatmul.mubr.msk.f32.gmra.mrb[62].mxu1 %vm501_vm2, %v6777_v31 }
  0xaf   : > { %2131 = vmatprep.mubr.f32.mxu0 %v6544_v7  ;;  %2220 = vmatprep.mubr.f32.mxu1 %v6544_v7 }
  0xb2   : > { %5674 = vmatmul.mubr.msk.f32.vlgmr.msra.gmra.mrb[64].mxu0 %vm501_vm2, %v6725_v9  ;;  %5680 = vmatmul.mubr.msk.f32.vlgmr.msra.gmra.mrb[64].mxu1 %vm501_vm2, %v6725_v9 }
  0xb3   : > { %5685 = vmatpush1.msk.msra.mxu0 %vm514_vm1, %v6982_v54  ;;  %5691 = vmatpush1.msk.msra.mxu1 %vm514_vm1, %v420_v60  ;;  %v4530_v54 = vadd.f32 %v4529_v53, %v4528_v52 }
  0xb4   : > { %2137 = vmatprep.mubr.f32.mxu0 %v6544_v7  ;;  %2226 = vmatprep.mubr.f32.mxu1 %v6544_v7 }
  0xb5   : > { %5696 = vmatprep.subr.msk.mxu0 %vm514_vm1, %v489_v4  ;;  %5702 = vmatprep.subr.msk.mxu1 %vm514_vm1, %v490_v12  ;;  %v4532_v58 = vadd.f32 %v4531_v56, %v4530_v54  ;;  %v499_v4 = vcombine.high %v7220_v0, %v7220_v0  ;;  %v500_v12 = vcombine.high %v7234_v6, %v7234_v6 }
  0xb6   : > { %5675 = vmatmul.mubr.msk.f32.gmra.mrb[66].mxu0 %vm501_vm2, %v6745_v19  ;;  %5681 = vmatmul.mubr.msk.f32.gmra.mrb[66].mxu1 %vm501_vm2, %v6745_v19 }
  0xb7   : > { %2143 = vmatprep.mubr.f32.mxu0 %v6544_v7  ;;  %2232 = vmatprep.mubr.f32.mxu1 %v6544_v7  ;;  %v4534_v60 = vadd.f32 %v4533_v59, %v4532_v58  ;;  %v4545_v15 = vsel %vm514_vm1, %v500_v12, 0.0 }
  0xb9   : > { %v4536_v1 = vadd.f32 %v4535_v63, %v4534_v60  ;;  %v6426_v63 = vld [vmem:[%s8439_s1] sm:$0xff] }
  0xba   : > { %5676 = vmatmul.mubr.msk.f32.gmra.mrb[68].mxu0 %vm501_vm2, %v6762_v26  ;;  %5682 = vmatmul.mubr.msk.f32.gmra.mrb[68].mxu1 %vm501_vm2, %v6762_v26 }
  0xbb   : > { %2149 = vmatprep.mubr.f32.mxu0 %v6544_v7  ;;  %2238 = vmatprep.mubr.f32.mxu1 %v6544_v7 }
  0xbe   : > { %5677 = vmatmul.mubr.msk.f32.gmra.mrb[70].mxu0 %vm501_vm2, %v6777_v31  ;;  %5683 = vmatmul.mubr.msk.f32.gmra.mrb[70].mxu1 %vm501_vm2, %v6777_v31 }
  0xbf   : > { %2309 = vmatprep.mubr.f32.mxu0 %v6544_v7  ;;  %2398 = vmatprep.mubr.f32.mxu1 %v6544_v7 }
  0xc2   : > { %5686 = vmatmul.mubr.msk.f32.vlgmr.msra.gmra.mrb[72].mxu0 %vm501_vm2, %v6725_v9  ;;  %5692 = vmatmul.mubr.msk.f32.vlgmr.msra.gmra.mrb[72].mxu1 %vm501_vm2, %v6725_v9 }
  0xc3   : > { %5697 = vmatpush1.msk.msra.mxu0 %vm514_vm1, %v7022_v2  ;;  %5703 = vmatpush1.msk.msra.mxu1 %vm514_vm1, %v422_v10  ;;  %v4537_v2 = vsel %vm514_vm1, %v498_v62, 0.0  ;;  %v4541_v10 = vsel %vm514_vm1, %v499_v4, 0.0 }
  0xc4   : > { %2315 = vmatprep.mubr.f32.mxu0 %v6544_v7  ;;  %2404 = vmatprep.mubr.f32.mxu1 %v6544_v7  ;;  %v4538_v3 = vadd.f32 %v4537_v2, %v4536_v1 }
  0xc5   : > { %5708 = vmatprep.subr.msk.mxu0 %vm514_vm1, %v491_v18  ;;  %5714 = vmatprep.subr.msk.mxu1 %vm514_vm1, %v492_v25 }
  0xc6   : > { %5687 = vmatmul.mubr.msk.f32.gmra.mrb[74].mxu0 %vm501_vm2, %v6745_v19  ;;  %5693 = vmatmul.mubr.msk.f32.gmra.mrb[74].mxu1 %vm501_vm2, %v6745_v19  ;;  %v4540_v8 = vadd.f32 %v4539_v5, %v4538_v3  ;;  %v6427_v5 = vld [vmem:[%s8439_s1 + $0x8] sm:$0xff] }
  0xc7   : > { %2321 = vmatprep.mubr.f32.mxu0 %v6544_v7  ;;  %2410 = vmatprep.mubr.f32.mxu1 %v6544_v7 }
  0xc8   : > { %v4542_v11 = vadd.f32 %v4541_v10, %v4540_v8 }
  0xca   : > { %5688 = vmatmul.mubr.msk.f32.gmra.mrb[76].mxu0 %vm501_vm2, %v6762_v26  ;;  %5694 = vmatmul.mubr.msk.f32.gmra.mrb[76].mxu1 %vm501_vm2, %v6762_v26  ;;  %v4544_v14 = vadd.f32 %v4543_v13, %v4542_v11 }
  0xcb   : > { %2327 = vmatprep.mubr.f32.mxu0 %v6544_v7  ;;  %2416 = vmatprep.mubr.f32.mxu1 %v6544_v7 }
  0xce   : > { %5689 = vmatmul.mubr.msk.f32.gmra.mrb[78].mxu0 %vm501_vm2, %v6777_v31  ;;  %5695 = vmatmul.mubr.msk.f32.gmra.mrb[78].mxu1 %vm501_vm2, %v6777_v31 }
  0xcf   : > { %2487 = vmatprep.mubr.f32.mxu0 %v6544_v7  ;;  %2576 = vmatprep.mubr.f32.mxu1 %v6544_v7 }
  0xd2   : > { %5698 = vmatmul.mubr.msk.f32.vlgmr.msra.gmra.mrb[80].mxu0 %vm501_vm2, %v6725_v9  ;;  %5704 = vmatmul.mubr.msk.f32.vlgmr.msra.gmra.mrb[80].mxu1 %vm501_vm2, %v6725_v9 }
  0xd3   : > { %5709 = vmatpush1.msk.msra.mxu0 %vm514_vm1, %v7062_v16  ;;  %5715 = vmatpush1.msk.msra.mxu1 %vm514_vm1, %v424_v23  ;;  %v4546_v16 = vadd.f32 %v4545_v15, %v4544_v14  ;;  %v6428_v14 = vld [vmem:[%s8439_s1 + $0x10] sm:$0xff] }
  0xd4   : > { %2493 = vmatprep.mubr.f32.mxu0 %v6544_v7  ;;  %2582 = vmatprep.mubr.f32.mxu1 %v6544_v7 }
  0xd5   : > { %5720 = vmatprep.subr.msk.mxu0 %vm514_vm1, %v493_v33  ;;  %5726 = vmatprep.subr.msk.mxu1 %vm514_vm1, %v494_v39 }
  0xd6   : > { %5699 = vmatmul.mubr.msk.f32.gmra.mrb[82].mxu0 %vm501_vm2, %v6745_v19  ;;  %5705 = vmatmul.mubr.msk.f32.gmra.mrb[82].mxu1 %vm501_vm2, %v6745_v19 }
  0xd7   : > { %2499 = vmatprep.mubr.f32.mxu0 %v6544_v7  ;;  %2588 = vmatprep.mubr.f32.mxu1 %v6544_v7 }
  0xd8   : > { %4547 = vadd.xlane.f32.xlu0 %v4546_v16 }
  0xda   : > { %5700 = vmatmul.mubr.msk.f32.gmra.mrb[84].mxu0 %vm501_vm2, %v6762_v26  ;;  %5706 = vmatmul.mubr.msk.f32.gmra.mrb[84].mxu1 %vm501_vm2, %v6762_v26 }
  0xdb   : > { %2505 = vmatprep.mubr.f32.mxu0 %v6544_v7  ;;  %2594 = vmatprep.mubr.f32.mxu1 %v6544_v7 }
  0xde   : > { %5701 = vmatmul.mubr.msk.f32.gmra.mrb[86].mxu0 %vm501_vm2, %v6777_v31  ;;  %5707 = vmatmul.mubr.msk.f32.gmra.mrb[86].mxu1 %vm501_vm2, %v6777_v31 }
  0xdf   : > { %2665 = vmatprep.mubr.f32.mxu0 %v6544_v7  ;;  %2754 = vmatprep.mubr.f32.mxu1 %v6544_v7 }
  0xe2   : > { %5710 = vmatmul.mubr.msk.f32.vlgmr.msra.gmra.mrb[88].mxu0 %vm501_vm2, %v6725_v9  ;;  %5716 = vmatmul.mubr.msk.f32.vlgmr.msra.gmra.mrb[88].mxu1 %vm501_vm2, %v6725_v9 }
  0xe3   : > { %5721 = vmatpush1.msk.msra.mxu0 %vm514_vm1, %v7102_v30  ;;  %5727 = vmatpush1.msk.msra.mxu1 %vm514_vm1, %v426_v37 }
  0xe4   : > { %2671 = vmatprep.mubr.f32.mxu0 %v6544_v7  ;;  %2760 = vmatprep.mubr.f32.mxu1 %v6544_v7 }
  0xe5   : > { %5732 = vmatprep.subr.msk.mxu0 %vm514_vm1, %v495_v45  ;;  %5738 = vmatprep.subr.msk.mxu1 %vm514_vm1, %v496_v51 }
  0xe6   : > { %5711 = vmatmul.mubr.msk.f32.gmra.mrb[90].mxu0 %vm501_vm2, %v6745_v19  ;;  %5717 = vmatmul.mubr.msk.f32.gmra.mrb[90].mxu1 %vm501_vm2, %v6745_v19 }
  0xe7   : > { %2677 = vmatprep.mubr.f32.mxu0 %v6544_v7  ;;  %2766 = vmatprep.mubr.f32.mxu1 %v6544_v7 }
  0xea   : > { %5712 = vmatmul.mubr.msk.f32.gmra.mrb[92].mxu0 %vm501_vm2, %v6762_v26  ;;  %5718 = vmatmul.mubr.msk.f32.gmra.mrb[92].mxu1 %vm501_vm2, %v6762_v26 }
  0xeb   : > { %2683 = vmatprep.mubr.f32.mxu0 %v6544_v7  ;;  %2772 = vmatprep.mubr.f32.mxu1 %v6544_v7 }
  0xee   : > { %5713 = vmatmul.mubr.msk.f32.gmra.mrb[94].mxu0 %vm501_vm2, %v6777_v31  ;;  %5719 = vmatmul.mubr.msk.f32.gmra.mrb[94].mxu1 %vm501_vm2, %v6777_v31 }
  0xef   : > { %2843 = vmatprep.mubr.f32.mxu0 %v6544_v7  ;;  %2932 = vmatprep.mubr.f32.mxu1 %v6544_v7 }
  0xf2   : > { %5722 = vmatmul.mubr.msk.f32.vlgmr.msra.gmra.mrb[96].mxu0 %vm501_vm2, %v6725_v9  ;;  %5728 = vmatmul.mubr.msk.f32.vlgmr.msra.gmra.mrb[96].mxu1 %vm501_vm2, %v6725_v9 }
  0xf3   : > { %5733 = vmatpush1.msk.msra.mxu0 %vm514_vm1, %v7142_v43  ;;  %5739 = vmatpush1.msk.msra.mxu1 %vm514_vm1, %v7167_v49 }
  0xf4   : > { %2849 = vmatprep.mubr.f32.mxu0 %v6544_v7  ;;  %2938 = vmatprep.mubr.f32.mxu1 %v6544_v7 }
  0xf5   : > { %5744 = vmatprep.subr.msk.mxu0 %vm514_vm1, %v497_v57  ;;  %5750 = vmatprep.subr.msk.mxu1 %vm514_vm1, %v498_v62 }
  0xf6   : > { %5723 = vmatmul.mubr.msk.f32.gmra.mrb[98].mxu0 %vm501_vm2, %v6745_v19  ;;  %5729 = vmatmul.mubr.msk.f32.gmra.mrb[98].mxu1 %vm501_vm2, %v6745_v19 }
  0xf7   : > { %2855 = vmatprep.mubr.f32.mxu0 %v6544_v7  ;;  %2944 = vmatprep.mubr.f32.mxu1 %v6544_v7 }
  0xfa   : > { %5724 = vmatmul.mubr.msk.f32.gmra.mrb[100].mxu0 %vm501_vm2, %v6762_v26  ;;  %5730 = vmatmul.mubr.msk.f32.gmra.mrb[100].mxu1 %vm501_vm2, %v6762_v26 }
  0xfb   : > { %2861 = vmatprep.mubr.f32.mxu0 %v6544_v7  ;;  %2950 = vmatprep.mubr.f32.mxu1 %v6544_v7 }
  0xfe   : > { %5725 = vmatmul.mubr.msk.f32.gmra.mrb[102].mxu0 %vm501_vm2, %v6777_v31  ;;  %5731 = vmatmul.mubr.msk.f32.gmra.mrb[102].mxu1 %vm501_vm2, %v6777_v31 }
  0xff   : > { %3021 = vmatprep.mubr.f32.mxu0 %v6544_v7  ;;  %3110 = vmatprep.mubr.f32.mxu1 %v6544_v7 }
 0x102   : > { %5734 = vmatmul.mubr.msk.f32.vlgmr.msra.gmra.mrb[104].mxu0 %vm501_vm2, %v6725_v9  ;;  %5740 = vmatmul.mubr.msk.f32.vlgmr.msra.gmra.mrb[104].mxu1 %vm501_vm2, %v6725_v9 }
 0x103   : > { %5745 = vmatpush1.msk.msra.mxu0 %vm514_vm1, %v7187_v55  ;;  %5751 = vmatpush1.msk.msra.mxu1 %vm514_vm1, %v430_v61 }
 0x104   : > { %3027 = vmatprep.mubr.f32.mxu0 %v6544_v7  ;;  %3116 = vmatprep.mubr.f32.mxu1 %v6544_v7 }
 0x105   : > { %v709_v17 = vpop.f32.mrb[0].mxu0  ;;  %v798_v18 = vpop.f32.mrb[0].mxu1  ;;  %5756 = vmatprep.subr.msk.mxu0 %vm514_vm1, %v499_v4  ;;  %5762 = vmatprep.subr.msk.mxu1 %vm514_vm1, %v500_v12 }
 0x106   : > { %v711_v20 = vpop.f32.mrb[1].mxu0  ;;  %v800_v21 = vpop.f32.mrb[1].mxu1  ;;  %5735 = vmatmul.mubr.msk.f32.gmra.mrb[106].mxu0 %vm501_vm2, %v6745_v19  ;;  %5741 = vmatmul.mubr.msk.f32.gmra.mrb[106].mxu1 %vm501_vm2, %v6745_v19 }
 0x107   : > { %v5905_v22 = vpack.c.bf16 %v711_v20, %v709_v17  ;;  %v5906_v23 = vpack.c.bf16 %v800_v21, %v798_v18  ;;  %3033 = vmatprep.mubr.f32.mxu0 %v6544_v7  ;;  %3122 = vmatprep.mubr.f32.mxu1 %v6544_v7 }
 0x109   : > { %4259 = vst [vmem:[%s6708_s25] sm:$0xff] %v5905_v22  ;;  %4260 = vst [vmem:[%s6708_s25 + $0x8] sm:$0xff] %v5906_v23  ;;  %v715_v24 = vpop.f32.mrb[2].mxu0  ;;  %v804_v25 = vpop.f32.mrb[2].mxu1  ;;  %v6429_v22 = vld [vmem:[%s8439_s1 + $0x18] sm:$0xff] }
 0x10a   : > { %v717_v27 = vpop.f32.mrb[3].mxu0  ;;  %v806_v28 = vpop.f32.mrb[3].mxu1  ;;  %5736 = vmatmul.mubr.msk.f32.gmra.mrb[108].mxu0 %vm501_vm2, %v6762_v26  ;;  %5742 = vmatmul.mubr.msk.f32.gmra.mrb[108].mxu1 %vm501_vm2, %v6762_v26 }
 0x10b   : > { %v5937_v29 = vpack.c.bf16 %v717_v27, %v715_v24  ;;  %v5938_v30 = vpack.c.bf16 %v806_v28, %v804_v25  ;;  %3039 = vmatprep.mubr.f32.mxu0 %v6544_v7  ;;  %3128 = vmatprep.mubr.f32.mxu1 %v6544_v7 }
 0x10d   : > { %4291 = vst [vmem:[%s6708_s25 + $0x100] sm:$0xff] %v5937_v29  ;;  %4292 = vst [vmem:[%s6708_s25 + $0x108] sm:$0xff] %v5938_v30  ;;  %v721_v32 = vpop.f32.mrb[4].mxu0  ;;  %v810_v33 = vpop.f32.mrb[4].mxu1 }
 0x10e   : > { %v723_v34 = vpop.f32.mrb[5].mxu0  ;;  %v812_v35 = vpop.f32.mrb[5].mxu1  ;;  %5737 = vmatmul.mubr.msk.f32.gmra.mrb[110].mxu0 %vm501_vm2, %v6777_v31  ;;  %5743 = vmatmul.mubr.msk.f32.gmra.mrb[110].mxu1 %vm501_vm2, %v6777_v31 }
 0x10f   : > { %v5969_v36 = vpack.c.bf16 %v723_v34, %v721_v32  ;;  %v5970_v37 = vpack.c.bf16 %v812_v35, %v810_v33  ;;  %3199 = vmatprep.mubr.f32.mxu0 %v6544_v7  ;;  %3288 = vmatprep.mubr.f32.mxu1 %v6544_v7 }
 0x111   : > { %4323 = vst [vmem:[%s6708_s25 + $0x200] sm:$0xff] %v5969_v36  ;;  %4324 = vst [vmem:[%s6708_s25 + $0x208] sm:$0xff] %v5970_v37  ;;  %v727_v38 = vpop.f32.mrb[6].mxu0  ;;  %v816_v39 = vpop.f32.mrb[6].mxu1 }
 0x112   : > { %v729_v40 = vpop.f32.mrb[7].mxu0  ;;  %v818_v41 = vpop.f32.mrb[7].mxu1  ;;  %5746 = vmatmul.mubr.msk.f32.vlgmr.msra.gmra.mrb[112].mxu0 %vm501_vm2, %v6725_v9  ;;  %5752 = vmatmul.mubr.msk.f32.vlgmr.msra.gmra.mrb[112].mxu1 %vm501_vm2, %v6725_v9 }
 0x113   : > { %v6001_v42 = vpack.c.bf16 %v729_v40, %v727_v38  ;;  %v6002_v43 = vpack.c.bf16 %v818_v41, %v816_v39  ;;  %5757 = vmatpush1.msk.msra.mxu0 %vm514_vm1, %v7220_v0  ;;  %5763 = vmatpush1.msk.msra.mxu1 %vm514_vm1, %v7234_v6 }
 0x114   : > { %3205 = vmatprep.mubr.f32.mxu0 %v6544_v7  ;;  %3294 = vmatprep.mubr.f32.mxu1 %v6544_v7 }
 0x115   : > { %4355 = vst [vmem:[%s6708_s25 + $0x300] sm:$0xff] %v6001_v42  ;;  %4356 = vst [vmem:[%s6708_s25 + $0x308] sm:$0xff] %v6002_v43  ;;  %v887_v44 = vpop.f32.mrb[8].mxu0  ;;  %v976_v45 = vpop.f32.mrb[8].mxu1 }
 0x116   : > { %v889_v46 = vpop.f32.mrb[9].mxu0  ;;  %v978_v9 = vpop.f32.mrb[9].mxu1  ;;  %5747 = vmatmul.mubr.msk.f32.gmra.mrb[114].mxu0 %vm501_vm2, %v6745_v19  ;;  %5753 = vmatmul.mubr.msk.f32.gmra.mrb[114].mxu1 %vm501_vm2, %v6745_v19 }
 0x117   : > { %v5907_v47 = vpack.c.bf16 %v889_v46, %v887_v44  ;;  %v5908_v48 = vpack.c.bf16 %v978_v9, %v976_v45  ;;  %3211 = vmatprep.mubr.f32.mxu0 %v6544_v7  ;;  %3300 = vmatprep.mubr.f32.mxu1 %v6544_v7 }
 0x119   : > { %4261 = vst [vmem:[%s6708_s25 + $0x10] sm:$0xff] %v5907_v47  ;;  %4262 = vst [vmem:[%s6708_s25 + $0x18] sm:$0xff] %v5908_v48  ;;  %v893_v49 = vpop.f32.mrb[10].mxu0  ;;  %v982_v50 = vpop.f32.mrb[10].mxu1 }
 0x11a   : > { %v895_v51 = vpop.f32.mrb[11].mxu0  ;;  %v984_v52 = vpop.f32.mrb[11].mxu1  ;;  %5748 = vmatmul.mubr.msk.f32.gmra.mrb[116].mxu0 %vm501_vm2, %v6762_v26  ;;  %5754 = vmatmul.mubr.msk.f32.gmra.mrb[116].mxu1 %vm501_vm2, %v6762_v26 }
 0x11b   : > { %v5939_v19 = vpack.c.bf16 %v895_v51, %v893_v49  ;;  %v5940_v53 = vpack.c.bf16 %v984_v52, %v982_v50  ;;  %3217 = vmatprep.mubr.f32.mxu0 %v6544_v7  ;;  %3306 = vmatprep.mubr.f32.mxu1 %v6544_v7 }
 0x11d   : > { %4293 = vst [vmem:[%s6708_s25 + $0x110] sm:$0xff] %v5939_v19  ;;  %4294 = vst [vmem:[%s6708_s25 + $0x118] sm:$0xff] %v5940_v53  ;;  %v899_v54 = vpop.f32.mrb[12].mxu0  ;;  %v988_v55 = vpop.f32.mrb[12].mxu1 }
 0x11e   : > { %v901_v56 = vpop.f32.mrb[13].mxu0  ;;  %v990_v57 = vpop.f32.mrb[13].mxu1  ;;  %5749 = vmatmul.mubr.msk.f32.gmra.mrb[118].mxu0 %vm501_vm2, %v6777_v31  ;;  %5755 = vmatmul.mubr.msk.f32.gmra.mrb[118].mxu1 %vm501_vm2, %v6777_v31 }
 0x11f   : > { %v5971_v26 = vpack.c.bf16 %v901_v56, %v899_v54  ;;  %v5972_v58 = vpack.c.bf16 %v990_v57, %v988_v55  ;;  %3377 = vmatprep.mubr.f32.mxu0 %v6544_v7  ;;  %3466 = vmatprep.mubr.f32.mxu1 %v6544_v7 }
 0x121   : > { %4325 = vst [vmem:[%s6708_s25 + $0x210] sm:$0xff] %v5971_v26  ;;  %4326 = vst [vmem:[%s6708_s25 + $0x218] sm:$0xff] %v5972_v58  ;;  %v905_v59 = vpop.f32.mrb[14].mxu0  ;;  %v994_v60 = vpop.f32.mrb[14].mxu1 }
 0x122   : > { %v907_v61 = vpop.f32.mrb[15].mxu0  ;;  %v996_v62 = vpop.f32.mrb[15].mxu1  ;;  %5758 = vmatmul.mubr.msk.f32.vlgmr.msra.gmra.mrb[120].mxu0 %vm501_vm2, %v6426_v63  ;;  %5764 = vmatmul.mubr.msk.f32.vlgmr.msra.gmra.mrb[120].mxu1 %vm501_vm2, %v6426_v63 }
 0x123   : > { %v6003_v31 = vpack.c.bf16 %v907_v61, %v905_v59  ;;  %v6004_v0 = vpack.c.bf16 %v996_v62, %v994_v60  ;;  %3383 = vmatprep.mubr.f32.mxu0 %v6544_v7  ;;  %3472 = vmatprep.mubr.f32.mxu1 %v6544_v7 }
 0x125   : > { %4357 = vst [vmem:[%s6708_s25 + $0x310] sm:$0xff] %v6003_v31  ;;  %4358 = vst [vmem:[%s6708_s25 + $0x318] sm:$0xff] %v6004_v0  ;;  %v1065_v1 = vpop.f32.mrb[16].mxu0  ;;  %v1154_v2 = vpop.f32.mrb[16].mxu1 }
 0x126   : > { %v1067_v3 = vpop.f32.mrb[17].mxu0  ;;  %v1156_v4 = vpop.f32.mrb[17].mxu1  ;;  %5759 = vmatmul.mubr.msk.f32.gmra.mrb[122].mxu0 %vm501_vm2, %v6427_v5  ;;  %5765 = vmatmul.mubr.msk.f32.gmra.mrb[122].mxu1 %vm501_vm2, %v6427_v5 }
 0x127   : > { %v5909_v6 = vpack.c.bf16 %v1067_v3, %v1065_v1  ;;  %v5910_v8 = vpack.c.bf16 %v1156_v4, %v1154_v2  ;;  %3389 = vmatprep.mubr.f32.mxu0 %v6544_v7  ;;  %3478 = vmatprep.mubr.f32.mxu1 %v6544_v7 }
 0x129   : > { %4263 = vst [vmem:[%s6708_s25 + $0x20] sm:$0xff] %v5909_v6  ;;  %4264 = vst [vmem:[%s6708_s25 + $0x28] sm:$0xff] %v5910_v8  ;;  %v1071_v10 = vpop.f32.mrb[18].mxu0  ;;  %v1160_v11 = vpop.f32.mrb[18].mxu1 }
 0x12a   : > { %v1073_v12 = vpop.f32.mrb[19].mxu0  ;;  %v1162_v13 = vpop.f32.mrb[19].mxu1  ;;  %5760 = vmatmul.mubr.msk.f32.gmra.mrb[124].mxu0 %vm501_vm2, %v6428_v14  ;;  %5766 = vmatmul.mubr.msk.f32.gmra.mrb[124].mxu1 %vm501_vm2, %v6428_v14 }
 0x12b   : > { %v5941_v15 = vpack.c.bf16 %v1073_v12, %v1071_v10  ;;  %v5942_v16 = vpack.c.bf16 %v1162_v13, %v1160_v11  ;;  %3395 = vmatprep.mubr.f32.mxu0 %v6544_v7  ;;  %3484 = vmatprep.mubr.f32.mxu1 %v6544_v7 }
 0x12d   : > { %4295 = vst [vmem:[%s6708_s25 + $0x120] sm:$0xff] %v5941_v15  ;;  %4296 = vst [vmem:[%s6708_s25 + $0x128] sm:$0xff] %v5942_v16  ;;  %v1077_v17 = vpop.f32.mrb[20].mxu0  ;;  %v1166_v18 = vpop.f32.mrb[20].mxu1 }
 0x12e   : > { %v1079_v20 = vpop.f32.mrb[21].mxu0  ;;  %v1168_v21 = vpop.f32.mrb[21].mxu1  ;;  %5761 = vmatmul.mubr.msk.f32.gmra.mrb[126].mxu0 %vm501_vm2, %v6429_v22  ;;  %5767 = vmatmul.mubr.msk.f32.gmra.mrb[126].mxu1 %vm501_vm2, %v6429_v22 }
 0x12f   : > { %v5973_v23 = vpack.c.bf16 %v1079_v20, %v1077_v17  ;;  %v5974_v24 = vpack.c.bf16 %v1168_v21, %v1166_v18 }
 0x131   : > { %4327 = vst [vmem:[%s6708_s25 + $0x220] sm:$0xff] %v5973_v23  ;;  %4328 = vst [vmem:[%s6708_s25 + $0x228] sm:$0xff] %v5974_v24  ;;  %v1083_v7 = vpop.f32.mrb[22].mxu0  ;;  %v1172_v25 = vpop.f32.mrb[22].mxu1 }
 0x132   : > { %v1085_v27 = vpop.f32.mrb[23].mxu0  ;;  %v1174_v28 = vpop.f32.mrb[23].mxu1 }
 0x133   : > { %v6005_v29 = vpack.c.bf16 %v1085_v27, %v1083_v7  ;;  %v6006_v30 = vpack.c.bf16 %v1174_v28, %v1172_v25 }
 0x135   : > { %4359 = vst [vmem:[%s6708_s25 + $0x320] sm:$0xff] %v6005_v29  ;;  %4360 = vst [vmem:[%s6708_s25 + $0x328] sm:$0xff] %v6006_v30  ;;  %v1243_v32 = vpop.f32.mrb[24].mxu0  ;;  %v1332_v33 = vpop.f32.mrb[24].mxu1 }
 0x136   : > { %v1245_v34 = vpop.f32.mrb[25].mxu0  ;;  %v1334_v35 = vpop.f32.mrb[25].mxu1 }
 0x137   : > { %v5911_v36 = vpack.c.bf16 %v1245_v34, %v1243_v32  ;;  %v5912_v37 = vpack.c.bf16 %v1334_v35, %v1332_v33 }
 0x139   : > { %4265 = vst [vmem:[%s6708_s25 + $0x30] sm:$0xff] %v5911_v36  ;;  %4266 = vst [vmem:[%s6708_s25 + $0x38] sm:$0xff] %v5912_v37  ;;  %v1249_v38 = vpop.f32.mrb[26].mxu0  ;;  %v1338_v39 = vpop.f32.mrb[26].mxu1 }
 0x13a   : > { %v1251_v40 = vpop.f32.mrb[27].mxu0  ;;  %v1340_v41 = vpop.f32.mrb[27].mxu1 }
 0x13b   : > { %v5943_v42 = vpack.c.bf16 %v1251_v40, %v1249_v38  ;;  %v5944_v43 = vpack.c.bf16 %v1340_v41, %v1338_v39 }
 0x13d   : > { %4297 = vst [vmem:[%s6708_s25 + $0x130] sm:$0xff] %v5943_v42  ;;  %4298 = vst [vmem:[%s6708_s25 + $0x138] sm:$0xff] %v5944_v43  ;;  %v1255_v44 = vpop.f32.mrb[28].mxu0  ;;  %v1344_v45 = vpop.f32.mrb[28].mxu1 }
 0x13e   : > { %v1257_v46 = vpop.f32.mrb[29].mxu0  ;;  %v1346_v9 = vpop.f32.mrb[29].mxu1 }
 0x13f   : > { %v5975_v47 = vpack.c.bf16 %v1257_v46, %v1255_v44  ;;  %v5976_v48 = vpack.c.bf16 %v1346_v9, %v1344_v45 }
 0x141   : > { %4329 = vst [vmem:[%s6708_s25 + $0x230] sm:$0xff] %v5975_v47  ;;  %4330 = vst [vmem:[%s6708_s25 + $0x238] sm:$0xff] %v5976_v48  ;;  %v1261_v49 = vpop.f32.mrb[30].mxu0  ;;  %v1350_v50 = vpop.f32.mrb[30].mxu1 }
 0x142   : > { %v1263_v51 = vpop.f32.mrb[31].mxu0  ;;  %v1352_v52 = vpop.f32.mrb[31].mxu1 }
 0x143   : > { %v6007_v19 = vpack.c.bf16 %v1263_v51, %v1261_v49  ;;  %v6008_v53 = vpack.c.bf16 %v1352_v52, %v1350_v50 }
 0x145   : > { %4361 = vst [vmem:[%s6708_s25 + $0x330] sm:$0xff] %v6007_v19  ;;  %4362 = vst [vmem:[%s6708_s25 + $0x338] sm:$0xff] %v6008_v53  ;;  %v1421_v54 = vpop.f32.mrb[32].mxu0  ;;  %v1510_v55 = vpop.f32.mrb[32].mxu1 }
 0x146   : > { %v1423_v56 = vpop.f32.mrb[33].mxu0  ;;  %v1512_v57 = vpop.f32.mrb[33].mxu1 }
 0x147   : > { %v5913_v26 = vpack.c.bf16 %v1423_v56, %v1421_v54  ;;  %v5914_v58 = vpack.c.bf16 %v1512_v57, %v1510_v55 }
 0x149   : > { %4267 = vst [vmem:[%s6708_s25 + $0x40] sm:$0xff] %v5913_v26  ;;  %4268 = vst [vmem:[%s6708_s25 + $0x48] sm:$0xff] %v5914_v58  ;;  %v1427_v59 = vpop.f32.mrb[34].mxu0  ;;  %v1516_v60 = vpop.f32.mrb[34].mxu1 }
 0x14a   : > { %v1429_v61 = vpop.f32.mrb[35].mxu0  ;;  %v1518_v62 = vpop.f32.mrb[35].mxu1 }
 0x14b   : > { %v5945_v63 = vpack.c.bf16 %v1429_v61, %v1427_v59  ;;  %v5946_v31 = vpack.c.bf16 %v1518_v62, %v1516_v60 }
 0x14d   : > { %4299 = vst [vmem:[%s6708_s25 + $0x140] sm:$0xff] %v5945_v63  ;;  %4300 = vst [vmem:[%s6708_s25 + $0x148] sm:$0xff] %v5946_v31  ;;  %v1433_v0 = vpop.f32.mrb[36].mxu0  ;;  %v1522_v1 = vpop.f32.mrb[36].mxu1 }
 0x14e   : > { %v1435_v2 = vpop.f32.mrb[37].mxu0  ;;  %v1524_v3 = vpop.f32.mrb[37].mxu1 }
 0x14f   : > { %v5977_v4 = vpack.c.bf16 %v1435_v2, %v1433_v0  ;;  %v5978_v5 = vpack.c.bf16 %v1524_v3, %v1522_v1 }
 0x151   : > { %4331 = vst [vmem:[%s6708_s25 + $0x240] sm:$0xff] %v5977_v4  ;;  %4332 = vst [vmem:[%s6708_s25 + $0x248] sm:$0xff] %v5978_v5  ;;  %v1439_v6 = vpop.f32.mrb[38].mxu0  ;;  %v1528_v8 = vpop.f32.mrb[38].mxu1 }
 0x152   : > { %v1441_v10 = vpop.f32.mrb[39].mxu0  ;;  %v1530_v11 = vpop.f32.mrb[39].mxu1 }
 0x153   : > { %v6009_v12 = vpack.c.bf16 %v1441_v10, %v1439_v6  ;;  %v6010_v13 = vpack.c.bf16 %v1530_v11, %v1528_v8 }
 0x155   : > { %4363 = vst [vmem:[%s6708_s25 + $0x340] sm:$0xff] %v6009_v12  ;;  %4364 = vst [vmem:[%s6708_s25 + $0x348] sm:$0xff] %v6010_v13  ;;  %v1599_v14 = vpop.f32.mrb[40].mxu0  ;;  %v1688_v15 = vpop.f32.mrb[40].mxu1 }
 0x156   : > { %v1601_v16 = vpop.f32.mrb[41].mxu0  ;;  %v1690_v17 = vpop.f32.mrb[41].mxu1 }
 0x157   : > { %v5915_v18 = vpack.c.bf16 %v1601_v16, %v1599_v14  ;;  %v5916_v20 = vpack.c.bf16 %v1690_v17, %v1688_v15 }
 0x159   : > { %4269 = vst [vmem:[%s6708_s25 + $0x50] sm:$0xff] %v5915_v18  ;;  %4270 = vst [vmem:[%s6708_s25 + $0x58] sm:$0xff] %v5916_v20  ;;  %v1605_v21 = vpop.f32.mrb[42].mxu0  ;;  %v1694_v22 = vpop.f32.mrb[42].mxu1 }
 0x15a   : > { %v1607_v23 = vpop.f32.mrb[43].mxu0  ;;  %v1696_v24 = vpop.f32.mrb[43].mxu1 }
 0x15b   : > { %v5947_v7 = vpack.c.bf16 %v1607_v23, %v1605_v21  ;;  %v5948_v25 = vpack.c.bf16 %v1696_v24, %v1694_v22 }
 0x15d   : > { %4301 = vst [vmem:[%s6708_s25 + $0x150] sm:$0xff] %v5947_v7  ;;  %4302 = vst [vmem:[%s6708_s25 + $0x158] sm:$0xff] %v5948_v25  ;;  %v1611_v27 = vpop.f32.mrb[44].mxu0  ;;  %v1700_v28 = vpop.f32.mrb[44].mxu1  ;;  %v4387_v7 = vld [vmem:[#allocation2] sm:$0xf] }
 0x15e   : > { %v1613_v29 = vpop.f32.mrb[45].mxu0  ;;  %v1702_v30 = vpop.f32.mrb[45].mxu1 }
 0x15f   : > { %v5979_v32 = vpack.c.bf16 %v1613_v29, %v1611_v27  ;;  %v5980_v33 = vpack.c.bf16 %v1702_v30, %v1700_v28 }
 0x161   : > { %4333 = vst [vmem:[%s6708_s25 + $0x250] sm:$0xff] %v5979_v32  ;;  %4334 = vst [vmem:[%s6708_s25 + $0x258] sm:$0xff] %v5980_v33  ;;  %v1617_v34 = vpop.f32.mrb[46].mxu0  ;;  %v1706_v35 = vpop.f32.mrb[46].mxu1 }
 0x162   : > { %v1619_v36 = vpop.f32.mrb[47].mxu0  ;;  %v1708_v37 = vpop.f32.mrb[47].mxu1 }
 0x163   : > { %v6011_v38 = vpack.c.bf16 %v1619_v36, %v1617_v34  ;;  %v6012_v39 = vpack.c.bf16 %v1708_v37, %v1706_v35 }
 0x165   : > { %4365 = vst [vmem:[%s6708_s25 + $0x350] sm:$0xff] %v6011_v38  ;;  %4366 = vst [vmem:[%s6708_s25 + $0x358] sm:$0xff] %v6012_v39  ;;  %v1777_v40 = vpop.f32.mrb[48].mxu0  ;;  %v1866_v41 = vpop.f32.mrb[48].mxu1 }
 0x166   : > { %v1779_v42 = vpop.f32.mrb[49].mxu0  ;;  %v1868_v43 = vpop.f32.mrb[49].mxu1 }
 0x167   : > { %v5917_v44 = vpack.c.bf16 %v1779_v42, %v1777_v40  ;;  %v5918_v45 = vpack.c.bf16 %v1868_v43, %v1866_v41  ;;  %v4548_v30 = vpop.xlane.xlu0 %4547 }
 0x168   : > { %v4549_v32 = vadd.f32 %v4548_v30, %v4387_v7 }
 0x169   : > { %4271 = vst [vmem:[%s6708_s25 + $0x60] sm:$0xff] %v5917_v44  ;;  %4272 = vst [vmem:[%s6708_s25 + $0x68] sm:$0xff] %v5918_v45  ;;  %v1783_v46 = vpop.f32.mrb[50].mxu0  ;;  %v1872_v9 = vpop.f32.mrb[50].mxu1 }
 0x16a   : > { %v1785_v47 = vpop.f32.mrb[51].mxu0  ;;  %v1874_v48 = vpop.f32.mrb[51].mxu1  ;;  %4551 = vst.msk [vmem:[#allocation2] sm:$0xf] %vm4550_vm3, %v4549_v32 }
 0x16b   : > { %v5949_v49 = vpack.c.bf16 %v1785_v47, %v1783_v46  ;;  %v5950_v50 = vpack.c.bf16 %v1874_v48, %v1872_v9 }
 0x16d   : > { %4303 = vst [vmem:[%s6708_s25 + $0x160] sm:$0xff] %v5949_v49  ;;  %4304 = vst [vmem:[%s6708_s25 + $0x168] sm:$0xff] %v5950_v50  ;;  %v1789_v51 = vpop.f32.mrb[52].mxu0  ;;  %v1878_v52 = vpop.f32.mrb[52].mxu1 }
 0x16e   : > { %v1791_v19 = vpop.f32.mrb[53].mxu0  ;;  %v1880_v53 = vpop.f32.mrb[53].mxu1 }
 0x16f   : > { %v5981_v54 = vpack.c.bf16 %v1791_v19, %v1789_v51  ;;  %v5982_v55 = vpack.c.bf16 %v1880_v53, %v1878_v52 }
 0x171   : > { %4335 = vst [vmem:[%s6708_s25 + $0x260] sm:$0xff] %v5981_v54  ;;  %4336 = vst [vmem:[%s6708_s25 + $0x268] sm:$0xff] %v5982_v55  ;;  %v1795_v56 = vpop.f32.mrb[54].mxu0  ;;  %v1884_v57 = vpop.f32.mrb[54].mxu1 }
 0x172   : > { %v1797_v26 = vpop.f32.mrb[55].mxu0  ;;  %v1886_v58 = vpop.f32.mrb[55].mxu1 }
 0x173   : > { %v6013_v59 = vpack.c.bf16 %v1797_v26, %v1795_v56  ;;  %v6014_v60 = vpack.c.bf16 %v1886_v58, %v1884_v57 }
 0x175   : > { %4367 = vst [vmem:[%s6708_s25 + $0x360] sm:$0xff] %v6013_v59  ;;  %4368 = vst [vmem:[%s6708_s25 + $0x368] sm:$0xff] %v6014_v60  ;;  %v1955_v61 = vpop.f32.mrb[56].mxu0  ;;  %v2044_v62 = vpop.f32.mrb[56].mxu1 }
 0x176   : > { %v1957_v63 = vpop.f32.mrb[57].mxu0  ;;  %v2046_v31 = vpop.f32.mrb[57].mxu1 }
 0x177   : > { %v5919_v0 = vpack.c.bf16 %v1957_v63, %v1955_v61  ;;  %v5920_v1 = vpack.c.bf16 %v2046_v31, %v2044_v62 }
 0x179   : > { %4273 = vst [vmem:[%s6708_s25 + $0x70] sm:$0xff] %v5919_v0  ;;  %4274 = vst [vmem:[%s6708_s25 + $0x78] sm:$0xff] %v5920_v1  ;;  %v1961_v2 = vpop.f32.mrb[58].mxu0  ;;  %v2050_v3 = vpop.f32.mrb[58].mxu1 }
 0x17a   : > { %v1963_v4 = vpop.f32.mrb[59].mxu0  ;;  %v2052_v5 = vpop.f32.mrb[59].mxu1 }
 0x17b   : > { %v5951_v6 = vpack.c.bf16 %v1963_v4, %v1961_v2  ;;  %v5952_v8 = vpack.c.bf16 %v2052_v5, %v2050_v3 }
 0x17d   : > { %4305 = vst [vmem:[%s6708_s25 + $0x170] sm:$0xff] %v5951_v6  ;;  %4306 = vst [vmem:[%s6708_s25 + $0x178] sm:$0xff] %v5952_v8  ;;  %v1967_v10 = vpop.f32.mrb[60].mxu0  ;;  %v2056_v11 = vpop.f32.mrb[60].mxu1 }
 0x17e   : > { %v1969_v12 = vpop.f32.mrb[61].mxu0  ;;  %v2058_v13 = vpop.f32.mrb[61].mxu1 }
 0x17f   : > { %v5983_v14 = vpack.c.bf16 %v1969_v12, %v1967_v10  ;;  %v5984_v15 = vpack.c.bf16 %v2058_v13, %v2056_v11 }
 0x181   : > { %4337 = vst [vmem:[%s6708_s25 + $0x270] sm:$0xff] %v5983_v14  ;;  %4338 = vst [vmem:[%s6708_s25 + $0x278] sm:$0xff] %v5984_v15  ;;  %v1973_v16 = vpop.f32.mrb[62].mxu0  ;;  %v2062_v17 = vpop.f32.mrb[62].mxu1 }
 0x182   : > { %v1975_v18 = vpop.f32.mrb[63].mxu0  ;;  %v2064_v20 = vpop.f32.mrb[63].mxu1 }
 0x183   : > { %v6015_v21 = vpack.c.bf16 %v1975_v18, %v1973_v16  ;;  %v6016_v22 = vpack.c.bf16 %v2064_v20, %v2062_v17 }
 0x185   : > { %4369 = vst [vmem:[%s6708_s25 + $0x370] sm:$0xff] %v6015_v21  ;;  %4370 = vst [vmem:[%s6708_s25 + $0x378] sm:$0xff] %v6016_v22  ;;  %v2133_v23 = vpop.f32.mrb[64].mxu0  ;;  %v2222_v24 = vpop.f32.mrb[64].mxu1 }
 0x186   : > { %v2135_v25 = vpop.f32.mrb[65].mxu0  ;;  %v2224_v27 = vpop.f32.mrb[65].mxu1 }
 0x187   : > { %v5921_v28 = vpack.c.bf16 %v2135_v25, %v2133_v23  ;;  %v5922_v29 = vpack.c.bf16 %v2224_v27, %v2222_v24 }
 0x189   : > { %4275 = vst [vmem:[%s6708_s25 + $0x80] sm:$0xff] %v5921_v28  ;;  %4276 = vst [vmem:[%s6708_s25 + $0x88] sm:$0xff] %v5922_v29  ;;  %v2139_v33 = vpop.f32.mrb[66].mxu0  ;;  %v2228_v34 = vpop.f32.mrb[66].mxu1 }
 0x18a   : > { %v2141_v35 = vpop.f32.mrb[67].mxu0  ;;  %v2230_v36 = vpop.f32.mrb[67].mxu1 }
 0x18b   : > { %v5953_v37 = vpack.c.bf16 %v2141_v35, %v2139_v33  ;;  %v5954_v38 = vpack.c.bf16 %v2230_v36, %v2228_v34 }
 0x18d   : > { %4307 = vst [vmem:[%s6708_s25 + $0x180] sm:$0xff] %v5953_v37  ;;  %4308 = vst [vmem:[%s6708_s25 + $0x188] sm:$0xff] %v5954_v38  ;;  %v2145_v39 = vpop.f32.mrb[68].mxu0  ;;  %v2234_v40 = vpop.f32.mrb[68].mxu1 }
 0x18e   : > { %v2147_v41 = vpop.f32.mrb[69].mxu0  ;;  %v2236_v42 = vpop.f32.mrb[69].mxu1 }
 0x18f   : > { %v5985_v43 = vpack.c.bf16 %v2147_v41, %v2145_v39  ;;  %v5986_v44 = vpack.c.bf16 %v2236_v42, %v2234_v40 }
 0x191   : > { %4339 = vst [vmem:[%s6708_s25 + $0x280] sm:$0xff] %v5985_v43  ;;  %4340 = vst [vmem:[%s6708_s25 + $0x288] sm:$0xff] %v5986_v44  ;;  %v2151_v45 = vpop.f32.mrb[70].mxu0  ;;  %v2240_v46 = vpop.f32.mrb[70].mxu1 }
 0x192   : > { %v2153_v9 = vpop.f32.mrb[71].mxu0  ;;  %v2242_v47 = vpop.f32.mrb[71].mxu1 }
 0x193   : > { %v6017_v48 = vpack.c.bf16 %v2153_v9, %v2151_v45  ;;  %v6018_v49 = vpack.c.bf16 %v2242_v47, %v2240_v46 }
 0x195   : > { %4371 = vst [vmem:[%s6708_s25 + $0x380] sm:$0xff] %v6017_v48  ;;  %4372 = vst [vmem:[%s6708_s25 + $0x388] sm:$0xff] %v6018_v49  ;;  %v2311_v50 = vpop.f32.mrb[72].mxu0  ;;  %v2400_v51 = vpop.f32.mrb[72].mxu1 }
 0x196   : > { %v2313_v52 = vpop.f32.mrb[73].mxu0  ;;  %v2402_v19 = vpop.f32.mrb[73].mxu1 }
 0x197   : > { %v5923_v53 = vpack.c.bf16 %v2313_v52, %v2311_v50  ;;  %v5924_v54 = vpack.c.bf16 %v2402_v19, %v2400_v51 }
 0x199   : > { %4277 = vst [vmem:[%s6708_s25 + $0x90] sm:$0xff] %v5923_v53  ;;  %4278 = vst [vmem:[%s6708_s25 + $0x98] sm:$0xff] %v5924_v54  ;;  %v2317_v55 = vpop.f32.mrb[74].mxu0  ;;  %v2406_v56 = vpop.f32.mrb[74].mxu1 }
 0x19a   : > { %v2319_v57 = vpop.f32.mrb[75].mxu0  ;;  %v2408_v26 = vpop.f32.mrb[75].mxu1 }
 0x19b   : > { %v5955_v58 = vpack.c.bf16 %v2319_v57, %v2317_v55  ;;  %v5956_v59 = vpack.c.bf16 %v2408_v26, %v2406_v56 }
 0x19d   : > { %4309 = vst [vmem:[%s6708_s25 + $0x190] sm:$0xff] %v5955_v58  ;;  %4310 = vst [vmem:[%s6708_s25 + $0x198] sm:$0xff] %v5956_v59  ;;  %v2323_v60 = vpop.f32.mrb[76].mxu0  ;;  %v2412_v61 = vpop.f32.mrb[76].mxu1 }
 0x19e   : > { %v2325_v62 = vpop.f32.mrb[77].mxu0  ;;  %v2414_v63 = vpop.f32.mrb[77].mxu1 }
 0x19f   : > { %v5987_v31 = vpack.c.bf16 %v2325_v62, %v2323_v60  ;;  %v5988_v0 = vpack.c.bf16 %v2414_v63, %v2412_v61 }
 0x1a1   : > { %4341 = vst [vmem:[%s6708_s25 + $0x290] sm:$0xff] %v5987_v31  ;;  %4342 = vst [vmem:[%s6708_s25 + $0x298] sm:$0xff] %v5988_v0  ;;  %v2329_v1 = vpop.f32.mrb[78].mxu0  ;;  %v2418_v2 = vpop.f32.mrb[78].mxu1 }
 0x1a2   : > { %v2331_v3 = vpop.f32.mrb[79].mxu0  ;;  %v2420_v4 = vpop.f32.mrb[79].mxu1 }
 0x1a3   : > { %v6019_v5 = vpack.c.bf16 %v2331_v3, %v2329_v1  ;;  %v6020_v6 = vpack.c.bf16 %v2420_v4, %v2418_v2 }
 0x1a5   : > { %4373 = vst [vmem:[%s6708_s25 + $0x390] sm:$0xff] %v6019_v5  ;;  %4374 = vst [vmem:[%s6708_s25 + $0x398] sm:$0xff] %v6020_v6  ;;  %v2489_v8 = vpop.f32.mrb[80].mxu0  ;;  %v2578_v10 = vpop.f32.mrb[80].mxu1 }
 0x1a6   : > { %v2491_v11 = vpop.f32.mrb[81].mxu0  ;;  %v2580_v12 = vpop.f32.mrb[81].mxu1 }
 0x1a7   : > { %v5925_v13 = vpack.c.bf16 %v2491_v11, %v2489_v8  ;;  %v5926_v14 = vpack.c.bf16 %v2580_v12, %v2578_v10 }
 0x1a9   : > { %4279 = vst [vmem:[%s6708_s25 + $0xa0] sm:$0xff] %v5925_v13  ;;  %4280 = vst [vmem:[%s6708_s25 + $0xa8] sm:$0xff] %v5926_v14  ;;  %v2495_v15 = vpop.f32.mrb[82].mxu0  ;;  %v2584_v16 = vpop.f32.mrb[82].mxu1 }
 0x1aa   : > { %v2497_v17 = vpop.f32.mrb[83].mxu0  ;;  %v2586_v18 = vpop.f32.mrb[83].mxu1 }
 0x1ab   : > { %v5957_v20 = vpack.c.bf16 %v2497_v17, %v2495_v15  ;;  %v5958_v21 = vpack.c.bf16 %v2586_v18, %v2584_v16 }
 0x1ad   : > { %4311 = vst [vmem:[%s6708_s25 + $0x1a0] sm:$0xff] %v5957_v20  ;;  %4312 = vst [vmem:[%s6708_s25 + $0x1a8] sm:$0xff] %v5958_v21  ;;  %v2501_v22 = vpop.f32.mrb[84].mxu0  ;;  %v2590_v23 = vpop.f32.mrb[84].mxu1 }
 0x1ae   : > { %v2503_v24 = vpop.f32.mrb[85].mxu0  ;;  %v2592_v7 = vpop.f32.mrb[85].mxu1 }
 0x1af   : > { %v5989_v25 = vpack.c.bf16 %v2503_v24, %v2501_v22  ;;  %v5990_v27 = vpack.c.bf16 %v2592_v7, %v2590_v23 }
 0x1b1   : > { %4343 = vst [vmem:[%s6708_s25 + $0x2a0] sm:$0xff] %v5989_v25  ;;  %4344 = vst [vmem:[%s6708_s25 + $0x2a8] sm:$0xff] %v5990_v27  ;;  %v2507_v28 = vpop.f32.mrb[86].mxu0  ;;  %v2596_v29 = vpop.f32.mrb[86].mxu1 }
 0x1b2   : > { %v2509_v30 = vpop.f32.mrb[87].mxu0  ;;  %v2598_v32 = vpop.f32.mrb[87].mxu1 }
 0x1b3   : > { %v6021_v33 = vpack.c.bf16 %v2509_v30, %v2507_v28  ;;  %v6022_v34 = vpack.c.bf16 %v2598_v32, %v2596_v29 }
 0x1b5   : > { %4375 = vst [vmem:[%s6708_s25 + $0x3a0] sm:$0xff] %v6021_v33  ;;  %4376 = vst [vmem:[%s6708_s25 + $0x3a8] sm:$0xff] %v6022_v34  ;;  %v2667_v35 = vpop.f32.mrb[88].mxu0  ;;  %v2756_v36 = vpop.f32.mrb[88].mxu1 }
 0x1b6   : > { %v2669_v37 = vpop.f32.mrb[89].mxu0  ;;  %v2758_v38 = vpop.f32.mrb[89].mxu1 }
 0x1b7   : > { %v5927_v39 = vpack.c.bf16 %v2669_v37, %v2667_v35  ;;  %v5928_v40 = vpack.c.bf16 %v2758_v38, %v2756_v36 }
 0x1b9   : > { %4281 = vst [vmem:[%s6708_s25 + $0xb0] sm:$0xff] %v5927_v39  ;;  %4282 = vst [vmem:[%s6708_s25 + $0xb8] sm:$0xff] %v5928_v40  ;;  %v2673_v41 = vpop.f32.mrb[90].mxu0  ;;  %v2762_v42 = vpop.f32.mrb[90].mxu1 }
 0x1ba   : > { %v2675_v43 = vpop.f32.mrb[91].mxu0  ;;  %v2764_v44 = vpop.f32.mrb[91].mxu1 }
 0x1bb   : > { %v5959_v45 = vpack.c.bf16 %v2675_v43, %v2673_v41  ;;  %v5960_v46 = vpack.c.bf16 %v2764_v44, %v2762_v42 }
 0x1bd   : > { %4313 = vst [vmem:[%s6708_s25 + $0x1b0] sm:$0xff] %v5959_v45  ;;  %4314 = vst [vmem:[%s6708_s25 + $0x1b8] sm:$0xff] %v5960_v46  ;;  %v2679_v9 = vpop.f32.mrb[92].mxu0  ;;  %v2768_v47 = vpop.f32.mrb[92].mxu1 }
 0x1be   : > { %v2681_v48 = vpop.f32.mrb[93].mxu0  ;;  %v2770_v49 = vpop.f32.mrb[93].mxu1 }
 0x1bf   : > { %v5991_v50 = vpack.c.bf16 %v2681_v48, %v2679_v9  ;;  %v5992_v51 = vpack.c.bf16 %v2770_v49, %v2768_v47 }
 0x1c1   : > { %4345 = vst [vmem:[%s6708_s25 + $0x2b0] sm:$0xff] %v5991_v50  ;;  %4346 = vst [vmem:[%s6708_s25 + $0x2b8] sm:$0xff] %v5992_v51  ;;  %v2685_v52 = vpop.f32.mrb[94].mxu0  ;;  %v2774_v19 = vpop.f32.mrb[94].mxu1 }
 0x1c2   : > { %v2687_v53 = vpop.f32.mrb[95].mxu0  ;;  %v2776_v54 = vpop.f32.mrb[95].mxu1 }
 0x1c3   : > { %v6023_v55 = vpack.c.bf16 %v2687_v53, %v2685_v52  ;;  %v6024_v56 = vpack.c.bf16 %v2776_v54, %v2774_v19 }
 0x1c5   : > { %4377 = vst [vmem:[%s6708_s25 + $0x3b0] sm:$0xff] %v6023_v55  ;;  %4378 = vst [vmem:[%s6708_s25 + $0x3b8] sm:$0xff] %v6024_v56  ;;  %v2845_v57 = vpop.f32.mrb[96].mxu0  ;;  %v2934_v26 = vpop.f32.mrb[96].mxu1 }
 0x1c6   : > { %v2847_v58 = vpop.f32.mrb[97].mxu0  ;;  %v2936_v59 = vpop.f32.mrb[97].mxu1 }
 0x1c7   : > { %v5929_v60 = vpack.c.bf16 %v2847_v58, %v2845_v57  ;;  %v5930_v61 = vpack.c.bf16 %v2936_v59, %v2934_v26 }
 0x1c9   : > { %4283 = vst [vmem:[%s6708_s25 + $0xc0] sm:$0xff] %v5929_v60  ;;  %4284 = vst [vmem:[%s6708_s25 + $0xc8] sm:$0xff] %v5930_v61  ;;  %v2851_v62 = vpop.f32.mrb[98].mxu0  ;;  %v2940_v63 = vpop.f32.mrb[98].mxu1 }
 0x1ca   : > { %v2853_v31 = vpop.f32.mrb[99].mxu0  ;;  %v2942_v0 = vpop.f32.mrb[99].mxu1 }
 0x1cb   : > { %v5961_v1 = vpack.c.bf16 %v2853_v31, %v2851_v62  ;;  %v5962_v2 = vpack.c.bf16 %v2942_v0, %v2940_v63 }
 0x1cd   : > { %4315 = vst [vmem:[%s6708_s25 + $0x1c0] sm:$0xff] %v5961_v1  ;;  %4316 = vst [vmem:[%s6708_s25 + $0x1c8] sm:$0xff] %v5962_v2  ;;  %v2857_v3 = vpop.f32.mrb[100].mxu0  ;;  %v2946_v4 = vpop.f32.mrb[100].mxu1 }
 0x1ce   : > { %v2859_v5 = vpop.f32.mrb[101].mxu0  ;;  %v2948_v6 = vpop.f32.mrb[101].mxu1 }
 0x1cf   : > { %v5993_v8 = vpack.c.bf16 %v2859_v5, %v2857_v3  ;;  %v5994_v10 = vpack.c.bf16 %v2948_v6, %v2946_v4 }
 0x1d1   : > { %4347 = vst [vmem:[%s6708_s25 + $0x2c0] sm:$0xff] %v5993_v8  ;;  %4348 = vst [vmem:[%s6708_s25 + $0x2c8] sm:$0xff] %v5994_v10  ;;  %v2863_v11 = vpop.f32.mrb[102].mxu0  ;;  %v2952_v12 = vpop.f32.mrb[102].mxu1 }
 0x1d2   : > { %v2865_v13 = vpop.f32.mrb[103].mxu0  ;;  %v2954_v14 = vpop.f32.mrb[103].mxu1 }
 0x1d3   : > { %v6025_v15 = vpack.c.bf16 %v2865_v13, %v2863_v11  ;;  %v6026_v16 = vpack.c.bf16 %v2954_v14, %v2952_v12 }
 0x1d5   : > { %4379 = vst [vmem:[%s6708_s25 + $0x3c0] sm:$0xff] %v6025_v15  ;;  %4380 = vst [vmem:[%s6708_s25 + $0x3c8] sm:$0xff] %v6026_v16  ;;  %v3023_v17 = vpop.f32.mrb[104].mxu0  ;;  %v3112_v18 = vpop.f32.mrb[104].mxu1 }
 0x1d6   : > { %v3025_v20 = vpop.f32.mrb[105].mxu0  ;;  %v3114_v21 = vpop.f32.mrb[105].mxu1 }
 0x1d7   : > { %v5931_v22 = vpack.c.bf16 %v3025_v20, %v3023_v17  ;;  %v5932_v23 = vpack.c.bf16 %v3114_v21, %v3112_v18 }
 0x1d9   : > { %4285 = vst [vmem:[%s6708_s25 + $0xd0] sm:$0xff] %v5931_v22  ;;  %4286 = vst [vmem:[%s6708_s25 + $0xd8] sm:$0xff] %v5932_v23  ;;  %v3029_v24 = vpop.f32.mrb[106].mxu0  ;;  %v3118_v7 = vpop.f32.mrb[106].mxu1 }
 0x1da   : > { %v3031_v25 = vpop.f32.mrb[107].mxu0  ;;  %v3120_v27 = vpop.f32.mrb[107].mxu1 }
 0x1db   : > { %v5963_v28 = vpack.c.bf16 %v3031_v25, %v3029_v24  ;;  %v5964_v29 = vpack.c.bf16 %v3120_v27, %v3118_v7  ;;  %v4556_v25 = vld [vmem:[#allocation2] sm:$0xf] (!%p5896_p5)  ;;  %v6545_v27 = vmov (!%p5896_p5), 0  }
 0x1dc   : > { %6430 = vset.pattern.permute.xlu0 (!%p5896_p5), %v6545_v27  ;;  %v4728_v27 = vld [vmem:[%s8443_s5 + $0x1e0] sm:$0xff] (!%p5896_p5) }
 0x1dd   : > { %4317 = vst [vmem:[%s6708_s25 + $0x1d0] sm:$0xff] %v5963_v28  ;;  %4318 = vst [vmem:[%s6708_s25 + $0x1d8] sm:$0xff] %v5964_v29  ;;  %v3035_v30 = vpop.f32.mrb[108].mxu0  ;;  %v3124_v32 = vpop.f32.mrb[108].mxu1  ;;  %v4557_v28 = vmul.f32 (!%p5896_p5), 3.0517578e-05, %v4556_v25  ;;  %v4574_v29 = vld [vmem:[%s8441_s3 + $0x8] sm:$0xff] (!%p5896_p5) }
 0x1de   : > { %v3037_v33 = vpop.f32.mrb[109].mxu0  ;;  %v3126_v34 = vpop.f32.mrb[109].mxu1  ;;  %v4724_v25 = vld [vmem:[%s8443_s5 + $0x1c0] sm:$0xff] (!%p5896_p5) }
 0x1df   : > { %v5995_v35 = vpack.c.bf16 %v3037_v33, %v3035_v30  ;;  %v5996_v36 = vpack.c.bf16 %v3126_v34, %v3124_v32  ;;  %4561 = vperm.xlu0 (!%p5896_p5), %6430, %v4557_v28   ;;  %v4576_v30 = vld [vmem:[%s8441_s3 + $0x18] sm:$0xff] (!%p5896_p5)  ;;  %v4573_v33 = vld [vmem:[%s8441_s3] sm:$0xff] (!%p5896_p5)  ;;  %v4575_v34 = vld [vmem:[%s8441_s3 + $0x10] sm:$0xff] (!%p5896_p5)  ;;  %v6141_v28 = vpack.c.bf16 (!%p5896_p5), %v4728_v27, %v4724_v25 }
 0x1e0   : > { %v6103_v32 = vpack.c.bf16 (!%p5896_p5), %v4576_v30, %v4574_v29  ;;  %v4733_v29 = vld [vmem:[%s8443_s5 + $0x208] sm:$0xff] (!%p5896_p5)  ;;  %v4691_v25 = vld [vmem:[%s8443_s5 + $0xb8] sm:$0xff] (!%p5896_p5) }
 0x1e1   : > { %4349 = vst [vmem:[%s6708_s25 + $0x2d0] sm:$0xff] %v5995_v35  ;;  %4350 = vst [vmem:[%s6708_s25 + $0x2d8] sm:$0xff] %v5996_v36  ;;  %v3041_v37 = vpop.f32.mrb[110].mxu0  ;;  %v3130_v38 = vpop.f32.mrb[110].mxu1  ;;  %v6105_v35 = vpack.c.bf16 (!%p5896_p5), %v4575_v34, %v4573_v33  ;;  %v4578_v36 = vld [vmem:[%s8441_s3 + $0x28] sm:$0xff] (!%p5896_p5)  ;;  %v4732_v33 = vld [vmem:[%s8443_s5 + $0x200] sm:$0xff] (!%p5896_p5) }
 0x1e2   : > { %v3043_v39 = vpop.f32.mrb[111].mxu0  ;;  %v3132_v40 = vpop.f32.mrb[111].mxu1  ;;  %6104 = vmatprep.subr.bf16.mxu0 (!%p5896_p5), %v6103_v32  ;;  %v4737_v30 = vld [vmem:[%s8443_s5 + $0x228] sm:$0xff] (!%p5896_p5)  ;;  %v4736_v34 = vld [vmem:[%s8443_s5 + $0x220] sm:$0xff] (!%p5896_p5) }
 0x1e3   : > { %v6027_v41 = vpack.c.bf16 %v3043_v39, %v3041_v37  ;;  %v6028_v42 = vpack.c.bf16 %v3132_v40, %v3130_v38  ;;  %6106 = vmatpush1.bf16.msra.mxu0 (!%p5896_p5), %v6105_v35  ;;  %v4580_v37 = vld [vmem:[%s8441_s3 + $0x38] sm:$0xff] (!%p5896_p5)  ;;  %v4577_v39 = vld [vmem:[%s8441_s3 + $0x20] sm:$0xff] (!%p5896_p5)  ;;  %v4579_v40 = vld [vmem:[%s8441_s3 + $0x30] sm:$0xff] (!%p5896_p5)  ;;  %v6143_v32 = vpack.c.bf16 (!%p5896_p5), %v4737_v30, %v4733_v29  ;;  %v6145_v35 = vpack.c.bf16 (!%p5896_p5), %v4736_v34, %v4732_v33 }
 0x1e4   : > { %v6107_v38 = vpack.c.bf16 (!%p5896_p5), %v4580_v37, %v4578_v36  ;;  %v4741_v36 = vld [vmem:[%s8443_s5 + $0x248] sm:$0xff] (!%p5896_p5)  ;;  %v4686_v29 = vld [vmem:[%s8443_s5 + $0x90] sm:$0xff] (!%p5896_p5)  ;;  %v4699_v33 = vld [vmem:[%s8443_s5 + $0xf8] sm:$0xff] (!%p5896_p5) }
 0x1e5   : > { %4381 = vst [vmem:[%s6708_s25 + $0x3d0] sm:$0xff] %v6027_v41  ;;  %4382 = vst [vmem:[%s6708_s25 + $0x3d8] sm:$0xff] %v6028_v42  ;;  %v3201_v43 = vpop.f32.mrb[112].mxu0  ;;  %v3290_v44 = vpop.f32.mrb[112].mxu1  ;;  %v6109_v41 = vpack.c.bf16 (!%p5896_p5), %v4579_v40, %v4577_v39  ;;  %v6546_v42 = vmov (!%p5896_p5), 0.0   ;;  %v4745_v37 = vld [vmem:[%s8443_s5 + $0x268] sm:$0xff] (!%p5896_p5) }
 0x1e6   : > { %v3203_v45 = vpop.f32.mrb[113].mxu0  ;;  %v3292_v46 = vpop.f32.mrb[113].mxu1  ;;  %6108 = vmatprep.subr.bf16.mxu0 (!%p5896_p5), %v6107_v38  ;;  %4661 = vmatprep.mubr.f32.mxu0 (!%p5896_p5), %v6546_v42  ;;  %v6147_v38 = vpack.c.bf16 (!%p5896_p5), %v4745_v37, %v4741_v36  ;;  %v4740_v39 = vld [vmem:[%s8443_s5 + $0x240] sm:$0xff] (!%p5896_p5)  ;;  %v4749_v42 = vld [vmem:[%s8443_s5 + $0x288] sm:$0xff] (!%p5896_p5)  ;;  %v4690_v30 = vld [vmem:[%s8443_s5 + $0xb0] sm:$0xff] (!%p5896_p5) }
 0x1e7   : > { %v5933_v9 = vpack.c.bf16 %v3203_v45, %v3201_v43  ;;  %v5934_v47 = vpack.c.bf16 %v3292_v46, %v3290_v44  ;;  %6110 = vmatpush1.bf16.msra.mxu0 (!%p5896_p5), %v6109_v41  ;;  %v4669_v43 = vld [vmem:[%s8443_s5 + $0x8] sm:$0xff] (!%p5896_p5)  ;;  %v4671_v45 = vld [vmem:[%s8443_s5 + $0x18] sm:$0xff] (!%p5896_p5)  ;;  %v4744_v40 = vld [vmem:[%s8443_s5 + $0x260] sm:$0xff] (!%p5896_p5)  ;;  %v6185_v34 = vpack.c.bf16 (!%p5896_p5), %v4690_v30, %v4686_v29 }
 0x1e8   : > { %v4673_v44 = vld [vmem:[%s8443_s5 + $0x28] sm:$0xff] (!%p5896_p5)  ;;  %v6149_v41 = vpack.c.bf16 (!%p5896_p5), %v4744_v40, %v4740_v39  ;;  %v4694_v36 = vld [vmem:[%s8443_s5 + $0xd0] sm:$0xff] (!%p5896_p5)  ;;  %v4707_v39 = vld [vmem:[%s8443_s5 + $0x138] sm:$0xff] (!%p5896_p5) }
 0x1e9   : > { %4287 = vst [vmem:[%s6708_s25 + $0xe0] sm:$0xff] %v5933_v9  ;;  %4288 = vst [vmem:[%s6708_s25 + $0xe8] sm:$0xff] %v5934_v47  ;;  %v3207_v48 = vpop.f32.mrb[114].mxu0  ;;  %v3296_v49 = vpop.f32.mrb[114].mxu1  ;;  %v6111_v46 = vpack.c.bf16 (!%p5896_p5), %v4673_v44, %v4669_v43  ;;  %v4675_v9 = vld [vmem:[%s8443_s5 + $0x38] sm:$0xff] (!%p5896_p5)  ;;  %v4668_v47 = vld [vmem:[%s8443_s5] sm:$0xff] (!%p5896_p5) }
 0x1ea   : > { %v3209_v50 = vpop.f32.mrb[115].mxu0  ;;  %v3298_v51 = vpop.f32.mrb[115].mxu1  ;;  %v4753_v43 = vld [vmem:[%s8443_s5 + $0x2a8] sm:$0xff] (!%p5896_p5)  ;;  %v4698_v37 = vld [vmem:[%s8443_s5 + $0xf0] sm:$0xff] (!%p5896_p5) }
 0x1eb   : > { %v5965_v52 = vpack.c.bf16 %v3209_v50, %v3207_v48  ;;  %v5966_v19 = vpack.c.bf16 %v3298_v51, %v3296_v49  ;;  %v4672_v48 = vld [vmem:[%s8443_s5 + $0x20] sm:$0xff] (!%p5896_p5)  ;;  %v6175_v49 = vpack.c.bf16 (!%p5896_p5), %v4675_v9, %v4671_v45  ;;  %v4677_v51 = vld [vmem:[%s8443_s5 + $0x48] sm:$0xff] (!%p5896_p5)  ;;  %6112 = vmatprep.subr.bf16.mxu1 (!%p5896_p5), %v6111_v46  ;;  %v6151_v44 = vpack.c.bf16 (!%p5896_p5), %v4753_v43, %v4749_v42  ;;  %v4702_v42 = vld [vmem:[%s8443_s5 + $0x110] sm:$0xff] (!%p5896_p5) }
 0x1ec   : > { %v6113_v50 = vpack.c.bf16 (!%p5896_p5), %v4672_v48, %v4668_v47  ;;  %v4748_v45 = vld [vmem:[%s8443_s5 + $0x280] sm:$0xff] (!%p5896_p5)  ;;  %v4757_v47 = vld [vmem:[%s8443_s5 + $0x2c8] sm:$0xff] (!%p5896_p5)  ;;  %v6189_v40 = vpack.c.bf16 (!%p5896_p5), %v4698_v37, %v4694_v36  ;;  %v4706_v43 = vld [vmem:[%s8443_s5 + $0x130] sm:$0xff] (!%p5896_p5) }
 0x1ed   : > { %4319 = vst [vmem:[%s6708_s25 + $0x1e0] sm:$0xff] %v5965_v52  ;;  %4320 = vst [vmem:[%s6708_s25 + $0x1e8] sm:$0xff] %v5966_v19  ;;  %v3213_v53 = vpop.f32.mrb[116].mxu0  ;;  %v3302_v54 = vpop.f32.mrb[116].mxu1  ;;  %v4681_v52 = vld [vmem:[%s8443_s5 + $0x68] sm:$0xff] (!%p5896_p5)  ;;  %6176 = vmatprep.subr.bf16.mxu0 (!%p5896_p5), %v6175_v49  ;;  %v4752_v46 = vld [vmem:[%s8443_s5 + $0x2a0] sm:$0xff] (!%p5896_p5) }
 0x1ee   : > { %v3215_v55 = vpop.f32.mrb[117].mxu0  ;;  %v3304_v56 = vpop.f32.mrb[117].mxu1  ;;  %6114 = vmatpush1.bf16.msra.mxu1 (!%p5896_p5), %v6113_v50  ;;  %v6115_v19 = vpack.c.bf16 (!%p5896_p5), %v4681_v52, %v4677_v51  ;;  %v6153_v9 = vpack.c.bf16 (!%p5896_p5), %v4752_v46, %v4748_v45  ;;  %v4761_v48 = vld [vmem:[%s8443_s5 + $0x2e8] sm:$0xff] (!%p5896_p5)  ;;  %v4756_v50 = vld [vmem:[%s8443_s5 + $0x2c0] sm:$0xff] (!%p5896_p5)  ;;  %v4715_v45 = vld [vmem:[%s8443_s5 + $0x178] sm:$0xff] (!%p5896_p5)  ;;  %v6193_v46 = vpack.c.bf16 (!%p5896_p5), %v4706_v43, %v4702_v42 }
 0x1ef   : > { %v5997_v57 = vpack.c.bf16 %v3215_v55, %v3213_v53  ;;  %v5998_v26 = vpack.c.bf16 %v3304_v56, %v3302_v54  ;;  %v4676_v53 = vld [vmem:[%s8443_s5 + $0x40] sm:$0xff] (!%p5896_p5)  ;;  %v4685_v56 = vld [vmem:[%s8443_s5 + $0x88] sm:$0xff] (!%p5896_p5)  ;;  %v6155_v49 = vpack.c.bf16 (!%p5896_p5), %v4761_v48, %v4757_v47  ;;  %v4710_v47 = vld [vmem:[%s8443_s5 + $0x150] sm:$0xff] (!%p5896_p5) }
 0x1f0   : > { %v4680_v54 = vld [vmem:[%s8443_s5 + $0x60] sm:$0xff] (!%p5896_p5)  ;;  %6116 = vmatprep.subr.bf16.mxu1 (!%p5896_p5), %v6115_v19  ;;  %v4765_v19 = vld [vmem:[%s8443_s5 + $0x308] sm:$0xff] (!%p5896_p5)  ;;  %v4714_v48 = vld [vmem:[%s8443_s5 + $0x170] sm:$0xff] (!%p5896_p5) }
 0x1f1   : > { %4351 = vst [vmem:[%s6708_s25 + $0x2e0] sm:$0xff] %v5997_v57  ;;  %4352 = vst [vmem:[%s6708_s25 + $0x2e8] sm:$0xff] %v5998_v26  ;;  %v3219_v58 = vpop.f32.mrb[118].mxu0  ;;  %v3308_v59 = vpop.f32.mrb[118].mxu1  ;;  %v6117_v55 = vpack.c.bf16 (!%p5896_p5), %v4680_v54, %v4676_v53  ;;  %v4689_v57 = vld [vmem:[%s8443_s5 + $0xa8] sm:$0xff] (!%p5896_p5)  ;;  %v4760_v51 = vld [vmem:[%s8443_s5 + $0x2e0] sm:$0xff] (!%p5896_p5) }
 0x1f2   : > { %v3221_v60 = vpop.f32.mrb[119].mxu0  ;;  %v3310_v61 = vpop.f32.mrb[119].mxu1  ;;  %v6119_v26 = vpack.c.bf16 (!%p5896_p5), %v4689_v57, %v4685_v56  ;;  %v6157_v52 = vpack.c.bf16 (!%p5896_p5), %v4760_v51, %v4756_v50  ;;  %v4769_v53 = vld [vmem:[%s8443_s5 + $0x328] sm:$0xff] (!%p5896_p5)  ;;  %v4768_v56 = vld [vmem:[%s8443_s5 + $0x320] sm:$0xff] (!%p5896_p5)  ;;  %v4723_v50 = vld [vmem:[%s8443_s5 + $0x1b8] sm:$0xff] (!%p5896_p5)  ;;  %v6197_v51 = vpack.c.bf16 (!%p5896_p5), %v4714_v48, %v4710_v47 }
 0x1f3   : > { %v6029_v62 = vpack.c.bf16 %v3221_v60, %v3219_v58  ;;  %v6030_v63 = vpack.c.bf16 %v3310_v61, %v3308_v59  ;;  %v4684_v58 = vld [vmem:[%s8443_s5 + $0x80] sm:$0xff] (!%p5896_p5)  ;;  %6118 = vmatpush1.bf16.msra.mxu1 (!%p5896_p5), %v6117_v55  ;;  %v4693_v61 = vld [vmem:[%s8443_s5 + $0xc8] sm:$0xff] (!%p5896_p5)  ;;  %v6159_v54 = vpack.c.bf16 (!%p5896_p5), %v4769_v53, %v4765_v19  ;;  %v4718_v19 = vld [vmem:[%s8443_s5 + $0x190] sm:$0xff] (!%p5896_p5) }
 0x1f4   : > { %v4688_v59 = vld [vmem:[%s8443_s5 + $0xa0] sm:$0xff] (!%p5896_p5)  ;;  %6120 = vmatprep.subr.bf16.mxu1 (!%p5896_p5), %v6119_v26  ;;  %v4773_v26 = vld [vmem:[%s8443_s5 + $0x348] sm:$0xff] (!%p5896_p5)  ;;  %v4722_v53 = vld [vmem:[%s8443_s5 + $0x1b0] sm:$0xff] (!%p5896_p5) }
 0x1f5   : > { %4383 = vst [vmem:[%s6708_s25 + $0x3e0] sm:$0xff] %v6029_v62  ;;  %4384 = vst [vmem:[%s6708_s25 + $0x3e8] sm:$0xff] %v6030_v63  ;;  %v3379_v31 = vpop.f32.mrb[120].mxu0  ;;  %v3468_v0 = vpop.f32.mrb[120].mxu1  ;;  %v6121_v60 = vpack.c.bf16 (!%p5896_p5), %v4688_v59, %v4684_v58  ;;  %v4697_v62 = vld [vmem:[%s8443_s5 + $0xe8] sm:$0xff] (!%p5896_p5)  ;;  %v4764_v55 = vld [vmem:[%s8443_s5 + $0x300] sm:$0xff] (!%p5896_p5) }
 0x1f6   : > { %v3381_v1 = vpop.f32.mrb[121].mxu0  ;;  %v3470_v2 = vpop.f32.mrb[121].mxu1  ;;  %v6123_v63 = vpack.c.bf16 (!%p5896_p5), %v4697_v62, %v4693_v61  ;;  %v6161_v57 = vpack.c.bf16 (!%p5896_p5), %v4768_v56, %v4764_v55  ;;  %v4777_v58 = vld [vmem:[%s8443_s5 + $0x368] sm:$0xff] (!%p5896_p5)  ;;  %v4776_v61 = vld [vmem:[%s8443_s5 + $0x360] sm:$0xff] (!%p5896_p5)  ;;  %v4731_v55 = vld [vmem:[%s8443_s5 + $0x1f8] sm:$0xff] (!%p5896_p5)  ;;  %v6201_v56 = vpack.c.bf16 (!%p5896_p5), %v4722_v53, %v4718_v19 }
 0x1f7   : > { %v5935_v3 = vpack.c.bf16 %v3381_v1, %v3379_v31  ;;  %v5936_v4 = vpack.c.bf16 %v3470_v2, %v3468_v0  ;;  %v4692_v31 = vld [vmem:[%s8443_s5 + $0xc0] sm:$0xff] (!%p5896_p5)  ;;  %6122 = vmatpush1.bf16.msra.mxu1 (!%p5896_p5), %v6121_v60  ;;  %v4701_v2 = vld [vmem:[%s8443_s5 + $0x108] sm:$0xff] (!%p5896_p5)  ;;  %v6163_v59 = vpack.c.bf16 (!%p5896_p5), %v4777_v58, %v4773_v26  ;;  %v4726_v26 = vld [vmem:[%s8443_s5 + $0x1d0] sm:$0xff] (!%p5896_p5) }
 0x1f8   : > { %v4696_v0 = vld [vmem:[%s8443_s5 + $0xe0] sm:$0xff] (!%p5896_p5)  ;;  %6124 = vmatprep.subr.bf16.mxu1 (!%p5896_p5), %v6123_v63  ;;  %v4781_v63 = vld [vmem:[%s8443_s5 + $0x388] sm:$0xff] (!%p5896_p5)  ;;  %v4730_v58 = vld [vmem:[%s8443_s5 + $0x1f0] sm:$0xff] (!%p5896_p5) }
 0x1f9   : > { %4289 = vst [vmem:[%s6708_s25 + $0xf0] sm:$0xff] %v5935_v3  ;;  %4290 = vst [vmem:[%s6708_s25 + $0xf8] sm:$0xff] %v5936_v4  ;;  %v3385_v5 = vpop.f32.mrb[122].mxu0  ;;  %v3474_v6 = vpop.f32.mrb[122].mxu1  ;;  %v6125_v1 = vpack.c.bf16 (!%p5896_p5), %v4696_v0, %v4692_v31  ;;  %v4705_v3 = vld [vmem:[%s8443_s5 + $0x128] sm:$0xff] (!%p5896_p5)  ;;  %v4772_v60 = vld [vmem:[%s8443_s5 + $0x340] sm:$0xff] (!%p5896_p5) }
 0x1fa   : > { %v3387_v8 = vpop.f32.mrb[123].mxu0  ;;  %v3476_v10 = vpop.f32.mrb[123].mxu1  ;;  %v6127_v4 = vpack.c.bf16 (!%p5896_p5), %v4705_v3, %v4701_v2  ;;  %v6165_v62 = vpack.c.bf16 (!%p5896_p5), %v4776_v61, %v4772_v60  ;;  %v4785_v31 = vld [vmem:[%s8443_s5 + $0x3a8] sm:$0xff] (!%p5896_p5)  ;;  %v4784_v2 = vld [vmem:[%s8443_s5 + $0x3a0] sm:$0xff] (!%p5896_p5)  ;;  %v4739_v60 = vld [vmem:[%s8443_s5 + $0x238] sm:$0xff] (!%p5896_p5)  ;;  %v6205_v61 = vpack.c.bf16 (!%p5896_p5), %v4730_v58, %v4726_v26 }
 0x1fb   : > { %v5967_v11 = vpack.c.bf16 %v3387_v8, %v3385_v5  ;;  %v5968_v12 = vpack.c.bf16 %v3476_v10, %v3474_v6  ;;  %v4700_v5 = vld [vmem:[%s8443_s5 + $0x100] sm:$0xff] (!%p5896_p5)  ;;  %6126 = vmatpush1.bf16.msra.mxu1 (!%p5896_p5), %v6125_v1  ;;  %v4709_v10 = vld [vmem:[%s8443_s5 + $0x148] sm:$0xff] (!%p5896_p5)  ;;  %v6167_v0 = vpack.c.bf16 (!%p5896_p5), %v4785_v31, %v4781_v63  ;;  %v4734_v63 = vld [vmem:[%s8443_s5 + $0x210] sm:$0xff] (!%p5896_p5) }
 0x1fc   : > { %v4704_v6 = vld [vmem:[%s8443_s5 + $0x120] sm:$0xff] (!%p5896_p5)  ;;  %6128 = vmatprep.subr.bf16.mxu1 (!%p5896_p5), %v6127_v4  ;;  %v4738_v31 = vld [vmem:[%s8443_s5 + $0x230] sm:$0xff] (!%p5896_p5)  ;;  %v4793_v42 = vld [vmem:[%s8443_s5 + $0x3e8] sm:$0xff] (!%p5896_p5) }
 0x1fd   : > { %4321 = vst [vmem:[%s6708_s25 + $0x1f0] sm:$0xff] %v5967_v11  ;;  %4322 = vst [vmem:[%s6708_s25 + $0x1f8] sm:$0xff] %v5968_v12  ;;  %v3391_v13 = vpop.f32.mrb[124].mxu0  ;;  %v3480_v14 = vpop.f32.mrb[124].mxu1  ;;  %v6129_v8 = vpack.c.bf16 (!%p5896_p5), %v4704_v6, %v4700_v5  ;;  %v4713_v11 = vld [vmem:[%s8443_s5 + $0x168] sm:$0xff] (!%p5896_p5)  ;;  %v4780_v1 = vld [vmem:[%s8443_s5 + $0x380] sm:$0xff] (!%p5896_p5) }
 0x1fe   : > { %v3393_v15 = vpop.f32.mrb[125].mxu0  ;;  %v3482_v16 = vpop.f32.mrb[125].mxu1  ;;  %v6131_v12 = vpack.c.bf16 (!%p5896_p5), %v4713_v11, %v4709_v10  ;;  %v6169_v3 = vpack.c.bf16 (!%p5896_p5), %v4784_v2, %v4780_v1  ;;  %v4558_v4 = vld [vmem:[%s8440_s2] sm:$0xf] (!%p5896_p5)  ;;  %v4747_v1 = vld [vmem:[%s8443_s5 + $0x278] sm:$0xff] (!%p5896_p5)  ;;  %v6209_v2 = vpack.c.bf16 (!%p5896_p5), %v4738_v31, %v4734_v63  ;;  %v4977_v19 = vld [vmem:[%s8445_s7 + $0x88] sm:$0xff] (!%p5896_p5) }
 0x1ff   : > { %v5999_v17 = vpack.c.bf16 %v3393_v15, %v3391_v13  ;;  %v6000_v18 = vpack.c.bf16 %v3482_v16, %v3480_v14  ;;  %4555 = sbr.rel (%p5896_p5) target bundleno = 1274 (0x4fa), region = 64  ;;  %v4708_v13 = vld [vmem:[%s8443_s5 + $0x140] sm:$0xff] (!%p5896_p5)  ;;  %6130 = vmatpush1.bf16.msra.mxu1 (!%p5896_p5), %v6129_v8  ;;  %v4717_v16 = vld [vmem:[%s8443_s5 + $0x188] sm:$0xff] (!%p5896_p5)  ;;  %v4791_v43 = vld [vmem:[%s8443_s5 + $0x3d8] sm:$0xff] (!%p5896_p5) }
 0x200   : > { %v4712_v14 = vld [vmem:[%s8443_s5 + $0x160] sm:$0xff] (!%p5896_p5)  ;;  %6132 = vmatprep.subr.bf16.mxu1 (!%p5896_p5), %v6131_v12  ;;  %v4961_v63 = vld [vmem:[%s8445_s7 + $0x8] sm:$0xff] (!%p5896_p5) }
 0x201   : > { %4353 = vst [vmem:[%s6708_s25 + $0x2f0] sm:$0xff] %v5999_v17  ;;  %4354 = vst [vmem:[%s6708_s25 + $0x2f8] sm:$0xff] %v6000_v18  ;;  %v3397_v20 = vpop.f32.mrb[126].mxu0  ;;  %v3486_v21 = vpop.f32.mrb[126].mxu1  ;;  %v6133_v15 = vpack.c.bf16 (!%p5896_p5), %v4712_v14, %v4708_v13  ;;  %v4721_v17 = vld [vmem:[%s8443_s5 + $0x1a8] sm:$0xff] (!%p5896_p5)  ;;  %v4670_v14 = vld [vmem:[%s8443_s5 + $0x10] sm:$0xff] (!%p5896_p5) }
 0x202   : > { %v3399_v22 = vpop.f32.mrb[127].mxu0  ;;  %v3488_v23 = vpop.f32.mrb[127].mxu1  ;;  %v6135_v18 = vpack.c.bf16 (!%p5896_p5), %v4721_v17, %v4717_v16  ;;  %v4679_v16 = vld [vmem:[%s8443_s5 + $0x58] sm:$0xff] (!%p5896_p5)  ;;  %v5008_v53 = vld [vmem:[%s8445_s7 + $0x180] sm:$0xff] (!%p5896_p5) }
 0x203   : > { %v6031_v24 = vpack.c.bf16 %v3399_v22, %v3397_v20  ;;  %v6032_v7 = vpack.c.bf16 %v3488_v23, %v3486_v21  ;;  %v4716_v20 = vld [vmem:[%s8443_s5 + $0x180] sm:$0xff] (!%p5896_p5)  ;;  %6134 = vmatpush1.bf16.msra.mxu1 (!%p5896_p5), %v6133_v15  ;;  %v4725_v23 = vld [vmem:[%s8443_s5 + $0x1c8] sm:$0xff] (!%p5896_p5)  ;;  %v4674_v15 = vld [vmem:[%s8443_s5 + $0x30] sm:$0xff] (!%p5896_p5) }
 0x204   : > { %v4720_v21 = vld [vmem:[%s8443_s5 + $0x1a0] sm:$0xff] (!%p5896_p5)  ;;  %6136 = vmatprep.subr.bf16.mxu1 (!%p5896_p5), %v6135_v18  ;;  %v4683_v17 = vld [vmem:[%s8443_s5 + $0x78] sm:$0xff] (!%p5896_p5) }
 0x205   : > { %4385 = vst [vmem:[%s6708_s25 + $0x3f0] sm:$0xff] %v6031_v24  ;;  %4386 = vst [vmem:[%s6708_s25 + $0x3f8] sm:$0xff] %v6032_v7  ;;  %v6137_v22 = vpack.c.bf16 (!%p5896_p5), %v4720_v21, %v4716_v20  ;;  %v4729_v24 = vld [vmem:[%s8443_s5 + $0x1e8] sm:$0xff] (!%p5896_p5)  ;;  %v6177_v20 = vpack.c.bf16 (!%p5896_p5), %v4674_v15, %v4670_v14  ;;  %v4759_v14 = vld [vmem:[%s8443_s5 + $0x2d8] sm:$0xff] (!%p5896_p5) }
 0x206   : > { %v6139_v7 = vpack.c.bf16 %v4729_v24, %v4725_v23  ;;  %v4678_v23 = vld [vmem:[%s8443_s5 + $0x50] sm:$0xff]  ;;  %v4763_v15 = vld [vmem:[%s8443_s5 + $0x2f8] sm:$0xff] }
 0x207   : > { %6138 = vmatpush1.bf16.msra.mxu1 %v6137_v22  ;;  %v6179_v22 = vpack.c.bf16 %v4683_v17, %v4679_v16  ;;  %v4682_v24 = vld [vmem:[%s8443_s5 + $0x70] sm:$0xff]  ;;  %v6219_v17 = vpack.c.bf16 %v4763_v15, %v4759_v14  ;;  %v4963_v14 = vld [vmem:[%s8445_s7 + $0x18] sm:$0xff] }
 0x208   : > { %6140 = vmatprep.subr.bf16.mxu1 %v6139_v7  ;;  %v4687_v7 = vld [vmem:[%s8443_s5 + $0x98] sm:$0xff]  ;;  %v6181_v27 = vpack.c.bf16 %v4682_v24, %v4678_v23 }
 0x20b   : > { %6142 = vmatpush1.bf16.msra.mxu1 %v6141_v28  ;;  %v6183_v28 = vpack.c.bf16 %v4691_v25, %v4687_v7  ;;  %v4766_v7 = vld [vmem:[%s8443_s5 + $0x310] sm:$0xff] }
 0x20c   : > { %6144 = vmatprep.subr.bf16.mxu1 %v6143_v32  ;;  %v4695_v32 = vld [vmem:[%s8443_s5 + $0xd8] sm:$0xff]  ;;  %v4770_v25 = vld [vmem:[%s8443_s5 + $0x330] sm:$0xff] }
 0x20d   : > { %v6225_v29 = vpack.c.bf16 %v4770_v25, %v4766_v7 }
 0x20f   : > { %6146 = vmatpush1.bf16.msra.mxu1 %v6145_v35  ;;  %v6187_v35 = vpack.c.bf16 %v4699_v33, %v4695_v32  ;;  %v4774_v32 = vld [vmem:[%s8443_s5 + $0x350] sm:$0xff] }
 0x210   : > { %6148 = vmatprep.subr.bf16.mxu1 %v6147_v38  ;;  %v4703_v38 = vld [vmem:[%s8443_s5 + $0x118] sm:$0xff]  ;;  %v4778_v33 = vld [vmem:[%s8443_s5 + $0x370] sm:$0xff] }
 0x211   : > { %v6229_v36 = vpack.c.bf16 %v4778_v33, %v4774_v32  ;;  %v4996_v32 = vld [vmem:[%s8445_s7 + $0x120] sm:$0xff]  ;;  %v4997_v33 = vld [vmem:[%s8445_s7 + $0x128] sm:$0xff] }
 0x213   : > { %6150 = vmatpush1.bf16.msra.mxu1 %v6149_v41  ;;  %v6191_v41 = vpack.c.bf16 %v4707_v39, %v4703_v38  ;;  %v4782_v38 = vld [vmem:[%s8443_s5 + $0x390] sm:$0xff] }
 0x214   : > { %6152 = vmatprep.subr.bf16.mxu1 %v6151_v44  ;;  %v4711_v44 = vld [vmem:[%s8443_s5 + $0x158] sm:$0xff]  ;;  %v4786_v39 = vld [vmem:[%s8443_s5 + $0x3b0] sm:$0xff] }
 0x217   : > { %6154 = vmatpush1.bf16.msra.mxu1 %v6153_v9  ;;  %v6195_v9 = vpack.c.bf16 %v4715_v45, %v4711_v44  ;;  %v4795_v45 = vld [vmem:[%s8443_s5 + $0x3f8] sm:$0xff] }
 0x218   : > { %6156 = vmatprep.subr.bf16.mxu1 %v6155_v49  ;;  %v4719_v49 = vld [vmem:[%s8443_s5 + $0x198] sm:$0xff]  ;;  %v6235_v47 = vpack.c.bf16 %v4795_v45, %v4791_v43 }
 0x219   : > { %v4999_v45 = vld [vmem:[%s8445_s7 + $0x138] sm:$0xff] }
 0x21b   : > { %6158 = vmatpush1.bf16.msra.mxu1 %v6157_v52  ;;  %v6199_v52 = vpack.c.bf16 %v4723_v50, %v4719_v49  ;;  %v4790_v49 = vld [vmem:[%s8443_s5 + $0x3d0] sm:$0xff] }
 0x21c   : > { %6160 = vmatprep.subr.bf16.mxu1 %v6159_v54  ;;  %v4727_v54 = vld [vmem:[%s8443_s5 + $0x1d8] sm:$0xff]  ;;  %v4794_v50 = vld [vmem:[%s8443_s5 + $0x3f0] sm:$0xff] }
 0x21f   : > { %6162 = vmatpush1.bf16.msra.mxu1 %v6161_v57  ;;  %v6203_v57 = vpack.c.bf16 %v4731_v55, %v4727_v54  ;;  %v5009_v55 = vld [vmem:[%s8445_s7 + $0x188] sm:$0xff] }
 0x220   : > { %6164 = vmatprep.subr.bf16.mxu1 %v6163_v59  ;;  %v4735_v59 = vld [vmem:[%s8443_s5 + $0x218] sm:$0xff] }
 0x223   : > { %6166 = vmatpush1.bf16.msra.mxu1 %v6165_v62  ;;  %v6207_v62 = vpack.c.bf16 %v4739_v60, %v4735_v59  ;;  %v4581_v59 = vld [vmem:[%s8442_s4] sm:$0x3] }
 0x224   : > { %6168 = vmatprep.subr.bf16.mxu1 %v6167_v0  ;;  %v4743_v0 = vld [vmem:[%s8443_s5 + $0x258] sm:$0xff] }
 0x227   : > { %6170 = vmatpush1.bf16.msra.mxu1 %v6169_v3  ;;  %v6211_v3 = vpack.c.bf16 %v4747_v1, %v4743_v0  ;;  %v4992_v0 = vld [vmem:[%s8445_s7 + $0x100] sm:$0xff]  ;;  %v4993_v1 = vld [vmem:[%s8445_s7 + $0x108] sm:$0xff] }
 0x25e   : > { %v4562_v5 = vpop.permute.xlu0 %4561 }
 0x25f   : > { %v4564_v6 = vmul.f32 %v4562_v5, %v4558_v4  ;;  %v4742_v4 = vld [vmem:[%s8443_s5 + $0x250] sm:$0xff] }
 0x260   : > { %v4746_v5 = vld [vmem:[%s8443_s5 + $0x270] sm:$0xff] }
 0x261   : > { %v4566_v8 = vsel %vm4565_vm4, %v4564_v6, 0.0  ;;  %v4751_v6 = vld [vmem:[%s8443_s5 + $0x298] sm:$0xff] }
 0x262   : > { %v4567_v10 = vrot.slane %v4566_v8, 4 }
 0x264   : > { %v4568_v11 = vadd.f32 %v4567_v10, %v4566_v8  ;;  %v4755_v8 = vld [vmem:[%s8443_s5 + $0x2b8] sm:$0xff]  ;;  %v6213_v10 = vpack.c.bf16 %v4746_v5, %v4742_v4  ;;  %v5010_v5 = vld [vmem:[%s8445_s7 + $0x190] sm:$0xff] }
 0x265   : > { %v4979_v4 = vld [vmem:[%s8445_s7 + $0x98] sm:$0xff] }
 0x266   : > { %v4569_v12 = vrot.slane %v4568_v11, 2 }
 0x268   : > { %v4570_v13 = vadd.f32 %v4569_v12, %v4568_v11  ;;  %v6215_v11 = vpack.c.bf16 %v4755_v8, %v4751_v6  ;;  %v4750_v12 = vld [vmem:[%s8443_s5 + $0x290] sm:$0xff]  ;;  %v5011_v6 = vld [vmem:[%s8445_s7 + $0x198] sm:$0xff] }
 0x26a   : > { %v4571_v18 = vrot.slane %v4570_v13, 1 }
 0x26c   : > { %v4572_v21 = vadd.f32 %v4571_v18, %v4570_v13  ;;  %v4754_v13 = vld [vmem:[%s8443_s5 + $0x2b0] sm:$0xff] }
 0x26d   : > { %v6217_v16 = vpack.c.bf16 %v4754_v13, %v4750_v12  ;;  %v4758_v18 = vld [vmem:[%s8443_s5 + $0x2d0] sm:$0xff]  ;;  %v6273_v12 = vpack.c.bf16 %v4993_v1, %v4992_v0  ;;  %v4971_v0 = vld [vmem:[%s8445_s7 + $0x58] sm:$0xff] }
 0x26e   : > { %5897 = vmatmul.mubr.msk.f32.vlgmr.msra.gmra.mrb[0].mxu0 %vm4593_vm5, %v4572_v21  ;;  %v4767_v21 = vld [vmem:[%s8443_s5 + $0x318] sm:$0xff]  ;;  %v4962_v13 = vld [vmem:[%s8445_s7 + $0x10] sm:$0xff] }
 0x26f   : > { %6178 = vmatpush1.bf16.msra.mxu0 %v6177_v20  ;;  %v4762_v20 = vld [vmem:[%s8443_s5 + $0x2f0] sm:$0xff]  ;;  %v6245_v7 = vpack.c.bf16 %v4963_v14, %v4962_v13  ;;  %v4972_v13 = vld [vmem:[%s8445_s7 + $0x60] sm:$0xff] }
 0x270   : > { %6180 = vmatprep.subr.bf16.mxu0 %v6179_v22  ;;  %v4771_v22 = vld [vmem:[%s8443_s5 + $0x338] sm:$0xff]  ;;  %v6221_v23 = vpack.c.bf16 %v4762_v20, %v4758_v18  ;;  %v4994_v18 = vld [vmem:[%s8445_s7 + $0x110] sm:$0xff] }
 0x271   : > { %v6223_v24 = vpack.c.bf16 %v4771_v22, %v4767_v21  ;;  %v4995_v20 = vld [vmem:[%s8445_s7 + $0x118] sm:$0xff]  ;;  %v4980_v21 = vld [vmem:[%s8445_s7 + $0xa0] sm:$0xff]  ;;  %v4981_v22 = vld [vmem:[%s8445_s7 + $0xa8] sm:$0xff] }
 0x272   : > { %v6277_v25 = vpack.c.bf16 %v4995_v20, %v4994_v18  ;;  %v5005_v18 = vld [vmem:[%s8445_s7 + $0x168] sm:$0xff] }
 0x273   : > { %6182 = vmatpush1.bf16.msra.mxu0 %v6181_v27  ;;  %v4775_v27 = vld [vmem:[%s8443_s5 + $0x358] sm:$0xff] }
 0x274   : > { %6184 = vmatprep.subr.bf16.mxu0 %v6183_v28  ;;  %v4779_v28 = vld [vmem:[%s8443_s5 + $0x378] sm:$0xff] }
 0x275   : > { %v6227_v30 = vpack.c.bf16 %v4779_v28, %v4775_v27  ;;  %v4964_v27 = vld [vmem:[%s8445_s7 + $0x20] sm:$0xff]  ;;  %v4965_v28 = vld [vmem:[%s8445_s7 + $0x28] sm:$0xff] }
 0x277   : > { %6186 = vmatpush1.bf16.msra.mxu0 %v6185_v34  ;;  %v4783_v34 = vld [vmem:[%s8443_s5 + $0x398] sm:$0xff] }
 0x278   : > { %6188 = vmatprep.subr.bf16.mxu0 %v6187_v35  ;;  %v4787_v35 = vld [vmem:[%s8443_s5 + $0x3b8] sm:$0xff] }
 0x279   : > { %v6231_v37 = vpack.c.bf16 %v4787_v35, %v4783_v34  ;;  %v4982_v34 = vld [vmem:[%s8445_s7 + $0xb0] sm:$0xff]  ;;  %v4983_v35 = vld [vmem:[%s8445_s7 + $0xb8] sm:$0xff] }
 0x27b   : > { %6190 = vmatpush1.bf16.msra.mxu0 %v6189_v40  ;;  %v6233_v40 = vpack.c.bf16 %v4786_v39, %v4782_v38  ;;  %v6249_v38 = vpack.c.bf16 %v4965_v28, %v4964_v27  ;;  %v6281_v39 = vpack.c.bf16 %v4997_v33, %v4996_v32  ;;  %v4974_v27 = vld [vmem:[%s8445_s7 + $0x70] sm:$0xff]  ;;  %v4975_v28 = vld [vmem:[%s8445_s7 + $0x78] sm:$0xff] }
 0x27c   : > { %6192 = vmatprep.subr.bf16.mxu0 %v6191_v41  ;;  %v4789_v41 = vld [vmem:[%s8443_s5 + $0x3c8] sm:$0xff]  ;;  %v5006_v32 = vld [vmem:[%s8445_s7 + $0x170] sm:$0xff]  ;;  %v5007_v33 = vld [vmem:[%s8445_s7 + $0x178] sm:$0xff] }
 0x27d   : > { %v6171_v44 = vpack.c.bf16 %v4793_v42, %v4789_v41  ;;  %v4967_v41 = vld [vmem:[%s8445_s7 + $0x38] sm:$0xff]  ;;  %v6251_v42 = vpack.c.bf16 %v4983_v35, %v4982_v34  ;;  %v6301_v34 = vpack.c.bf16 %v5007_v33, %v5006_v32 }
 0x27f   : > { %6194 = vmatpush1.bf16.msra.mxu0 %v6193_v46  ;;  %v4788_v46 = vld [vmem:[%s8443_s5 + $0x3c0] sm:$0xff]  ;;  %6172 = vmatprep.subr.bf16.mxu1 %v6171_v44  ;;  %v4998_v44 = vld [vmem:[%s8445_s7 + $0x130] sm:$0xff] }
 0x280   : > { %6196 = vmatprep.subr.bf16.mxu0 %v6195_v9  ;;  %v4792_v9 = vld [vmem:[%s8443_s5 + $0x3e0] sm:$0xff] }
 0x281   : > { %v6173_v48 = vpack.c.bf16 %v4792_v9, %v4788_v46  ;;  %v4984_v46 = vld [vmem:[%s8445_s7 + $0xc0] sm:$0xff]  ;;  %v4985_v9 = vld [vmem:[%s8445_s7 + $0xc8] sm:$0xff] }
 0x283   : > { %6198 = vmatpush1.bf16.msra.mxu0 %v6197_v51  ;;  %v6237_v51 = vpack.c.bf16 %v4794_v50, %v4790_v49  ;;  %6174 = vmatpush1.bf16.msra.mxu1 %v6173_v48  ;;  %v5017_v48 = vld [vmem:[%s8445_s7 + $0x1c8] sm:$0xff]  ;;  %v6285_v50 = vpack.c.bf16 %v4999_v45, %v4998_v44 }
 0x284   : > { %6200 = vmatprep.subr.bf16.mxu0 %v6199_v52  ;;  %v4976_v52 = vld [vmem:[%s8445_s7 + $0x80] sm:$0xff] }
 0x285   : > { %v6239_v54 = vpack.c.bf16 %v4977_v19, %v4976_v52  ;;  %v4969_v52 = vld [vmem:[%s8445_s7 + $0x48] sm:$0xff]  ;;  %v6255_v19 = vpack.c.bf16 %v4985_v9, %v4984_v46 }
 0x287   : > { %6202 = vmatpush1.bf16.msra.mxu0 %v6201_v56  ;;  %v6271_v56 = vpack.c.bf16 %v5009_v55, %v5008_v53  ;;  %6240 = vmatprep.subr.bf16.mxu1 %v6239_v54  ;;  %v5000_v54 = vld [vmem:[%s8445_s7 + $0x140] sm:$0xff]  ;;  %v5001_v55 = vld [vmem:[%s8445_s7 + $0x148] sm:$0xff] }
 0x288   : > { %6204 = vmatprep.subr.bf16.mxu0 %v6203_v57  ;;  %v4583_v57 = vlaneseq }
 0x28a   : > { %v7913_v26 = vshrl.u32 %v4583_v57, 7  ;;  %v4987_v57 = vld [vmem:[%s8445_s7 + $0xd8] sm:$0xff] }
 0x28b   : > { %6206 = vmatpush1.bf16.msra.mxu0 %v6205_v61 }
 0x28c   : > { %6208 = vmatprep.subr.bf16.mxu0 %v6207_v62  ;;  %v4589_v58 = vsub.s32 1, %v7913_v26  ;;  %v4585_v60 = vsub.s32 0, %v7913_v26  ;;  %v4960_v62 = vld [vmem:[%s8445_s7] sm:$0xff]  ;;  %v4812_v35 = vsub.s32 3, %v7913_v26 }
 0x28e   : > { %v4590_v61 = vrot.slane %v4581_v59, %v4589_v58  ;;  %v4586_v31 = vrot.slane %v4581_v59, %v4585_v60  ;;  %v5018_v59 = vld [vmem:[%s8445_s7 + $0x1d0] sm:$0xff] }
 0x28f   : > { %6210 = vmatpush1.bf16.msra.mxu0 %v6209_v2  ;;  %v4978_v2 = vld [vmem:[%s8445_s7 + $0x90] sm:$0xff] }
 0x290   : > { %6212 = vmatprep.subr.bf16.mxu0 %v6211_v3 }
 0x293   : > { %6214 = vmatpush1.bf16.msra.mxu0 %v6213_v10 }
 0x294   : > { %6216 = vmatprep.subr.bf16.mxu0 %v6215_v11  ;;  %v6241_v11 = vpack.c.bf16 %v4961_v63, %v4960_v62  ;;  %v6289_v63 = vpack.c.bf16 %v5001_v55, %v5000_v54 }
 0x297   : > { %6218 = vmatpush1.bf16.msra.mxu0 %v6217_v16  ;;  %v6243_v16 = vpack.c.bf16 %v4979_v4, %v4978_v2  ;;  %v5003_v4 = vld [vmem:[%s8445_s7 + $0x158] sm:$0xff] }
 0x298   : > { %6220 = vmatprep.subr.bf16.mxu0 %v6219_v17  ;;  %v6275_v17 = vpack.c.bf16 %v5011_v6, %v5010_v5  ;;  %v4988_v5 = vld [vmem:[%s8445_s7 + $0xe0] sm:$0xff]  ;;  %v4989_v6 = vld [vmem:[%s8445_s7 + $0xe8] sm:$0xff] }
 0x299   : > { %v6263_v14 = vpack.c.bf16 %v4989_v6, %v4988_v5 }
 0x29b   : > { %6222 = vmatpush1.bf16.msra.mxu0 %v6221_v23  ;;  %v5012_v23 = vld [vmem:[%s8445_s7 + $0x1a0] sm:$0xff] }
 0x29c   : > { %6224 = vmatprep.subr.bf16.mxu0 %v6223_v24  ;;  %v5013_v24 = vld [vmem:[%s8445_s7 + $0x1a8] sm:$0xff] }
 0x29f   : > { %6226 = vmatpush1.bf16.msra.mxu0 %v6225_v29  ;;  %v6247_v29 = vpack.c.bf16 %v4981_v22, %v4980_v21  ;;  %v4990_v22 = vld [vmem:[%s8445_s7 + $0xf0] sm:$0xff] }
 0x2a0   : > { %6228 = vmatprep.subr.bf16.mxu0 %v6227_v30  ;;  %v6279_v30 = vpack.c.bf16 %v5013_v24, %v5012_v23  ;;  %v4991_v23 = vld [vmem:[%s8445_s7 + $0xf8] sm:$0xff]  ;;  %v5022_v24 = vld [vmem:[%s8445_s7 + $0x1f0] sm:$0xff] }
 0x2a3   : > { %6230 = vmatpush1.bf16.msra.mxu0 %v6229_v36  ;;  %v5014_v36 = vld [vmem:[%s8445_s7 + $0x1b0] sm:$0xff] }
 0x2a4   : > { %6232 = vmatprep.subr.bf16.mxu0 %v6231_v37  ;;  %v5015_v37 = vld [vmem:[%s8445_s7 + $0x1b8] sm:$0xff] }
 0x2a5   : > { %v6283_v43 = vpack.c.bf16 %v5015_v37, %v5014_v36  ;;  %v4796_v36 = vld [vmem:[%s8444_s6] sm:$0xf]  ;;  %v4808_v37 = vsub.s32 2, %v7913_v26 }
 0x2a6   : > { %v5024_v26 = vld [vmem:[%s8446_s8] sm:$0x1] }
 0x2a7   : > { %6234 = vmatpush1.bf16.msra.mxu0 %v6233_v40  ;;  %v4966_v40 = vld [vmem:[%s8445_s7 + $0x30] sm:$0xff] }
 0x2a8   : > { %6236 = vmatprep.subr.bf16.mxu0 %v6235_v47  ;;  %v5016_v47 = vld [vmem:[%s8445_s7 + $0x1c0] sm:$0xff]  ;;  %v6253_v49 = vpack.c.bf16 %v4967_v41, %v4966_v40  ;;  %v4801_v40 = vrot.slane %v4796_v36, %v4585_v60  ;;  %v4809_v41 = vrot.slane %v4796_v36, %v4808_v37 }
 0x2a9   : > { %v6287_v53 = vpack.c.bf16 %v5017_v48, %v5016_v47 }
 0x2ab   : > { %6238 = vmatpush1.bf16.msra.mxu0 %v6237_v51  ;;  %v4968_v51 = vld [vmem:[%s8445_s7 + $0x40] sm:$0xff] }
 0x2ac   : > { %6272 = vmatprep.subr.bf16.mxu0 %v6271_v56  ;;  %v4986_v56 = vld [vmem:[%s8445_s7 + $0xd0] sm:$0xff]  ;;  %v6257_v62 = vpack.c.bf16 %v4969_v52, %v4968_v51 }
 0x2ad   : > { %v6259_v1 = vpack.c.bf16 %v4987_v57, %v4986_v56 }
 0x341   : > { %v4663_v3 = vpop.f32.mrb[0].mxu0 }
 0x342   : > { %v4665_v8 = vpop.f32.mrb[1].mxu0  ;;  %v4664_v15 = vadd.f32 %v4663_v3, %v4586_v31  ;;  %v4970_v31 = vld [vmem:[%s8445_s7 + $0x50] sm:$0xff] }
 0x343   : > { %v4666_v10 = vadd.f32 %v4665_v8, %v4590_v61  ;;  %v5019_v61 = vld [vmem:[%s8445_s7 + $0x1d8] sm:$0xff]  ;;  %v5002_v3 = vld [vmem:[%s8445_s7 + $0x150] sm:$0xff]  ;;  %v5020_v8 = vld [vmem:[%s8445_s7 + $0x1e0] sm:$0xff] }
 0x344   : > { %v6291_v2 = vpack.c.bf16 %v5019_v61, %v5018_v59 }
 0x345   : > { %4882 = vmatprep.mubr.f32.mxu1 %v4666_v10  ;;  %4953 = vmatprep.mubr.f32.mxu0 %v4666_v10  ;;  %v5021_v10 = vld [vmem:[%s8445_s7 + $0x1e8] sm:$0xff] }
 0x346   : > { %4883 = vmatmul.mubr.f32.vlgmr.msra.gmra.mrb[0].mxu1 %v4664_v15  ;;  %4954 = vmatmul.mubr.f32.vlgmr.msra.gmra.mrb[2].mxu0 %v4664_v15  ;;  %v6295_v15 = vpack.c.bf16 %v5021_v10, %v5020_v8 }
 0x347   : > { %6242 = vmatpush3.bf16.msra.mxu1 %v6241_v11  ;;  %6274 = vmatpush3.bf16.msra.mxu0 %v6273_v12  ;;  %v6261_v11 = vpack.c.bf16 %v4971_v0, %v4970_v31  ;;  %v6293_v12 = vpack.c.bf16 %v5003_v4, %v5002_v3 }
 0x348   : > { %6244 = vmatprep.subr.bf16.mxu1 %v6243_v16  ;;  %6276 = vmatprep.subr.bf16.mxu0 %v6275_v17  ;;  %v4973_v16 = vld [vmem:[%s8445_s7 + $0x68] sm:$0xff]  ;;  %v5004_v17 = vld [vmem:[%s8445_s7 + $0x160] sm:$0xff] }
 0x349   : > { %v6265_v20 = vpack.c.bf16 %v4973_v16, %v4972_v13  ;;  %v6297_v21 = vpack.c.bf16 %v5005_v18, %v5004_v17 }
 0x34b   : > { %6246 = vmatpush3.bf16.msra.mxu1 %v6245_v7  ;;  %6278 = vmatpush3.bf16.msra.mxu0 %v6277_v25  ;;  %v6267_v7 = vpack.c.bf16 %v4991_v23, %v4990_v22  ;;  %v5023_v25 = vld [vmem:[%s8445_s7 + $0x1f8] sm:$0xff] }
 0x34c   : > { %6248 = vmatprep.subr.bf16.mxu1 %v6247_v29  ;;  %6280 = vmatprep.subr.bf16.mxu0 %v6279_v30  ;;  %v6299_v29 = vpack.c.bf16 %v5023_v25, %v5022_v24  ;;  %v6269_v30 = vpack.c.bf16 %v4975_v28, %v4974_v27 }
 0x34f   : > { %6250 = vmatpush3.bf16.msra.mxu1 %v6249_v38  ;;  %6282 = vmatpush3.bf16.msra.mxu0 %v6281_v39  ;;  %v4805_v38 = vrot.slane %v4796_v36, %v4589_v58  ;;  %v4813_v39 = vrot.slane %v4796_v36, %v4812_v35 }
 0x350   : > { %6252 = vmatprep.subr.bf16.mxu1 %v6251_v42  ;;  %6284 = vmatprep.subr.bf16.mxu0 %v6283_v43 }
 0x353   : > { %6254 = vmatpush3.bf16.msra.mxu1 %v6253_v49  ;;  %6286 = vmatpush3.bf16.msra.mxu0 %v6285_v50 }
 0x354   : > { %6256 = vmatprep.subr.bf16.mxu1 %v6255_v19  ;;  %6288 = vmatprep.subr.bf16.mxu0 %v6287_v53 }
 0x357   : > { %6258 = vmatpush3.bf16.msra.mxu1 %v6257_v62  ;;  %6290 = vmatpush3.bf16.msra.mxu0 %v6289_v63 }
 0x358   : > { %6260 = vmatprep.subr.bf16.mxu1 %v6259_v1  ;;  %6292 = vmatprep.subr.bf16.mxu0 %v6291_v2 }
 0x35b   : > { %6262 = vmatpush3.bf16.msra.mxu1 %v6261_v11  ;;  %6294 = vmatpush3.bf16.msra.mxu0 %v6293_v12 }
 0x35c   : > { %6264 = vmatprep.subr.bf16.mxu1 %v6263_v14  ;;  %6296 = vmatprep.subr.bf16.mxu0 %v6295_v15 }
 0x35f   : > { %6266 = vmatpush3.bf16.msra.mxu1 %v6265_v20  ;;  %6298 = vmatpush3.bf16.msra.mxu0 %v6297_v21 }
 0x360   : > { %6268 = vmatprep.subr.bf16.mxu1 %v6267_v7  ;;  %6300 = vmatprep.subr.bf16.mxu0 %v6299_v29 }
 0x363   : > { %6270 = vmatpush3.bf16.msra.mxu1 %v6269_v30  ;;  %6302 = vmatpush3.bf16.msra.mxu0 %v6301_v34 }
 0x419   : > { %v4884_v42 = vpop.f32.mrb[0].mxu1  ;;  %v4955_v43 = vpop.f32.mrb[2].mxu0 }
 0x41a   : > { %v4886_v44 = vpop.f32.mrb[1].mxu1  ;;  %v4957_v45 = vpop.f32.mrb[3].mxu0  ;;  %v4885_v47 = vadd.f32 %v4884_v42, %v4801_v40  ;;  %v4956_v48 = vadd.f32 %v4955_v43, %v4809_v41 }
 0x41b   : > { %v4887_v46 = vadd.f32 %v4886_v44, %v4805_v38  ;;  %v4958_v9 = vadd.f32 %v4957_v45, %v4813_v39 }
 0x41d   : > { %5089 = vmatprep.mubr.f32.mxu1 %v4887_v46  ;;  %5159 = vmatprep.mubr.f32.mxu0 %v4958_v9 }
 0x41e   : > { %5090 = vmatmul.mubr.f32.vlgmr.msra.gmra.mrb[2].mxu1 %v4885_v47  ;;  %5160 = vmatmul.mubr.f32.vlgmr.msra.gmra.mrb[4].mxu0 %v4956_v48 }
 0x4f1   : > { %v6065_v49 = vpop.f32.mrb[2].mxu1  ;;  %v6100_v58 = vpop.f32.mrb[4].mxu0 }
 0x4f2   : > { %v6066_v60 = vpop.f32.mrb[3].mxu1  ;;  %v6101_v50 = vpop.f32.mrb[5].mxu0 }
 0x4f3   : > { %v6067_v51 = vadd.f32 %v6066_v60, %v6065_v49  ;;  %v6102_v52 = vadd.f32 %v6101_v50, %v6100_v58 }
 0x4f5   : > { %v5092_v19 = vadd.f32 %v6067_v51, %v5024_v26 }
 0x4f7   : > { %v5162_v53 = vadd.f32 %v6102_v52, %v5092_v19 }
 0x4f9   : > { %5166 = vst.msk [vmem:[%s6712_s16] sm:$0x1] %vm5165_vm6, %v5162_v53 }
 0x4fa PF: > { %s8471_s17 = sand.u32 1, %s6509_s14   ;;  %5177 = sbr.rel (!%p6665_p3) target bundleno = 1343 (0x53f), region = 68  ;;  %v5195_v54 = vld [vmem:[%s6708_s25] sm:$0xff] (%p6665_p3)  ;;  %v5197_v55 = vld [vmem:[%s6708_s25 + $0x8] sm:$0xff] (%p6665_p3)  ;;  %v5199_v56 = vld [vmem:[%s6708_s25 + $0x10] sm:$0xff] (%p6665_p3) }
 0x4fb   : > { %s8119_s18 = scalar_lea.sflag [#allocation5], %s8471_s17  ;;  %s5900_s28 = sshll.u32 (%p6665_p3), %s6529_s19, 10  ;;  %v5201_v57 = vld [vmem:[%s6708_s25 + $0x18] sm:$0xff] (%p6665_p3)  ;;  %v5203_v59 = vld [vmem:[%s6708_s25 + $0x20] sm:$0xff] (%p6665_p3)  ;;  %v5205_v61 = vld [vmem:[%s6708_s25 + $0x28] sm:$0xff] (%p6665_p3) }
 0x4fc   : > { %s5180_s29 = sadd.s32 (%p6665_p3), %s5900_s28, %s6697_s23  ;;  %v5207_v62 = vld [vmem:[%s6708_s25 + $0x30] sm:$0xff] (%p6665_p3)  ;;  %v5209_v63 = vld [vmem:[%s6708_s25 + $0x38] sm:$0xff] (%p6665_p3)  ;;  %v5211_v31 = vld [vmem:[%s6708_s25 + $0x40] sm:$0xff] (%p6665_p3) }
 0x4fd   : > { %s5901_s20 = sshll.u32 (%p6665_p3), %s5180_s29, 2  ;;  %v5213_v0 = vld [vmem:[%s6708_s25 + $0x48] sm:$0xff] (%p6665_p3)  ;;  %v5215_v1 = vld [vmem:[%s6708_s25 + $0x50] sm:$0xff] (%p6665_p3)  ;;  %v5217_v2 = vld [vmem:[%s6708_s25 + $0x58] sm:$0xff] (%p6665_p3) }
 0x4fe   : > { %s8137_s24 = scalar_lea.vmem (%p6665_p3), %s8447_s9, %s5901_s20  ;;  %v5219_v3 = vld [vmem:[%s6708_s25 + $0x60] sm:$0xff] (%p6665_p3)  ;;  %v5221_v4 = vld [vmem:[%s6708_s25 + $0x68] sm:$0xff] (%p6665_p3)  ;;  %v5223_v5 = vld [vmem:[%s6708_s25 + $0x70] sm:$0xff] (%p6665_p3) }
 0x4ff   : > { %5196 = vst [vmem:[%s8137_s24] sm:$0xff] (%p6665_p3), %v5195_v54  ;;  %5198 = vst [vmem:[%s8137_s24 + $0x8] sm:$0xff] (%p6665_p3), %v5197_v55  ;;  %v5225_v6 = vld [vmem:[%s6708_s25 + $0x78] sm:$0xff] (%p6665_p3)  ;;  %v5227_v8 = vld [vmem:[%s6708_s25 + $0x80] sm:$0xff] (%p6665_p3) }
 0x500   : > { %5200 = vst [vmem:[%s8137_s24 + $0x10] sm:$0xff] (%p6665_p3), %v5199_v56  ;;  %5202 = vst [vmem:[%s8137_s24 + $0x18] sm:$0xff] (%p6665_p3), %v5201_v57  ;;  %v5229_v10 = vld [vmem:[%s6708_s25 + $0x88] sm:$0xff] (%p6665_p3)  ;;  %v5231_v11 = vld [vmem:[%s6708_s25 + $0x90] sm:$0xff] (%p6665_p3) }
 0x501   : > { %5204 = vst [vmem:[%s8137_s24 + $0x20] sm:$0xff] %v5203_v59  ;;  %5206 = vst [vmem:[%s8137_s24 + $0x28] sm:$0xff] %v5205_v61  ;;  %v5233_v12 = vld [vmem:[%s6708_s25 + $0x98] sm:$0xff]  ;;  %v5235_v13 = vld [vmem:[%s6708_s25 + $0xa0] sm:$0xff] }
 0x502   : > { %5208 = vst [vmem:[%s8137_s24 + $0x30] sm:$0xff] %v5207_v62  ;;  %5210 = vst [vmem:[%s8137_s24 + $0x38] sm:$0xff] %v5209_v63  ;;  %v5237_v14 = vld [vmem:[%s6708_s25 + $0xa8] sm:$0xff]  ;;  %v5239_v15 = vld [vmem:[%s6708_s25 + $0xb0] sm:$0xff] }
 0x503   : > { %5212 = vst [vmem:[%s8137_s24 + $0x40] sm:$0xff] %v5211_v31  ;;  %5214 = vst [vmem:[%s8137_s24 + $0x48] sm:$0xff] %v5213_v0  ;;  %v5241_v16 = vld [vmem:[%s6708_s25 + $0xb8] sm:$0xff]  ;;  %v5243_v17 = vld [vmem:[%s6708_s25 + $0xc0] sm:$0xff] }
 0x504   : > { %5216 = vst [vmem:[%s8137_s24 + $0x50] sm:$0xff] %v5215_v1  ;;  %5218 = vst [vmem:[%s8137_s24 + $0x58] sm:$0xff] %v5217_v2  ;;  %v5245_v18 = vld [vmem:[%s6708_s25 + $0xc8] sm:$0xff]  ;;  %v5247_v20 = vld [vmem:[%s6708_s25 + $0xd0] sm:$0xff] }
 0x505   : > { %5220 = vst [vmem:[%s8137_s24 + $0x60] sm:$0xff] %v5219_v3  ;;  %5222 = vst [vmem:[%s8137_s24 + $0x68] sm:$0xff] %v5221_v4  ;;  %v5249_v21 = vld [vmem:[%s6708_s25 + $0xd8] sm:$0xff]  ;;  %v5251_v22 = vld [vmem:[%s6708_s25 + $0xe0] sm:$0xff] }
 0x506   : > { %5224 = vst [vmem:[%s8137_s24 + $0x70] sm:$0xff] %v5223_v5  ;;  %5226 = vst [vmem:[%s8137_s24 + $0x78] sm:$0xff] %v5225_v6  ;;  %v5253_v23 = vld [vmem:[%s6708_s25 + $0xe8] sm:$0xff]  ;;  %v5255_v24 = vld [vmem:[%s6708_s25 + $0xf0] sm:$0xff] }
 0x507   : > { %5228 = vst [vmem:[%s8137_s24 + $0x80] sm:$0xff] %v5227_v8  ;;  %5230 = vst [vmem:[%s8137_s24 + $0x88] sm:$0xff] %v5229_v10  ;;  %v5257_v7 = vld [vmem:[%s6708_s25 + $0xf8] sm:$0xff]  ;;  %v5259_v25 = vld [vmem:[%s6708_s25 + $0x100] sm:$0xff] }
 0x508   : > { %5232 = vst [vmem:[%s8137_s24 + $0x90] sm:$0xff] %v5231_v11  ;;  %5234 = vst [vmem:[%s8137_s24 + $0x98] sm:$0xff] %v5233_v12  ;;  %v5261_v27 = vld [vmem:[%s6708_s25 + $0x108] sm:$0xff]  ;;  %v5263_v28 = vld [vmem:[%s6708_s25 + $0x110] sm:$0xff] }
 0x509   : > { %5236 = vst [vmem:[%s8137_s24 + $0xa0] sm:$0xff] %v5235_v13  ;;  %5238 = vst [vmem:[%s8137_s24 + $0xa8] sm:$0xff] %v5237_v14  ;;  %v5265_v29 = vld [vmem:[%s6708_s25 + $0x118] sm:$0xff]  ;;  %v5267_v30 = vld [vmem:[%s6708_s25 + $0x120] sm:$0xff] }
 0x50a   : > { %5240 = vst [vmem:[%s8137_s24 + $0xb0] sm:$0xff] %v5239_v15  ;;  %5242 = vst [vmem:[%s8137_s24 + $0xb8] sm:$0xff] %v5241_v16  ;;  %v5269_v32 = vld [vmem:[%s6708_s25 + $0x128] sm:$0xff]  ;;  %v5271_v33 = vld [vmem:[%s6708_s25 + $0x130] sm:$0xff] }
 0x50b   : > { %5244 = vst [vmem:[%s8137_s24 + $0xc0] sm:$0xff] %v5243_v17  ;;  %5246 = vst [vmem:[%s8137_s24 + $0xc8] sm:$0xff] %v5245_v18  ;;  %v5273_v34 = vld [vmem:[%s6708_s25 + $0x138] sm:$0xff]  ;;  %v5275_v35 = vld [vmem:[%s6708_s25 + $0x140] sm:$0xff] }
 0x50c   : > { %5248 = vst [vmem:[%s8137_s24 + $0xd0] sm:$0xff] %v5247_v20  ;;  %5250 = vst [vmem:[%s8137_s24 + $0xd8] sm:$0xff] %v5249_v21  ;;  %v5277_v36 = vld [vmem:[%s6708_s25 + $0x148] sm:$0xff]  ;;  %v5279_v37 = vld [vmem:[%s6708_s25 + $0x150] sm:$0xff] }
 0x50d   : > { %5252 = vst [vmem:[%s8137_s24 + $0xe0] sm:$0xff] %v5251_v22  ;;  %5254 = vst [vmem:[%s8137_s24 + $0xe8] sm:$0xff] %v5253_v23  ;;  %v5281_v38 = vld [vmem:[%s6708_s25 + $0x158] sm:$0xff]  ;;  %v5283_v39 = vld [vmem:[%s6708_s25 + $0x160] sm:$0xff] }
 0x50e   : > { %5256 = vst [vmem:[%s8137_s24 + $0xf0] sm:$0xff] %v5255_v24  ;;  %5258 = vst [vmem:[%s8137_s24 + $0xf8] sm:$0xff] %v5257_v7  ;;  %v5285_v40 = vld [vmem:[%s6708_s25 + $0x168] sm:$0xff]  ;;  %v5287_v41 = vld [vmem:[%s6708_s25 + $0x170] sm:$0xff] }
 0x50f   : > { %5260 = vst [vmem:[%s8137_s24 + $0x400] sm:$0xff] %v5259_v25  ;;  %5262 = vst [vmem:[%s8137_s24 + $0x408] sm:$0xff] %v5261_v27  ;;  %v5289_v42 = vld [vmem:[%s6708_s25 + $0x178] sm:$0xff]  ;;  %v5291_v43 = vld [vmem:[%s6708_s25 + $0x180] sm:$0xff] }
 0x510   : > { %5264 = vst [vmem:[%s8137_s24 + $0x410] sm:$0xff] %v5263_v28  ;;  %5266 = vst [vmem:[%s8137_s24 + $0x418] sm:$0xff] %v5265_v29  ;;  %v5293_v44 = vld [vmem:[%s6708_s25 + $0x188] sm:$0xff]  ;;  %v5295_v45 = vld [vmem:[%s6708_s25 + $0x190] sm:$0xff] }
 0x511   : > { %5268 = vst [vmem:[%s8137_s24 + $0x420] sm:$0xff] %v5267_v30  ;;  %5270 = vst [vmem:[%s8137_s24 + $0x428] sm:$0xff] %v5269_v32  ;;  %v5297_v46 = vld [vmem:[%s6708_s25 + $0x198] sm:$0xff]  ;;  %v5299_v9 = vld [vmem:[%s6708_s25 + $0x1a0] sm:$0xff] }
 0x512   : > { %5272 = vst [vmem:[%s8137_s24 + $0x430] sm:$0xff] %v5271_v33  ;;  %5274 = vst [vmem:[%s8137_s24 + $0x438] sm:$0xff] %v5273_v34  ;;  %v5301_v47 = vld [vmem:[%s6708_s25 + $0x1a8] sm:$0xff]  ;;  %v5303_v48 = vld [vmem:[%s6708_s25 + $0x1b0] sm:$0xff] }
 0x513   : > { %5276 = vst [vmem:[%s8137_s24 + $0x440] sm:$0xff] %v5275_v35  ;;  %5278 = vst [vmem:[%s8137_s24 + $0x448] sm:$0xff] %v5277_v36  ;;  %v5305_v49 = vld [vmem:[%s6708_s25 + $0x1b8] sm:$0xff]  ;;  %v5307_v58 = vld [vmem:[%s6708_s25 + $0x1c0] sm:$0xff] }
 0x514   : > { %5280 = vst [vmem:[%s8137_s24 + $0x450] sm:$0xff] %v5279_v37  ;;  %5282 = vst [vmem:[%s8137_s24 + $0x458] sm:$0xff] %v5281_v38  ;;  %v5309_v26 = vld [vmem:[%s6708_s25 + $0x1c8] sm:$0xff]  ;;  %v5311_v60 = vld [vmem:[%s6708_s25 + $0x1d0] sm:$0xff] }
 0x515   : > { %5284 = vst [vmem:[%s8137_s24 + $0x460] sm:$0xff] %v5283_v39  ;;  %5286 = vst [vmem:[%s8137_s24 + $0x468] sm:$0xff] %v5285_v40  ;;  %v5313_v50 = vld [vmem:[%s6708_s25 + $0x1d8] sm:$0xff]  ;;  %v5315_v51 = vld [vmem:[%s6708_s25 + $0x1e0] sm:$0xff] }
 0x516   : > { %5288 = vst [vmem:[%s8137_s24 + $0x470] sm:$0xff] %v5287_v41  ;;  %5290 = vst [vmem:[%s8137_s24 + $0x478] sm:$0xff] %v5289_v42  ;;  %v5317_v52 = vld [vmem:[%s6708_s25 + $0x1e8] sm:$0xff]  ;;  %v5319_v19 = vld [vmem:[%s6708_s25 + $0x1f0] sm:$0xff] }
 0x517   : > { %5292 = vst [vmem:[%s8137_s24 + $0x480] sm:$0xff] %v5291_v43  ;;  %5294 = vst [vmem:[%s8137_s24 + $0x488] sm:$0xff] %v5293_v44  ;;  %v5321_v53 = vld [vmem:[%s6708_s25 + $0x1f8] sm:$0xff]  ;;  %v5323_v54 = vld [vmem:[%s6708_s25 + $0x200] sm:$0xff] }
 0x518   : > { %5296 = vst [vmem:[%s8137_s24 + $0x490] sm:$0xff] %v5295_v45  ;;  %5298 = vst [vmem:[%s8137_s24 + $0x498] sm:$0xff] %v5297_v46  ;;  %v5325_v55 = vld [vmem:[%s6708_s25 + $0x208] sm:$0xff]  ;;  %v5327_v56 = vld [vmem:[%s6708_s25 + $0x210] sm:$0xff] }
 0x519   : > { %5300 = vst [vmem:[%s8137_s24 + $0x4a0] sm:$0xff] %v5299_v9  ;;  %5302 = vst [vmem:[%s8137_s24 + $0x4a8] sm:$0xff] %v5301_v47  ;;  %v5329_v57 = vld [vmem:[%s6708_s25 + $0x218] sm:$0xff]  ;;  %v5331_v59 = vld [vmem:[%s6708_s25 + $0x220] sm:$0xff] }
 0x51a   : > { %5304 = vst [vmem:[%s8137_s24 + $0x4b0] sm:$0xff] %v5303_v48  ;;  %5306 = vst [vmem:[%s8137_s24 + $0x4b8] sm:$0xff] %v5305_v49  ;;  %v5333_v61 = vld [vmem:[%s6708_s25 + $0x228] sm:$0xff]  ;;  %v5335_v62 = vld [vmem:[%s6708_s25 + $0x230] sm:$0xff] }
 0x51b   : > { %5308 = vst [vmem:[%s8137_s24 + $0x4c0] sm:$0xff] %v5307_v58  ;;  %5310 = vst [vmem:[%s8137_s24 + $0x4c8] sm:$0xff] %v5309_v26  ;;  %v5337_v63 = vld [vmem:[%s6708_s25 + $0x238] sm:$0xff]  ;;  %v5339_v31 = vld [vmem:[%s6708_s25 + $0x240] sm:$0xff] }
 0x51c   : > { %5312 = vst [vmem:[%s8137_s24 + $0x4d0] sm:$0xff] %v5311_v60  ;;  %5314 = vst [vmem:[%s8137_s24 + $0x4d8] sm:$0xff] %v5313_v50  ;;  %v5341_v0 = vld [vmem:[%s6708_s25 + $0x248] sm:$0xff]  ;;  %v5343_v1 = vld [vmem:[%s6708_s25 + $0x250] sm:$0xff] }
 0x51d   : > { %5316 = vst [vmem:[%s8137_s24 + $0x4e0] sm:$0xff] %v5315_v51  ;;  %5318 = vst [vmem:[%s8137_s24 + $0x4e8] sm:$0xff] %v5317_v52  ;;  %v5345_v2 = vld [vmem:[%s6708_s25 + $0x258] sm:$0xff]  ;;  %v5347_v3 = vld [vmem:[%s6708_s25 + $0x260] sm:$0xff] }
 0x51e   : > { %5320 = vst [vmem:[%s8137_s24 + $0x4f0] sm:$0xff] %v5319_v19  ;;  %5322 = vst [vmem:[%s8137_s24 + $0x4f8] sm:$0xff] %v5321_v53  ;;  %v5349_v4 = vld [vmem:[%s6708_s25 + $0x268] sm:$0xff]  ;;  %v5351_v5 = vld [vmem:[%s6708_s25 + $0x270] sm:$0xff] }
 0x51f   : > { %5324 = vst [vmem:[%s8137_s24 + $0x800] sm:$0xff] %v5323_v54  ;;  %5326 = vst [vmem:[%s8137_s24 + $0x808] sm:$0xff] %v5325_v55  ;;  %v5353_v6 = vld [vmem:[%s6708_s25 + $0x278] sm:$0xff]  ;;  %v5355_v8 = vld [vmem:[%s6708_s25 + $0x280] sm:$0xff] }
 0x520   : > { %5328 = vst [vmem:[%s8137_s24 + $0x810] sm:$0xff] %v5327_v56  ;;  %5330 = vst [vmem:[%s8137_s24 + $0x818] sm:$0xff] %v5329_v57  ;;  %v5357_v10 = vld [vmem:[%s6708_s25 + $0x288] sm:$0xff]  ;;  %v5359_v11 = vld [vmem:[%s6708_s25 + $0x290] sm:$0xff] }
 0x521   : > { %5332 = vst [vmem:[%s8137_s24 + $0x820] sm:$0xff] %v5331_v59  ;;  %5334 = vst [vmem:[%s8137_s24 + $0x828] sm:$0xff] %v5333_v61  ;;  %v5361_v12 = vld [vmem:[%s6708_s25 + $0x298] sm:$0xff]  ;;  %v5363_v13 = vld [vmem:[%s6708_s25 + $0x2a0] sm:$0xff] }
 0x522   : > { %5336 = vst [vmem:[%s8137_s24 + $0x830] sm:$0xff] %v5335_v62  ;;  %5338 = vst [vmem:[%s8137_s24 + $0x838] sm:$0xff] %v5337_v63  ;;  %v5365_v14 = vld [vmem:[%s6708_s25 + $0x2a8] sm:$0xff]  ;;  %v5367_v15 = vld [vmem:[%s6708_s25 + $0x2b0] sm:$0xff] }
 0x523   : > { %5340 = vst [vmem:[%s8137_s24 + $0x840] sm:$0xff] %v5339_v31  ;;  %5342 = vst [vmem:[%s8137_s24 + $0x848] sm:$0xff] %v5341_v0  ;;  %v5369_v16 = vld [vmem:[%s6708_s25 + $0x2b8] sm:$0xff]  ;;  %v5371_v17 = vld [vmem:[%s6708_s25 + $0x2c0] sm:$0xff] }
 0x524   : > { %5344 = vst [vmem:[%s8137_s24 + $0x850] sm:$0xff] %v5343_v1  ;;  %5346 = vst [vmem:[%s8137_s24 + $0x858] sm:$0xff] %v5345_v2  ;;  %v5373_v18 = vld [vmem:[%s6708_s25 + $0x2c8] sm:$0xff]  ;;  %v5375_v20 = vld [vmem:[%s6708_s25 + $0x2d0] sm:$0xff] }
 0x525   : > { %5348 = vst [vmem:[%s8137_s24 + $0x860] sm:$0xff] %v5347_v3  ;;  %5350 = vst [vmem:[%s8137_s24 + $0x868] sm:$0xff] %v5349_v4  ;;  %v5377_v21 = vld [vmem:[%s6708_s25 + $0x2d8] sm:$0xff]  ;;  %v5379_v22 = vld [vmem:[%s6708_s25 + $0x2e0] sm:$0xff] }
 0x526   : > { %5352 = vst [vmem:[%s8137_s24 + $0x870] sm:$0xff] %v5351_v5  ;;  %5354 = vst [vmem:[%s8137_s24 + $0x878] sm:$0xff] %v5353_v6  ;;  %v5381_v23 = vld [vmem:[%s6708_s25 + $0x2e8] sm:$0xff]  ;;  %v5383_v24 = vld [vmem:[%s6708_s25 + $0x2f0] sm:$0xff] }
 0x527   : > { %5356 = vst [vmem:[%s8137_s24 + $0x880] sm:$0xff] %v5355_v8  ;;  %5358 = vst [vmem:[%s8137_s24 + $0x888] sm:$0xff] %v5357_v10  ;;  %v5385_v7 = vld [vmem:[%s6708_s25 + $0x2f8] sm:$0xff]  ;;  %v5387_v25 = vld [vmem:[%s6708_s25 + $0x300] sm:$0xff] }
 0x528   : > { %5360 = vst [vmem:[%s8137_s24 + $0x890] sm:$0xff] %v5359_v11  ;;  %5362 = vst [vmem:[%s8137_s24 + $0x898] sm:$0xff] %v5361_v12  ;;  %v5389_v27 = vld [vmem:[%s6708_s25 + $0x308] sm:$0xff]  ;;  %v5391_v28 = vld [vmem:[%s6708_s25 + $0x310] sm:$0xff] }
 0x529   : > { %5364 = vst [vmem:[%s8137_s24 + $0x8a0] sm:$0xff] %v5363_v13  ;;  %5366 = vst [vmem:[%s8137_s24 + $0x8a8] sm:$0xff] %v5365_v14  ;;  %v5393_v29 = vld [vmem:[%s6708_s25 + $0x318] sm:$0xff]  ;;  %v5395_v30 = vld [vmem:[%s6708_s25 + $0x320] sm:$0xff] }
 0x52a   : > { %5368 = vst [vmem:[%s8137_s24 + $0x8b0] sm:$0xff] %v5367_v15  ;;  %5370 = vst [vmem:[%s8137_s24 + $0x8b8] sm:$0xff] %v5369_v16  ;;  %v5397_v32 = vld [vmem:[%s6708_s25 + $0x328] sm:$0xff]  ;;  %v5399_v33 = vld [vmem:[%s6708_s25 + $0x330] sm:$0xff] }
 0x52b   : > { %5372 = vst [vmem:[%s8137_s24 + $0x8c0] sm:$0xff] %v5371_v17  ;;  %5374 = vst [vmem:[%s8137_s24 + $0x8c8] sm:$0xff] %v5373_v18  ;;  %v5401_v34 = vld [vmem:[%s6708_s25 + $0x338] sm:$0xff]  ;;  %v5403_v35 = vld [vmem:[%s6708_s25 + $0x340] sm:$0xff] }
 0x52c   : > { %5376 = vst [vmem:[%s8137_s24 + $0x8d0] sm:$0xff] %v5375_v20  ;;  %5378 = vst [vmem:[%s8137_s24 + $0x8d8] sm:$0xff] %v5377_v21  ;;  %v5405_v36 = vld [vmem:[%s6708_s25 + $0x348] sm:$0xff]  ;;  %v5407_v37 = vld [vmem:[%s6708_s25 + $0x350] sm:$0xff] }
 0x52d   : > { %5380 = vst [vmem:[%s8137_s24 + $0x8e0] sm:$0xff] %v5379_v22  ;;  %5382 = vst [vmem:[%s8137_s24 + $0x8e8] sm:$0xff] %v5381_v23  ;;  %v5409_v38 = vld [vmem:[%s6708_s25 + $0x358] sm:$0xff]  ;;  %v5411_v39 = vld [vmem:[%s6708_s25 + $0x360] sm:$0xff] }
 0x52e   : > { %5384 = vst [vmem:[%s8137_s24 + $0x8f0] sm:$0xff] %v5383_v24  ;;  %5386 = vst [vmem:[%s8137_s24 + $0x8f8] sm:$0xff] %v5385_v7  ;;  %v5413_v40 = vld [vmem:[%s6708_s25 + $0x368] sm:$0xff]  ;;  %v5415_v41 = vld [vmem:[%s6708_s25 + $0x370] sm:$0xff] }
 0x52f   : > { %5388 = vst [vmem:[%s8137_s24 + $0xc00] sm:$0xff] %v5387_v25  ;;  %5390 = vst [vmem:[%s8137_s24 + $0xc08] sm:$0xff] %v5389_v27  ;;  %v5417_v42 = vld [vmem:[%s6708_s25 + $0x378] sm:$0xff]  ;;  %v5419_v43 = vld [vmem:[%s6708_s25 + $0x380] sm:$0xff] }
 0x530   : > { %5392 = vst [vmem:[%s8137_s24 + $0xc10] sm:$0xff] %v5391_v28  ;;  %5394 = vst [vmem:[%s8137_s24 + $0xc18] sm:$0xff] %v5393_v29  ;;  %v5421_v44 = vld [vmem:[%s6708_s25 + $0x388] sm:$0xff]  ;;  %v5423_v45 = vld [vmem:[%s6708_s25 + $0x390] sm:$0xff] }
 0x531   : > { %5396 = vst [vmem:[%s8137_s24 + $0xc20] sm:$0xff] %v5395_v30  ;;  %5398 = vst [vmem:[%s8137_s24 + $0xc28] sm:$0xff] %v5397_v32  ;;  %v5425_v46 = vld [vmem:[%s6708_s25 + $0x398] sm:$0xff]  ;;  %v5427_v9 = vld [vmem:[%s6708_s25 + $0x3a0] sm:$0xff] }
 0x532   : > { %5400 = vst [vmem:[%s8137_s24 + $0xc30] sm:$0xff] %v5399_v33  ;;  %5402 = vst [vmem:[%s8137_s24 + $0xc38] sm:$0xff] %v5401_v34  ;;  %v5429_v47 = vld [vmem:[%s6708_s25 + $0x3a8] sm:$0xff]  ;;  %v5431_v48 = vld [vmem:[%s6708_s25 + $0x3b0] sm:$0xff] }
 0x533   : > { %5404 = vst [vmem:[%s8137_s24 + $0xc40] sm:$0xff] %v5403_v35  ;;  %5406 = vst [vmem:[%s8137_s24 + $0xc48] sm:$0xff] %v5405_v36  ;;  %v5433_v49 = vld [vmem:[%s6708_s25 + $0x3b8] sm:$0xff]  ;;  %v5435_v58 = vld [vmem:[%s6708_s25 + $0x3c0] sm:$0xff] }
 0x534   : > { %5408 = vst [vmem:[%s8137_s24 + $0xc50] sm:$0xff] %v5407_v37  ;;  %5410 = vst [vmem:[%s8137_s24 + $0xc58] sm:$0xff] %v5409_v38  ;;  %v5437_v26 = vld [vmem:[%s6708_s25 + $0x3c8] sm:$0xff]  ;;  %v5439_v60 = vld [vmem:[%s6708_s25 + $0x3d0] sm:$0xff] }
 0x535   : > { %5412 = vst [vmem:[%s8137_s24 + $0xc60] sm:$0xff] %v5411_v39  ;;  %5414 = vst [vmem:[%s8137_s24 + $0xc68] sm:$0xff] %v5413_v40  ;;  %v5441_v50 = vld [vmem:[%s6708_s25 + $0x3d8] sm:$0xff]  ;;  %v5443_v51 = vld [vmem:[%s6708_s25 + $0x3e0] sm:$0xff] }
 0x536   : > { %5416 = vst [vmem:[%s8137_s24 + $0xc70] sm:$0xff] %v5415_v41  ;;  %5418 = vst [vmem:[%s8137_s24 + $0xc78] sm:$0xff] %v5417_v42  ;;  %v5445_v52 = vld [vmem:[%s6708_s25 + $0x3e8] sm:$0xff]  ;;  %v5447_v19 = vld [vmem:[%s6708_s25 + $0x3f0] sm:$0xff] }
 0x537   : > { %5420 = vst [vmem:[%s8137_s24 + $0xc80] sm:$0xff] %v5419_v43  ;;  %5422 = vst [vmem:[%s8137_s24 + $0xc88] sm:$0xff] %v5421_v44  ;;  %v5449_v53 = vld [vmem:[%s6708_s25 + $0x3f8] sm:$0xff] }
 0x538   : > { %5424 = vst [vmem:[%s8137_s24 + $0xc90] sm:$0xff] %v5423_v45  ;;  %5426 = vst [vmem:[%s8137_s24 + $0xc98] sm:$0xff] %v5425_v46 }
 0x539   : > { %5428 = vst [vmem:[%s8137_s24 + $0xca0] sm:$0xff] %v5427_v9  ;;  %5430 = vst [vmem:[%s8137_s24 + $0xca8] sm:$0xff] %v5429_v47 }
 0x53a   : > { %5432 = vst [vmem:[%s8137_s24 + $0xcb0] sm:$0xff] %v5431_v48  ;;  %5434 = vst [vmem:[%s8137_s24 + $0xcb8] sm:$0xff] %v5433_v49 }
 0x53b   : > { %5436 = vst [vmem:[%s8137_s24 + $0xcc0] sm:$0xff] %v5435_v58  ;;  %5438 = vst [vmem:[%s8137_s24 + $0xcc8] sm:$0xff] %v5437_v26 }
 0x53c   : > { %5440 = vst [vmem:[%s8137_s24 + $0xcd0] sm:$0xff] %v5439_v60  ;;  %5442 = vst [vmem:[%s8137_s24 + $0xcd8] sm:$0xff] %v5441_v50 }
 0x53d   : > { %5444 = vst [vmem:[%s8137_s24 + $0xce0] sm:$0xff] %v5443_v51  ;;  %5446 = vst [vmem:[%s8137_s24 + $0xce8] sm:$0xff] %v5445_v52 }
 0x53e   : > { %5448 = vst [vmem:[%s8137_s24 + $0xcf0] sm:$0xff] %v5447_v19  ;;  %5450 = vst [vmem:[%s8137_s24 + $0xcf8] sm:$0xff] %v5449_v53 }
 0x53f PF: > { %s5902_s23 = sshll.u32 %s6529_s19, 4  ;;  %s5463_s12 = sshll.u32 %s6712_s16, 4  ;;  %s5464_s12 = int_to_ptr.vmem [resolvable:$true] %s5463_s12 }
 0x540   : > { %s5461_s30 = scalar_lea.hbm %s8448_s10, %s5902_s23  ;;  %s6431_s13 = scalar_lea.vmem %s5464_s12, 16 }
 0x541   : > { %p6432_p3 = scmp.ne.s32.totalorder %s5464_s12, %s6431_s13  ;;  %s6547_s17 = smov [#allocation4]  }
 0x542   : > { %s6435_s25 = sshll.u32 %s6547_s17, 4  ;;  %s6436_s25 = int_to_ptr.vmem [resolvable:$false] %s6435_s25 }
 0x543   : > { %p6433_p6 = pnand %p6432_p3, %p6676_p7  ;;  %s6437_s28 = scalar_lea.vmem %s6436_s25, 32 }
 0x544   : > { %p6438_p9 = scmp.lt.s32.totalorder %s5464_s12, %s6436_s25  ;;  %p6439_p10 = scmp.lt.s32.totalorder %s6437_s28, %s6431_s13 }
 0x545   : > { %p6434_p8 = pneg %p6433_p6 }
 0x546   : > { %p6440_p11 = por %p6439_p10, %p6438_p9 }
 0x548   : > { %p6441_p13 = pnand %p6440_p11, %p6434_p8 }
 0x54a   : > { %6444 = shalt.err (!%p6441_p13)
}
 0x54b   : > { %s6445_s19 = scalar_lea.hbm %s5461_s30, 16  ;;  %s6449_s20 = scalar_lea.hbm %s8448_s10, 32 }
 0x54c   : > { %p6446_p0 = scmp.ne.s32.totalorder %s5461_s30, %s6445_s19  ;;  %p6450_p4 = scmp.lt.u32.totalorder %s5461_s30, %s8448_s10 }
 0x54d   : > { %p6451_p5 = scmp.lt.u32.totalorder %s6449_s20, %s6445_s19  ;;  %p6453_p6 = scmp.lt.u32.totalorder %s6445_s19, %s5461_s30 }
 0x54e   : > { %p6447_p1 = pnand %p6446_p0, %p6676_p7 }
 0x54f   : > { %p6452_p3 = por %p6451_p5, %p6450_p4 }
 0x550   : > { %p6448_p2 = pneg %p6447_p1 }
 0x551   : > { %p6454_p9 = por %p6453_p6, %p6452_p3 }
 0x553   : > { %p6455_p8 = pnand %p6454_p9, %p6448_p2 }
 0x555   : > { %6458 = shalt.err (!%p6455_p8)
}
 0x556   : > { %6303 = dma.vmem_to_hbm [thread:$0]  (%p6676_p7), %s5464_s12, 16, %s5461_s30, %s8119_s18  }
 0x557 PF: > { %s8472_s24 = sld [smem:[#allocation7_spill]]  ;;  %p6309_p10 = scmp.ge.s32.totalorder %s6541_s22, 2 }
 0x559   : > { %p6306_p11 = pnand %p6309_p10, %p6683_p12 }
 0x55d   : > { %s5482_s27 = sand.u32 1, %s8472_s24  }
 0x55e   : > { %s5483_s15 = scalar_lea.sflag [#allocation5], %s5482_s27 }
 0x55f   : > { %6500 = dma.done.wait (!%p6306_p11), %s5483_s15, 16  }
 0x560   : > { %6502 = vsyncadd (!%p6306_p11), %s5483_s15, 4294967280  ;;  %s24_s22 = sadd.s32 1, %s6541_s22   ;;  %s8474_s17 = sld [smem:[#allocation8_spill]] }
 0x561   : > { %p21_p13 = scmp.ge.s32.totalorder %s24_s22, 10   ;;  %s8475_s15 = sld [smem:[#allocation15_spill]] }
 0x562   : > { %s8476_s16 = sld [smem:[#allocation9_spill]]  ;;  %s8477_s11 = sld [smem:[#allocation16_spill]] }
 0x563   : > { %s8478_s18 = sld [smem:[#allocation10_spill]]  ;;  %s8479_s19 = sld [smem:[#allocation11_spill]] }
 0x564   : > { %s8480_s20 = sld [smem:[#allocation12_spill]]  ;;  %s8481_s21 = sld [smem:[#allocation13_spill]] }
 0x565   : > { %s8482_s13 = smov %s6509_s14  ;;  %23 = sbr.rel (!%p21_p13) target bundleno = 6 (0x6), region = 134 }
 0x566   : > { %s8483_s14 = smov %s8474_s17 }
 0x568   : > { %s8484_s17 = smov %s8477_s11 }
 0x56c   :  { %5487 = vsyncpa [#allocation5], 1 }
 0x56d   :  { %5489 = vsyncpa [#allocation5 + $0x1], 1 }

</bundles_post_ra>
